<compile_context>
chip_gen: v5e
topology: v5e:2x2
jax: 0.10.0
libtpu: 0.0.40
codegen_flags: <defaults>
</compile_context>

<pallas_src>
import jax
import jax.numpy as jnp
from jax import lax
from jax.experimental import pallas as pl
from jax.experimental.pallas import tpu as pltpu

KSIZE = 7
PAD = (KSIZE - 1) // 2  # 3

# VMEM budget for the double-buffered (in + out) x blocks, with headroom.
_BLOCK_BUDGET_BYTES = 24 << 20
_VMEM_LIMIT_BYTES = 48 << 20  # <= 64 MiB physical on v7x, well under v5e/v6e


def _make_kernel(H, W):
    def spatial_gate_kernel(w_ref, bn_ref, x_ref, o_ref):
        # w_ref:  SMEM (2*7*7,) conv weight with BN scale folded in (OIHW flat)
        # bn_ref: SMEM (1,)     folded BN shift
        # x_ref:  VMEM (TB, C, H*W)   lane-dense
        # o_ref:  VMEM (TB, C, H*W)   lane-dense
        x = x_ref[...]                                   # (TB, C, HW)
        TB, C, HW = x.shape

        # --- ChannelPool: max & mean over C (lane-dense reduce) ---
        xmax = jnp.max(x, axis=1)                        # (TB, HW)
        xmean = jnp.sum(x, axis=1) * (1.0 / C)           # (TB, HW)

        # --- 7x7 conv, 2 -> 1 channel, zero pad 3, no bias ---
        # Tiny data (2 maps / batch elem): reshape to (TB, H, W) just for the conv.
        comp = (xmax.reshape(TB, H, W), xmean.reshape(TB, H, W))
        acc = jnp.zeros((TB, H, W), jnp.float32)
        for c in range(2):
            padded = jnp.pad(comp[c], ((0, 0), (PAD, PAD), (PAD, PAD)))
            for kh in range(KSIZE):
                rows = padded[:, kh:kh + H, :]           # hoisted out of kw loop
                for kw in range(KSIZE):
                    w = w_ref[c * KSIZE * KSIZE + kh * KSIZE + kw]
                    acc = acc + rows[:, :, kw:kw + W] * w

        # --- BatchNorm shift (scale folded into weights) + sigmoid ---
        gate = jax.nn.sigmoid(acc + bn_ref[0])           # (TB, H, W)

        # --- apply gate: lane-dense broadcast multiply + store ---
        o_ref[...] = x * gate.reshape(TB, 1, HW)

    return spatial_gate_kernel


def _pick_batch_tile(N, C, HW):
    """Largest divisor of N that fits the VMEM budget; prefer >=2 grid steps."""
    per_batch = 4 * C * HW * 4  # in + out, double-buffered, f32
    tb_max = max(1, _BLOCK_BUDGET_BYTES // per_batch)
    tb_cap = min(tb_max, N if N < 2 else max(1, N // 2))  # keep megacore busy
    tb = 1
    for d in range(1, int(tb_cap) + 1):
        if N % d == 0:
            tb = d
    return tb


def spatial_gate(x, conv_w, bn_gamma, bn_beta, bn_mean, bn_var, eps=1e-5):
    """x: (N, C, H, W) f32; conv_w: (1, 2, 7, 7) f32; bn_*: (1,) f32."""
    N, C, H, W = x.shape
    HW = H * W

    # Fold BN (eval mode) into the conv: y = conv(x)*scale + shift.
    bn_scale = bn_gamma / jnp.sqrt(bn_var + eps)                    # (1,)
    bn_shift = (bn_beta - bn_mean * bn_scale).astype(jnp.float32)   # (1,)
    w_flat = (conv_w * bn_scale[0]).reshape(-1).astype(jnp.float32)  # (98,)

    x2 = x.reshape(N, C, HW)  # lane-dense layout for the BW-bound path
    TB = _pick_batch_tile(N, C, HW)
    # TODO(synk): for feature maps so large that a single (C, H*W) slice blows the
    # VMEM budget, add an H-tiled grid with a 3-row halo for the 7x7 conv.

    out2 = pl.pallas_call(
        _make_kernel(H, W),
        out_shape=jax.ShapeDtypeStruct((N, C, HW), x.dtype),
        grid=(N // TB,),
        in_specs=[
            pl.BlockSpec(memory_space=pltpu.MemorySpace.SMEM),       # conv w (BN-scaled)
            pl.BlockSpec(memory_space=pltpu.MemorySpace.SMEM),       # BN shift
            pl.BlockSpec((TB, C, HW), lambda n: (n, 0, 0)),          # x, lane-dense
        ],
        out_specs=pl.BlockSpec((TB, C, HW), lambda n: (n, 0, 0)),
        compiler_params=pltpu.CompilerParams(
            dimension_semantics=("parallel",),
            vmem_limit_bytes=_VMEM_LIMIT_BYTES),
    )(w_flat, bn_shift, x2)
    return out2.reshape(N, C, H, W)


def spatial_gate_ref(x, conv_w, bn_gamma, bn_beta, bn_mean, bn_var, eps=1e-5):
    """Pure-JAX reference mirroring the PyTorch forward (BN in eval mode)."""
    xmax = jnp.max(x, axis=1, keepdims=True)
    xmean = jnp.mean(x, axis=1, keepdims=True)
    comp = jnp.concatenate([xmax, xmean], axis=1)                    # (N, 2, H, W)
    y = lax.conv_general_dilated(
        comp, conv_w, window_strides=(1, 1), padding=((PAD, PAD), (PAD, PAD)),
        dimension_numbers=("NCHW", "OIHW", "NCHW"))
    y = (y - bn_mean.reshape(1, -1, 1, 1)) / jnp.sqrt(
        bn_var.reshape(1, -1, 1, 1) + eps)
    y = y * bn_gamma.reshape(1, -1, 1, 1) + bn_beta.reshape(1, -1, 1, 1)
    return x * jax.nn.sigmoid(y)


if __name__ == "__main__":
    key = jax.random.PRNGKey(0)
    kx, kw = jax.random.split(key)

    N, C, H, W = 2, 4, 16, 16
    x = jax.random.normal(kx, (N, C, H, W), dtype=jnp.float32)

    # Deterministic parameter init (synthetic; shapes follow the module).
    conv_w = 0.1 * jax.random.normal(kw, (1, 2, KSIZE, KSIZE), dtype=jnp.float32)
    bn_gamma = jnp.ones((1,), jnp.float32)
    bn_beta = jnp.zeros((1,), jnp.float32)
    bn_mean = jnp.zeros((1,), jnp.float32)   # BatchNorm2d default running stats
    bn_var = jnp.ones((1,), jnp.float32)

    out = spatial_gate(x, conv_w, bn_gamma, bn_beta, bn_mean, bn_var)
    out = jax.block_until_ready(out)

    ref = spatial_gate_ref(x, conv_w, bn_gamma, bn_beta, bn_mean, bn_var)
    assert out.shape == (N, C, H, W)
    assert jnp.allclose(out, ref, atol=1e-4, rtol=1e-4), "mismatch vs reference"

    print("KERNEL_OK")
</pallas_src>

<mosaic_0001>
module attributes {stable_mosaic.version = 11 : i64} {
  func.func @spatial_gate_kernel(%arg0: i32, %arg1: memref<98xf32, #tpu.memory_space<smem>>, %arg2: memref<1xf32, #tpu.memory_space<smem>>, %arg3: memref<1x4x256xf32, #tpu.memory_space<vmem>>, %arg4: memref<1x4x256xf32, #tpu.memory_space<vmem>>) attributes {dimension_semantics = [#tpu.dimension_semantics<parallel>], iteration_bounds = array<i64: 2>, scalar_prefetch = 0 : i64, scratch_operands = 0 : i64, tpu.core_type = #tpu.core_type<tc>, window_params = [{transform_indices = @transform_0, window_bounds = array<i64: 98>}, {transform_indices = @transform_1, window_bounds = array<i64: 1>}, {transform_indices = @transform_2, window_bounds = array<i64: 1, 4, 256>}, {transform_indices = @transform_3, window_bounds = array<i64: 1, 4, 256>}]} {
    %c0 = arith.constant 0 : index
    %c0_0 = arith.constant 0 : index
    %c0_1 = arith.constant 0 : index
    %0 = vector.load %arg3[%c0, %c0_0, %c0_1] : memref<1x4x256xf32, #tpu.memory_space<vmem>>, vector<1x4x256xf32>
    %cst = arith.constant dense<0xFF800000> : vector<1x256xf32>
    %1 = vector.multi_reduction <maximumf>, %0, %cst [1] : vector<1x4x256xf32> to vector<1x256xf32>
    %cst_2 = arith.constant dense<0.000000e+00> : vector<1x256xf32>
    %2 = vector.multi_reduction <add>, %0, %cst_2 [1] : vector<1x4x256xf32> to vector<1x256xf32>
    %cst_3 = arith.constant 2.500000e-01 : f32
    %3 = vector.broadcast %cst_3 : f32 to vector<1x256xf32>
    %4 = arith.mulf %2, %3 : vector<1x256xf32>
    %5 = vector.shape_cast %1 : vector<1x256xf32> to vector<1x16x16xf32>
    %6 = vector.shape_cast %4 : vector<1x256xf32> to vector<1x16x16xf32>
    %cst_4 = arith.constant 0.000000e+00 : f32
    %7 = vector.broadcast %cst_4 : f32 to vector<1x16x16xf32>
    %c0_i32 = arith.constant 0 : i32
    %8 = arith.sitofp %c0_i32 : i32 to f32
    %9 = vector.broadcast %8 : f32 to vector<1x3x16xf32>
    %10 = tpu.concatenate %9, %5 in 1 : vector<1x3x16xf32>, vector<1x16x16xf32> -> vector<1x19x16xf32>
    %11 = vector.broadcast %8 : f32 to vector<1x3x16xf32>
    %12 = tpu.concatenate %10, %11 in 1 : vector<1x19x16xf32>, vector<1x3x16xf32> -> vector<1x22x16xf32>
    %13 = vector.broadcast %8 : f32 to vector<1x22x3xf32>
    %14 = tpu.concatenate %13, %12 in 2 : vector<1x22x3xf32>, vector<1x22x16xf32> -> vector<1x22x19xf32>
    %15 = vector.broadcast %8 : f32 to vector<1x22x3xf32>
    %16 = tpu.concatenate %14, %15 in 2 : vector<1x22x19xf32>, vector<1x22x3xf32> -> vector<1x22x22xf32>
    %17 = vector.extract_strided_slice %16 {offsets = [0, 0, 0], sizes = [1, 16, 22], strides = [1, 1, 1]} : vector<1x22x22xf32> to vector<1x16x22xf32>
    %c0_5 = arith.constant 0 : index
    %18 = memref.load %arg1[%c0_5] : memref<98xf32, #tpu.memory_space<smem>>
    %19 = vector.extract_strided_slice %17 {offsets = [0, 0, 0], sizes = [1, 16, 16], strides = [1, 1, 1]} : vector<1x16x22xf32> to vector<1x16x16xf32>
    %20 = vector.broadcast %18 : f32 to vector<1x16x16xf32>
    %21 = arith.mulf %19, %20 : vector<1x16x16xf32>
    %22 = arith.addf %7, %21 : vector<1x16x16xf32>
    %c1 = arith.constant 1 : index
    %23 = memref.load %arg1[%c1] : memref<98xf32, #tpu.memory_space<smem>>
    %24 = vector.extract_strided_slice %17 {offsets = [0, 0, 1], sizes = [1, 16, 16], strides = [1, 1, 1]} : vector<1x16x22xf32> to vector<1x16x16xf32>
    %25 = vector.broadcast %23 : f32 to vector<1x16x16xf32>
    %26 = arith.mulf %24, %25 : vector<1x16x16xf32>
    %27 = arith.addf %22, %26 : vector<1x16x16xf32>
    %c2 = arith.constant 2 : index
    %28 = memref.load %arg1[%c2] : memref<98xf32, #tpu.memory_space<smem>>
    %29 = vector.extract_strided_slice %17 {offsets = [0, 0, 2], sizes = [1, 16, 16], strides = [1, 1, 1]} : vector<1x16x22xf32> to vector<1x16x16xf32>
    %30 = vector.broadcast %28 : f32 to vector<1x16x16xf32>
    %31 = arith.mulf %29, %30 : vector<1x16x16xf32>
    %32 = arith.addf %27, %31 : vector<1x16x16xf32>
    %c3 = arith.constant 3 : index
    %33 = memref.load %arg1[%c3] : memref<98xf32, #tpu.memory_space<smem>>
    %34 = vector.extract_strided_slice %17 {offsets = [0, 0, 3], sizes = [1, 16, 16], strides = [1, 1, 1]} : vector<1x16x22xf32> to vector<1x16x16xf32>
    %35 = vector.broadcast %33 : f32 to vector<1x16x16xf32>
    %36 = arith.mulf %34, %35 : vector<1x16x16xf32>
    %37 = arith.addf %32, %36 : vector<1x16x16xf32>
    %c4 = arith.constant 4 : index
    %38 = memref.load %arg1[%c4] : memref<98xf32, #tpu.memory_space<smem>>
    %39 = vector.extract_strided_slice %17 {offsets = [0, 0, 4], sizes = [1, 16, 16], strides = [1, 1, 1]} : vector<1x16x22xf32> to vector<1x16x16xf32>
    %40 = vector.broadcast %38 : f32 to vector<1x16x16xf32>
    %41 = arith.mulf %39, %40 : vector<1x16x16xf32>
    %42 = arith.addf %37, %41 : vector<1x16x16xf32>
    %c5 = arith.constant 5 : index
    %43 = memref.load %arg1[%c5] : memref<98xf32, #tpu.memory_space<smem>>
    %44 = vector.extract_strided_slice %17 {offsets = [0, 0, 5], sizes = [1, 16, 16], strides = [1, 1, 1]} : vector<1x16x22xf32> to vector<1x16x16xf32>
    %45 = vector.broadcast %43 : f32 to vector<1x16x16xf32>
    %46 = arith.mulf %44, %45 : vector<1x16x16xf32>
    %47 = arith.addf %42, %46 : vector<1x16x16xf32>
    %c6 = arith.constant 6 : index
    %48 = memref.load %arg1[%c6] : memref<98xf32, #tpu.memory_space<smem>>
    %49 = vector.extract_strided_slice %17 {offsets = [0, 0, 6], sizes = [1, 16, 16], strides = [1, 1, 1]} : vector<1x16x22xf32> to vector<1x16x16xf32>
    %50 = vector.broadcast %48 : f32 to vector<1x16x16xf32>
    %51 = arith.mulf %49, %50 : vector<1x16x16xf32>
    %52 = arith.addf %47, %51 : vector<1x16x16xf32>
    %53 = vector.extract_strided_slice %16 {offsets = [0, 1, 0], sizes = [1, 16, 22], strides = [1, 1, 1]} : vector<1x22x22xf32> to vector<1x16x22xf32>
    %c7 = arith.constant 7 : index
    %54 = memref.load %arg1[%c7] : memref<98xf32, #tpu.memory_space<smem>>
    %55 = vector.extract_strided_slice %53 {offsets = [0, 0, 0], sizes = [1, 16, 16], strides = [1, 1, 1]} : vector<1x16x22xf32> to vector<1x16x16xf32>
    %56 = vector.broadcast %54 : f32 to vector<1x16x16xf32>
    %57 = arith.mulf %55, %56 : vector<1x16x16xf32>
    %58 = arith.addf %52, %57 : vector<1x16x16xf32>
    %c8 = arith.constant 8 : index
    %59 = memref.load %arg1[%c8] : memref<98xf32, #tpu.memory_space<smem>>
    %60 = vector.extract_strided_slice %53 {offsets = [0, 0, 1], sizes = [1, 16, 16], strides = [1, 1, 1]} : vector<1x16x22xf32> to vector<1x16x16xf32>
    %61 = vector.broadcast %59 : f32 to vector<1x16x16xf32>
    %62 = arith.mulf %60, %61 : vector<1x16x16xf32>
    %63 = arith.addf %58, %62 : vector<1x16x16xf32>
    %c9 = arith.constant 9 : index
    %64 = memref.load %arg1[%c9] : memref<98xf32, #tpu.memory_space<smem>>
    %65 = vector.extract_strided_slice %53 {offsets = [0, 0, 2], sizes = [1, 16, 16], strides = [1, 1, 1]} : vector<1x16x22xf32> to vector<1x16x16xf32>
    %66 = vector.broadcast %64 : f32 to vector<1x16x16xf32>
    %67 = arith.mulf %65, %66 : vector<1x16x16xf32>
    %68 = arith.addf %63, %67 : vector<1x16x16xf32>
    %c10 = arith.constant 10 : index
    %69 = memref.load %arg1[%c10] : memref<98xf32, #tpu.memory_space<smem>>
    %70 = vector.extract_strided_slice %53 {offsets = [0, 0, 3], sizes = [1, 16, 16], strides = [1, 1, 1]} : vector<1x16x22xf32> to vector<1x16x16xf32>
    %71 = vector.broadcast %69 : f32 to vector<1x16x16xf32>
    %72 = arith.mulf %70, %71 : vector<1x16x16xf32>
    %73 = arith.addf %68, %72 : vector<1x16x16xf32>
    %c11 = arith.constant 11 : index
    %74 = memref.load %arg1[%c11] : memref<98xf32, #tpu.memory_space<smem>>
    %75 = vector.extract_strided_slice %53 {offsets = [0, 0, 4], sizes = [1, 16, 16], strides = [1, 1, 1]} : vector<1x16x22xf32> to vector<1x16x16xf32>
    %76 = vector.broadcast %74 : f32 to vector<1x16x16xf32>
    %77 = arith.mulf %75, %76 : vector<1x16x16xf32>
    %78 = arith.addf %73, %77 : vector<1x16x16xf32>
    %c12 = arith.constant 12 : index
    %79 = memref.load %arg1[%c12] : memref<98xf32, #tpu.memory_space<smem>>
    %80 = vector.extract_strided_slice %53 {offsets = [0, 0, 5], sizes = [1, 16, 16], strides = [1, 1, 1]} : vector<1x16x22xf32> to vector<1x16x16xf32>
    %81 = vector.broadcast %79 : f32 to vector<1x16x16xf32>
    %82 = arith.mulf %80, %81 : vector<1x16x16xf32>
    %83 = arith.addf %78, %82 : vector<1x16x16xf32>
    %c13 = arith.constant 13 : index
    %84 = memref.load %arg1[%c13] : memref<98xf32, #tpu.memory_space<smem>>
    %85 = vector.extract_strided_slice %53 {offsets = [0, 0, 6], sizes = [1, 16, 16], strides = [1, 1, 1]} : vector<1x16x22xf32> to vector<1x16x16xf32>
    %86 = vector.broadcast %84 : f32 to vector<1x16x16xf32>
    %87 = arith.mulf %85, %86 : vector<1x16x16xf32>
    %88 = arith.addf %83, %87 : vector<1x16x16xf32>
    %89 = vector.extract_strided_slice %16 {offsets = [0, 2, 0], sizes = [1, 16, 22], strides = [1, 1, 1]} : vector<1x22x22xf32> to vector<1x16x22xf32>
    %c14 = arith.constant 14 : index
    %90 = memref.load %arg1[%c14] : memref<98xf32, #tpu.memory_space<smem>>
    %91 = vector.extract_strided_slice %89 {offsets = [0, 0, 0], sizes = [1, 16, 16], strides = [1, 1, 1]} : vector<1x16x22xf32> to vector<1x16x16xf32>
    %92 = vector.broadcast %90 : f32 to vector<1x16x16xf32>
    %93 = arith.mulf %91, %92 : vector<1x16x16xf32>
    %94 = arith.addf %88, %93 : vector<1x16x16xf32>
    %c15 = arith.constant 15 : index
    %95 = memref.load %arg1[%c15] : memref<98xf32, #tpu.memory_space<smem>>
    %96 = vector.extract_strided_slice %89 {offsets = [0, 0, 1], sizes = [1, 16, 16], strides = [1, 1, 1]} : vector<1x16x22xf32> to vector<1x16x16xf32>
    %97 = vector.broadcast %95 : f32 to vector<1x16x16xf32>
    %98 = arith.mulf %96, %97 : vector<1x16x16xf32>
    %99 = arith.addf %94, %98 : vector<1x16x16xf32>
    %c16 = arith.constant 16 : index
    %100 = memref.load %arg1[%c16] : memref<98xf32, #tpu.memory_space<smem>>
    %101 = vector.extract_strided_slice %89 {offsets = [0, 0, 2], sizes = [1, 16, 16], strides = [1, 1, 1]} : vector<1x16x22xf32> to vector<1x16x16xf32>
    %102 = vector.broadcast %100 : f32 to vector<1x16x16xf32>
    %103 = arith.mulf %101, %102 : vector<1x16x16xf32>
    %104 = arith.addf %99, %103 : vector<1x16x16xf32>
    %c17 = arith.constant 17 : index
    %105 = memref.load %arg1[%c17] : memref<98xf32, #tpu.memory_space<smem>>
    %106 = vector.extract_strided_slice %89 {offsets = [0, 0, 3], sizes = [1, 16, 16], strides = [1, 1, 1]} : vector<1x16x22xf32> to vector<1x16x16xf32>
    %107 = vector.broadcast %105 : f32 to vector<1x16x16xf32>
    %108 = arith.mulf %106, %107 : vector<1x16x16xf32>
    %109 = arith.addf %104, %108 : vector<1x16x16xf32>
    %c18 = arith.constant 18 : index
    %110 = memref.load %arg1[%c18] : memref<98xf32, #tpu.memory_space<smem>>
    %111 = vector.extract_strided_slice %89 {offsets = [0, 0, 4], sizes = [1, 16, 16], strides = [1, 1, 1]} : vector<1x16x22xf32> to vector<1x16x16xf32>
    %112 = vector.broadcast %110 : f32 to vector<1x16x16xf32>
    %113 = arith.mulf %111, %112 : vector<1x16x16xf32>
    %114 = arith.addf %109, %113 : vector<1x16x16xf32>
    %c19 = arith.constant 19 : index
    %115 = memref.load %arg1[%c19] : memref<98xf32, #tpu.memory_space<smem>>
    %116 = vector.extract_strided_slice %89 {offsets = [0, 0, 5], sizes = [1, 16, 16], strides = [1, 1, 1]} : vector<1x16x22xf32> to vector<1x16x16xf32>
    %117 = vector.broadcast %115 : f32 to vector<1x16x16xf32>
    %118 = arith.mulf %116, %117 : vector<1x16x16xf32>
    %119 = arith.addf %114, %118 : vector<1x16x16xf32>
    %c20 = arith.constant 20 : index
    %120 = memref.load %arg1[%c20] : memref<98xf32, #tpu.memory_space<smem>>
    %121 = vector.extract_strided_slice %89 {offsets = [0, 0, 6], sizes = [1, 16, 16], strides = [1, 1, 1]} : vector<1x16x22xf32> to vector<1x16x16xf32>
    %122 = vector.broadcast %120 : f32 to vector<1x16x16xf32>
    %123 = arith.mulf %121, %122 : vector<1x16x16xf32>
    %124 = arith.addf %119, %123 : vector<1x16x16xf32>
    %125 = vector.extract_strided_slice %16 {offsets = [0, 3, 0], sizes = [1, 16, 22], strides = [1, 1, 1]} : vector<1x22x22xf32> to vector<1x16x22xf32>
    %c21 = arith.constant 21 : index
    %126 = memref.load %arg1[%c21] : memref<98xf32, #tpu.memory_space<smem>>
    %127 = vector.extract_strided_slice %125 {offsets = [0, 0, 0], sizes = [1, 16, 16], strides = [1, 1, 1]} : vector<1x16x22xf32> to vector<1x16x16xf32>
    %128 = vector.broadcast %126 : f32 to vector<1x16x16xf32>
    %129 = arith.mulf %127, %128 : vector<1x16x16xf32>
    %130 = arith.addf %124, %129 : vector<1x16x16xf32>
    %c22 = arith.constant 22 : index
    %131 = memref.load %arg1[%c22] : memref<98xf32, #tpu.memory_space<smem>>
    %132 = vector.extract_strided_slice %125 {offsets = [0, 0, 1], sizes = [1, 16, 16], strides = [1, 1, 1]} : vector<1x16x22xf32> to vector<1x16x16xf32>
    %133 = vector.broadcast %131 : f32 to vector<1x16x16xf32>
    %134 = arith.mulf %132, %133 : vector<1x16x16xf32>
    %135 = arith.addf %130, %134 : vector<1x16x16xf32>
    %c23 = arith.constant 23 : index
    %136 = memref.load %arg1[%c23] : memref<98xf32, #tpu.memory_space<smem>>
    %137 = vector.extract_strided_slice %125 {offsets = [0, 0, 2], sizes = [1, 16, 16], strides = [1, 1, 1]} : vector<1x16x22xf32> to vector<1x16x16xf32>
    %138 = vector.broadcast %136 : f32 to vector<1x16x16xf32>
    %139 = arith.mulf %137, %138 : vector<1x16x16xf32>
    %140 = arith.addf %135, %139 : vector<1x16x16xf32>
    %c24 = arith.constant 24 : index
    %141 = memref.load %arg1[%c24] : memref<98xf32, #tpu.memory_space<smem>>
    %142 = vector.extract_strided_slice %125 {offsets = [0, 0, 3], sizes = [1, 16, 16], strides = [1, 1, 1]} : vector<1x16x22xf32> to vector<1x16x16xf32>
    %143 = vector.broadcast %141 : f32 to vector<1x16x16xf32>
    %144 = arith.mulf %142, %143 : vector<1x16x16xf32>
    %145 = arith.addf %140, %144 : vector<1x16x16xf32>
    %c25 = arith.constant 25 : index
    %146 = memref.load %arg1[%c25] : memref<98xf32, #tpu.memory_space<smem>>
    %147 = vector.extract_strided_slice %125 {offsets = [0, 0, 4], sizes = [1, 16, 16], strides = [1, 1, 1]} : vector<1x16x22xf32> to vector<1x16x16xf32>
    %148 = vector.broadcast %146 : f32 to vector<1x16x16xf32>
    %149 = arith.mulf %147, %148 : vector<1x16x16xf32>
    %150 = arith.addf %145, %149 : vector<1x16x16xf32>
    %c26 = arith.constant 26 : index
    %151 = memref.load %arg1[%c26] : memref<98xf32, #tpu.memory_space<smem>>
    %152 = vector.extract_strided_slice %125 {offsets = [0, 0, 5], sizes = [1, 16, 16], strides = [1, 1, 1]} : vector<1x16x22xf32> to vector<1x16x16xf32>
    %153 = vector.broadcast %151 : f32 to vector<1x16x16xf32>
    %154 = arith.mulf %152, %153 : vector<1x16x16xf32>
    %155 = arith.addf %150, %154 : vector<1x16x16xf32>
    %c27 = arith.constant 27 : index
    %156 = memref.load %arg1[%c27] : memref<98xf32, #tpu.memory_space<smem>>
    %157 = vector.extract_strided_slice %125 {offsets = [0, 0, 6], sizes = [1, 16, 16], strides = [1, 1, 1]} : vector<1x16x22xf32> to vector<1x16x16xf32>
    %158 = vector.broadcast %156 : f32 to vector<1x16x16xf32>
    %159 = arith.mulf %157, %158 : vector<1x16x16xf32>
    %160 = arith.addf %155, %159 : vector<1x16x16xf32>
    %161 = vector.extract_strided_slice %16 {offsets = [0, 4, 0], sizes = [1, 16, 22], strides = [1, 1, 1]} : vector<1x22x22xf32> to vector<1x16x22xf32>
    %c28 = arith.constant 28 : index
    %162 = memref.load %arg1[%c28] : memref<98xf32, #tpu.memory_space<smem>>
    %163 = vector.extract_strided_slice %161 {offsets = [0, 0, 0], sizes = [1, 16, 16], strides = [1, 1, 1]} : vector<1x16x22xf32> to vector<1x16x16xf32>
    %164 = vector.broadcast %162 : f32 to vector<1x16x16xf32>
    %165 = arith.mulf %163, %164 : vector<1x16x16xf32>
    %166 = arith.addf %160, %165 : vector<1x16x16xf32>
    %c29 = arith.constant 29 : index
    %167 = memref.load %arg1[%c29] : memref<98xf32, #tpu.memory_space<smem>>
    %168 = vector.extract_strided_slice %161 {offsets = [0, 0, 1], sizes = [1, 16, 16], strides = [1, 1, 1]} : vector<1x16x22xf32> to vector<1x16x16xf32>
    %169 = vector.broadcast %167 : f32 to vector<1x16x16xf32>
    %170 = arith.mulf %168, %169 : vector<1x16x16xf32>
    %171 = arith.addf %166, %170 : vector<1x16x16xf32>
    %c30 = arith.constant 30 : index
    %172 = memref.load %arg1[%c30] : memref<98xf32, #tpu.memory_space<smem>>
    %173 = vector.extract_strided_slice %161 {offsets = [0, 0, 2], sizes = [1, 16, 16], strides = [1, 1, 1]} : vector<1x16x22xf32> to vector<1x16x16xf32>
    %174 = vector.broadcast %172 : f32 to vector<1x16x16xf32>
    %175 = arith.mulf %173, %174 : vector<1x16x16xf32>
    %176 = arith.addf %171, %175 : vector<1x16x16xf32>
    %c31 = arith.constant 31 : index
    %177 = memref.load %arg1[%c31] : memref<98xf32, #tpu.memory_space<smem>>
    %178 = vector.extract_strided_slice %161 {offsets = [0, 0, 3], sizes = [1, 16, 16], strides = [1, 1, 1]} : vector<1x16x22xf32> to vector<1x16x16xf32>
    %179 = vector.broadcast %177 : f32 to vector<1x16x16xf32>
    %180 = arith.mulf %178, %179 : vector<1x16x16xf32>
    %181 = arith.addf %176, %180 : vector<1x16x16xf32>
    %c32 = arith.constant 32 : index
    %182 = memref.load %arg1[%c32] : memref<98xf32, #tpu.memory_space<smem>>
    %183 = vector.extract_strided_slice %161 {offsets = [0, 0, 4], sizes = [1, 16, 16], strides = [1, 1, 1]} : vector<1x16x22xf32> to vector<1x16x16xf32>
    %184 = vector.broadcast %182 : f32 to vector<1x16x16xf32>
    %185 = arith.mulf %183, %184 : vector<1x16x16xf32>
    %186 = arith.addf %181, %185 : vector<1x16x16xf32>
    %c33 = arith.constant 33 : index
    %187 = memref.load %arg1[%c33] : memref<98xf32, #tpu.memory_space<smem>>
    %188 = vector.extract_strided_slice %161 {offsets = [0, 0, 5], sizes = [1, 16, 16], strides = [1, 1, 1]} : vector<1x16x22xf32> to vector<1x16x16xf32>
    %189 = vector.broadcast %187 : f32 to vector<1x16x16xf32>
    %190 = arith.mulf %188, %189 : vector<1x16x16xf32>
    %191 = arith.addf %186, %190 : vector<1x16x16xf32>
    %c34 = arith.constant 34 : index
    %192 = memref.load %arg1[%c34] : memref<98xf32, #tpu.memory_space<smem>>
    %193 = vector.extract_strided_slice %161 {offsets = [0, 0, 6], sizes = [1, 16, 16], strides = [1, 1, 1]} : vector<1x16x22xf32> to vector<1x16x16xf32>
    %194 = vector.broadcast %192 : f32 to vector<1x16x16xf32>
    %195 = arith.mulf %193, %194 : vector<1x16x16xf32>
    %196 = arith.addf %191, %195 : vector<1x16x16xf32>
    %197 = vector.extract_strided_slice %16 {offsets = [0, 5, 0], sizes = [1, 16, 22], strides = [1, 1, 1]} : vector<1x22x22xf32> to vector<1x16x22xf32>
    %c35 = arith.constant 35 : index
    %198 = memref.load %arg1[%c35] : memref<98xf32, #tpu.memory_space<smem>>
    %199 = vector.extract_strided_slice %197 {offsets = [0, 0, 0], sizes = [1, 16, 16], strides = [1, 1, 1]} : vector<1x16x22xf32> to vector<1x16x16xf32>
    %200 = vector.broadcast %198 : f32 to vector<1x16x16xf32>
    %201 = arith.mulf %199, %200 : vector<1x16x16xf32>
    %202 = arith.addf %196, %201 : vector<1x16x16xf32>
    %c36 = arith.constant 36 : index
    %203 = memref.load %arg1[%c36] : memref<98xf32, #tpu.memory_space<smem>>
    %204 = vector.extract_strided_slice %197 {offsets = [0, 0, 1], sizes = [1, 16, 16], strides = [1, 1, 1]} : vector<1x16x22xf32> to vector<1x16x16xf32>
    %205 = vector.broadcast %203 : f32 to vector<1x16x16xf32>
    %206 = arith.mulf %204, %205 : vector<1x16x16xf32>
    %207 = arith.addf %202, %206 : vector<1x16x16xf32>
    %c37 = arith.constant 37 : index
    %208 = memref.load %arg1[%c37] : memref<98xf32, #tpu.memory_space<smem>>
    %209 = vector.extract_strided_slice %197 {offsets = [0, 0, 2], sizes = [1, 16, 16], strides = [1, 1, 1]} : vector<1x16x22xf32> to vector<1x16x16xf32>
    %210 = vector.broadcast %208 : f32 to vector<1x16x16xf32>
    %211 = arith.mulf %209, %210 : vector<1x16x16xf32>
    %212 = arith.addf %207, %211 : vector<1x16x16xf32>
    %c38 = arith.constant 38 : index
    %213 = memref.load %arg1[%c38] : memref<98xf32, #tpu.memory_space<smem>>
    %214 = vector.extract_strided_slice %197 {offsets = [0, 0, 3], sizes = [1, 16, 16], strides = [1, 1, 1]} : vector<1x16x22xf32> to vector<1x16x16xf32>
    %215 = vector.broadcast %213 : f32 to vector<1x16x16xf32>
    %216 = arith.mulf %214, %215 : vector<1x16x16xf32>
    %217 = arith.addf %212, %216 : vector<1x16x16xf32>
    %c39 = arith.constant 39 : index
    %218 = memref.load %arg1[%c39] : memref<98xf32, #tpu.memory_space<smem>>
    %219 = vector.extract_strided_slice %197 {offsets = [0, 0, 4], sizes = [1, 16, 16], strides = [1, 1, 1]} : vector<1x16x22xf32> to vector<1x16x16xf32>
    %220 = vector.broadcast %218 : f32 to vector<1x16x16xf32>
    %221 = arith.mulf %219, %220 : vector<1x16x16xf32>
    %222 = arith.addf %217, %221 : vector<1x16x16xf32>
    %c40 = arith.constant 40 : index
    %223 = memref.load %arg1[%c40] : memref<98xf32, #tpu.memory_space<smem>>
    %224 = vector.extract_strided_slice %197 {offsets = [0, 0, 5], sizes = [1, 16, 16], strides = [1, 1, 1]} : vector<1x16x22xf32> to vector<1x16x16xf32>
    %225 = vector.broadcast %223 : f32 to vector<1x16x16xf32>
    %226 = arith.mulf %224, %225 : vector<1x16x16xf32>
    %227 = arith.addf %222, %226 : vector<1x16x16xf32>
    %c41 = arith.constant 41 : index
    %228 = memref.load %arg1[%c41] : memref<98xf32, #tpu.memory_space<smem>>
    %229 = vector.extract_strided_slice %197 {offsets = [0, 0, 6], sizes = [1, 16, 16], strides = [1, 1, 1]} : vector<1x16x22xf32> to vector<1x16x16xf32>
    %230 = vector.broadcast %228 : f32 to vector<1x16x16xf32>
    %231 = arith.mulf %229, %230 : vector<1x16x16xf32>
    %232 = arith.addf %227, %231 : vector<1x16x16xf32>
    %233 = vector.extract_strided_slice %16 {offsets = [0, 6, 0], sizes = [1, 16, 22], strides = [1, 1, 1]} : vector<1x22x22xf32> to vector<1x16x22xf32>
    %c42 = arith.constant 42 : index
    %234 = memref.load %arg1[%c42] : memref<98xf32, #tpu.memory_space<smem>>
    %235 = vector.extract_strided_slice %233 {offsets = [0, 0, 0], sizes = [1, 16, 16], strides = [1, 1, 1]} : vector<1x16x22xf32> to vector<1x16x16xf32>
    %236 = vector.broadcast %234 : f32 to vector<1x16x16xf32>
    %237 = arith.mulf %235, %236 : vector<1x16x16xf32>
    %238 = arith.addf %232, %237 : vector<1x16x16xf32>
    %c43 = arith.constant 43 : index
    %239 = memref.load %arg1[%c43] : memref<98xf32, #tpu.memory_space<smem>>
    %240 = vector.extract_strided_slice %233 {offsets = [0, 0, 1], sizes = [1, 16, 16], strides = [1, 1, 1]} : vector<1x16x22xf32> to vector<1x16x16xf32>
    %241 = vector.broadcast %239 : f32 to vector<1x16x16xf32>
    %242 = arith.mulf %240, %241 : vector<1x16x16xf32>
    %243 = arith.addf %238, %242 : vector<1x16x16xf32>
    %c44 = arith.constant 44 : index
    %244 = memref.load %arg1[%c44] : memref<98xf32, #tpu.memory_space<smem>>
    %245 = vector.extract_strided_slice %233 {offsets = [0, 0, 2], sizes = [1, 16, 16], strides = [1, 1, 1]} : vector<1x16x22xf32> to vector<1x16x16xf32>
    %246 = vector.broadcast %244 : f32 to vector<1x16x16xf32>
    %247 = arith.mulf %245, %246 : vector<1x16x16xf32>
    %248 = arith.addf %243, %247 : vector<1x16x16xf32>
    %c45 = arith.constant 45 : index
    %249 = memref.load %arg1[%c45] : memref<98xf32, #tpu.memory_space<smem>>
    %250 = vector.extract_strided_slice %233 {offsets = [0, 0, 3], sizes = [1, 16, 16], strides = [1, 1, 1]} : vector<1x16x22xf32> to vector<1x16x16xf32>
    %251 = vector.broadcast %249 : f32 to vector<1x16x16xf32>
    %252 = arith.mulf %250, %251 : vector<1x16x16xf32>
    %253 = arith.addf %248, %252 : vector<1x16x16xf32>
    %c46 = arith.constant 46 : index
    %254 = memref.load %arg1[%c46] : memref<98xf32, #tpu.memory_space<smem>>
    %255 = vector.extract_strided_slice %233 {offsets = [0, 0, 4], sizes = [1, 16, 16], strides = [1, 1, 1]} : vector<1x16x22xf32> to vector<1x16x16xf32>
    %256 = vector.broadcast %254 : f32 to vector<1x16x16xf32>
    %257 = arith.mulf %255, %256 : vector<1x16x16xf32>
    %258 = arith.addf %253, %257 : vector<1x16x16xf32>
    %c47 = arith.constant 47 : index
    %259 = memref.load %arg1[%c47] : memref<98xf32, #tpu.memory_space<smem>>
    %260 = vector.extract_strided_slice %233 {offsets = [0, 0, 5], sizes = [1, 16, 16], strides = [1, 1, 1]} : vector<1x16x22xf32> to vector<1x16x16xf32>
    %261 = vector.broadcast %259 : f32 to vector<1x16x16xf32>
    %262 = arith.mulf %260, %261 : vector<1x16x16xf32>
    %263 = arith.addf %258, %262 : vector<1x16x16xf32>
    %c48 = arith.constant 48 : index
    %264 = memref.load %arg1[%c48] : memref<98xf32, #tpu.memory_space<smem>>
    %265 = vector.extract_strided_slice %233 {offsets = [0, 0, 6], sizes = [1, 16, 16], strides = [1, 1, 1]} : vector<1x16x22xf32> to vector<1x16x16xf32>
    %266 = vector.broadcast %264 : f32 to vector<1x16x16xf32>
    %267 = arith.mulf %265, %266 : vector<1x16x16xf32>
    %268 = arith.addf %263, %267 : vector<1x16x16xf32>
    %c0_i32_6 = arith.constant 0 : i32
    %269 = arith.sitofp %c0_i32_6 : i32 to f32
    %270 = vector.broadcast %269 : f32 to vector<1x3x16xf32>
    %271 = tpu.concatenate %270, %6 in 1 : vector<1x3x16xf32>, vector<1x16x16xf32> -> vector<1x19x16xf32>
    %272 = vector.broadcast %269 : f32 to vector<1x3x16xf32>
    %273 = tpu.concatenate %271, %272 in 1 : vector<1x19x16xf32>, vector<1x3x16xf32> -> vector<1x22x16xf32>
    %274 = vector.broadcast %269 : f32 to vector<1x22x3xf32>
    %275 = tpu.concatenate %274, %273 in 2 : vector<1x22x3xf32>, vector<1x22x16xf32> -> vector<1x22x19xf32>
    %276 = vector.broadcast %269 : f32 to vector<1x22x3xf32>
    %277 = tpu.concatenate %275, %276 in 2 : vector<1x22x19xf32>, vector<1x22x3xf32> -> vector<1x22x22xf32>
    %278 = vector.extract_strided_slice %277 {offsets = [0, 0, 0], sizes = [1, 16, 22], strides = [1, 1, 1]} : vector<1x22x22xf32> to vector<1x16x22xf32>
    %c49 = arith.constant 49 : index
    %279 = memref.load %arg1[%c49] : memref<98xf32, #tpu.memory_space<smem>>
    %280 = vector.extract_strided_slice %278 {offsets = [0, 0, 0], sizes = [1, 16, 16], strides = [1, 1, 1]} : vector<1x16x22xf32> to vector<1x16x16xf32>
    %281 = vector.broadcast %279 : f32 to vector<1x16x16xf32>
    %282 = arith.mulf %280, %281 : vector<1x16x16xf32>
    %283 = arith.addf %268, %282 : vector<1x16x16xf32>
    %c50 = arith.constant 50 : index
    %284 = memref.load %arg1[%c50] : memref<98xf32, #tpu.memory_space<smem>>
    %285 = vector.extract_strided_slice %278 {offsets = [0, 0, 1], sizes = [1, 16, 16], strides = [1, 1, 1]} : vector<1x16x22xf32> to vector<1x16x16xf32>
    %286 = vector.broadcast %284 : f32 to vector<1x16x16xf32>
    %287 = arith.mulf %285, %286 : vector<1x16x16xf32>
    %288 = arith.addf %283, %287 : vector<1x16x16xf32>
    %c51 = arith.constant 51 : index
    %289 = memref.load %arg1[%c51] : memref<98xf32, #tpu.memory_space<smem>>
    %290 = vector.extract_strided_slice %278 {offsets = [0, 0, 2], sizes = [1, 16, 16], strides = [1, 1, 1]} : vector<1x16x22xf32> to vector<1x16x16xf32>
    %291 = vector.broadcast %289 : f32 to vector<1x16x16xf32>
    %292 = arith.mulf %290, %291 : vector<1x16x16xf32>
    %293 = arith.addf %288, %292 : vector<1x16x16xf32>
    %c52 = arith.constant 52 : index
    %294 = memref.load %arg1[%c52] : memref<98xf32, #tpu.memory_space<smem>>
    %295 = vector.extract_strided_slice %278 {offsets = [0, 0, 3], sizes = [1, 16, 16], strides = [1, 1, 1]} : vector<1x16x22xf32> to vector<1x16x16xf32>
    %296 = vector.broadcast %294 : f32 to vector<1x16x16xf32>
    %297 = arith.mulf %295, %296 : vector<1x16x16xf32>
    %298 = arith.addf %293, %297 : vector<1x16x16xf32>
    %c53 = arith.constant 53 : index
    %299 = memref.load %arg1[%c53] : memref<98xf32, #tpu.memory_space<smem>>
    %300 = vector.extract_strided_slice %278 {offsets = [0, 0, 4], sizes = [1, 16, 16], strides = [1, 1, 1]} : vector<1x16x22xf32> to vector<1x16x16xf32>
    %301 = vector.broadcast %299 : f32 to vector<1x16x16xf32>
    %302 = arith.mulf %300, %301 : vector<1x16x16xf32>
    %303 = arith.addf %298, %302 : vector<1x16x16xf32>
    %c54 = arith.constant 54 : index
    %304 = memref.load %arg1[%c54] : memref<98xf32, #tpu.memory_space<smem>>
    %305 = vector.extract_strided_slice %278 {offsets = [0, 0, 5], sizes = [1, 16, 16], strides = [1, 1, 1]} : vector<1x16x22xf32> to vector<1x16x16xf32>
    %306 = vector.broadcast %304 : f32 to vector<1x16x16xf32>
    %307 = arith.mulf %305, %306 : vector<1x16x16xf32>
    %308 = arith.addf %303, %307 : vector<1x16x16xf32>
    %c55 = arith.constant 55 : index
    %309 = memref.load %arg1[%c55] : memref<98xf32, #tpu.memory_space<smem>>
    %310 = vector.extract_strided_slice %278 {offsets = [0, 0, 6], sizes = [1, 16, 16], strides = [1, 1, 1]} : vector<1x16x22xf32> to vector<1x16x16xf32>
    %311 = vector.broadcast %309 : f32 to vector<1x16x16xf32>
    %312 = arith.mulf %310, %311 : vector<1x16x16xf32>
    %313 = arith.addf %308, %312 : vector<1x16x16xf32>
    %314 = vector.extract_strided_slice %277 {offsets = [0, 1, 0], sizes = [1, 16, 22], strides = [1, 1, 1]} : vector<1x22x22xf32> to vector<1x16x22xf32>
    %c56 = arith.constant 56 : index
    %315 = memref.load %arg1[%c56] : memref<98xf32, #tpu.memory_space<smem>>
    %316 = vector.extract_strided_slice %314 {offsets = [0, 0, 0], sizes = [1, 16, 16], strides = [1, 1, 1]} : vector<1x16x22xf32> to vector<1x16x16xf32>
    %317 = vector.broadcast %315 : f32 to vector<1x16x16xf32>
    %318 = arith.mulf %316, %317 : vector<1x16x16xf32>
    %319 = arith.addf %313, %318 : vector<1x16x16xf32>
    %c57 = arith.constant 57 : index
    %320 = memref.load %arg1[%c57] : memref<98xf32, #tpu.memory_space<smem>>
    %321 = vector.extract_strided_slice %314 {offsets = [0, 0, 1], sizes = [1, 16, 16], strides = [1, 1, 1]} : vector<1x16x22xf32> to vector<1x16x16xf32>
    %322 = vector.broadcast %320 : f32 to vector<1x16x16xf32>
    %323 = arith.mulf %321, %322 : vector<1x16x16xf32>
    %324 = arith.addf %319, %323 : vector<1x16x16xf32>
    %c58 = arith.constant 58 : index
    %325 = memref.load %arg1[%c58] : memref<98xf32, #tpu.memory_space<smem>>
    %326 = vector.extract_strided_slice %314 {offsets = [0, 0, 2], sizes = [1, 16, 16], strides = [1, 1, 1]} : vector<1x16x22xf32> to vector<1x16x16xf32>
    %327 = vector.broadcast %325 : f32 to vector<1x16x16xf32>
    %328 = arith.mulf %326, %327 : vector<1x16x16xf32>
    %329 = arith.addf %324, %328 : vector<1x16x16xf32>
    %c59 = arith.constant 59 : index
    %330 = memref.load %arg1[%c59] : memref<98xf32, #tpu.memory_space<smem>>
    %331 = vector.extract_strided_slice %314 {offsets = [0, 0, 3], sizes = [1, 16, 16], strides = [1, 1, 1]} : vector<1x16x22xf32> to vector<1x16x16xf32>
    %332 = vector.broadcast %330 : f32 to vector<1x16x16xf32>
    %333 = arith.mulf %331, %332 : vector<1x16x16xf32>
    %334 = arith.addf %329, %333 : vector<1x16x16xf32>
    %c60 = arith.constant 60 : index
    %335 = memref.load %arg1[%c60] : memref<98xf32, #tpu.memory_space<smem>>
    %336 = vector.extract_strided_slice %314 {offsets = [0, 0, 4], sizes = [1, 16, 16], strides = [1, 1, 1]} : vector<1x16x22xf32> to vector<1x16x16xf32>
    %337 = vector.broadcast %335 : f32 to vector<1x16x16xf32>
    %338 = arith.mulf %336, %337 : vector<1x16x16xf32>
    %339 = arith.addf %334, %338 : vector<1x16x16xf32>
    %c61 = arith.constant 61 : index
    %340 = memref.load %arg1[%c61] : memref<98xf32, #tpu.memory_space<smem>>
    %341 = vector.extract_strided_slice %314 {offsets = [0, 0, 5], sizes = [1, 16, 16], strides = [1, 1, 1]} : vector<1x16x22xf32> to vector<1x16x16xf32>
    %342 = vector.broadcast %340 : f32 to vector<1x16x16xf32>
    %343 = arith.mulf %341, %342 : vector<1x16x16xf32>
    %344 = arith.addf %339, %343 : vector<1x16x16xf32>
    %c62 = arith.constant 62 : index
    %345 = memref.load %arg1[%c62] : memref<98xf32, #tpu.memory_space<smem>>
    %346 = vector.extract_strided_slice %314 {offsets = [0, 0, 6], sizes = [1, 16, 16], strides = [1, 1, 1]} : vector<1x16x22xf32> to vector<1x16x16xf32>
    %347 = vector.broadcast %345 : f32 to vector<1x16x16xf32>
    %348 = arith.mulf %346, %347 : vector<1x16x16xf32>
    %349 = arith.addf %344, %348 : vector<1x16x16xf32>
    %350 = vector.extract_strided_slice %277 {offsets = [0, 2, 0], sizes = [1, 16, 22], strides = [1, 1, 1]} : vector<1x22x22xf32> to vector<1x16x22xf32>
    %c63 = arith.constant 63 : index
    %351 = memref.load %arg1[%c63] : memref<98xf32, #tpu.memory_space<smem>>
    %352 = vector.extract_strided_slice %350 {offsets = [0, 0, 0], sizes = [1, 16, 16], strides = [1, 1, 1]} : vector<1x16x22xf32> to vector<1x16x16xf32>
    %353 = vector.broadcast %351 : f32 to vector<1x16x16xf32>
    %354 = arith.mulf %352, %353 : vector<1x16x16xf32>
    %355 = arith.addf %349, %354 : vector<1x16x16xf32>
    %c64 = arith.constant 64 : index
    %356 = memref.load %arg1[%c64] : memref<98xf32, #tpu.memory_space<smem>>
    %357 = vector.extract_strided_slice %350 {offsets = [0, 0, 1], sizes = [1, 16, 16], strides = [1, 1, 1]} : vector<1x16x22xf32> to vector<1x16x16xf32>
    %358 = vector.broadcast %356 : f32 to vector<1x16x16xf32>
    %359 = arith.mulf %357, %358 : vector<1x16x16xf32>
    %360 = arith.addf %355, %359 : vector<1x16x16xf32>
    %c65 = arith.constant 65 : index
    %361 = memref.load %arg1[%c65] : memref<98xf32, #tpu.memory_space<smem>>
    %362 = vector.extract_strided_slice %350 {offsets = [0, 0, 2], sizes = [1, 16, 16], strides = [1, 1, 1]} : vector<1x16x22xf32> to vector<1x16x16xf32>
    %363 = vector.broadcast %361 : f32 to vector<1x16x16xf32>
    %364 = arith.mulf %362, %363 : vector<1x16x16xf32>
    %365 = arith.addf %360, %364 : vector<1x16x16xf32>
    %c66 = arith.constant 66 : index
    %366 = memref.load %arg1[%c66] : memref<98xf32, #tpu.memory_space<smem>>
    %367 = vector.extract_strided_slice %350 {offsets = [0, 0, 3], sizes = [1, 16, 16], strides = [1, 1, 1]} : vector<1x16x22xf32> to vector<1x16x16xf32>
    %368 = vector.broadcast %366 : f32 to vector<1x16x16xf32>
    %369 = arith.mulf %367, %368 : vector<1x16x16xf32>
    %370 = arith.addf %365, %369 : vector<1x16x16xf32>
    %c67 = arith.constant 67 : index
    %371 = memref.load %arg1[%c67] : memref<98xf32, #tpu.memory_space<smem>>
    %372 = vector.extract_strided_slice %350 {offsets = [0, 0, 4], sizes = [1, 16, 16], strides = [1, 1, 1]} : vector<1x16x22xf32> to vector<1x16x16xf32>
    %373 = vector.broadcast %371 : f32 to vector<1x16x16xf32>
    %374 = arith.mulf %372, %373 : vector<1x16x16xf32>
    %375 = arith.addf %370, %374 : vector<1x16x16xf32>
    %c68 = arith.constant 68 : index
    %376 = memref.load %arg1[%c68] : memref<98xf32, #tpu.memory_space<smem>>
    %377 = vector.extract_strided_slice %350 {offsets = [0, 0, 5], sizes = [1, 16, 16], strides = [1, 1, 1]} : vector<1x16x22xf32> to vector<1x16x16xf32>
    %378 = vector.broadcast %376 : f32 to vector<1x16x16xf32>
    %379 = arith.mulf %377, %378 : vector<1x16x16xf32>
    %380 = arith.addf %375, %379 : vector<1x16x16xf32>
    %c69 = arith.constant 69 : index
    %381 = memref.load %arg1[%c69] : memref<98xf32, #tpu.memory_space<smem>>
    %382 = vector.extract_strided_slice %350 {offsets = [0, 0, 6], sizes = [1, 16, 16], strides = [1, 1, 1]} : vector<1x16x22xf32> to vector<1x16x16xf32>
    %383 = vector.broadcast %381 : f32 to vector<1x16x16xf32>
    %384 = arith.mulf %382, %383 : vector<1x16x16xf32>
    %385 = arith.addf %380, %384 : vector<1x16x16xf32>
    %386 = vector.extract_strided_slice %277 {offsets = [0, 3, 0], sizes = [1, 16, 22], strides = [1, 1, 1]} : vector<1x22x22xf32> to vector<1x16x22xf32>
    %c70 = arith.constant 70 : index
    %387 = memref.load %arg1[%c70] : memref<98xf32, #tpu.memory_space<smem>>
    %388 = vector.extract_strided_slice %386 {offsets = [0, 0, 0], sizes = [1, 16, 16], strides = [1, 1, 1]} : vector<1x16x22xf32> to vector<1x16x16xf32>
    %389 = vector.broadcast %387 : f32 to vector<1x16x16xf32>
    %390 = arith.mulf %388, %389 : vector<1x16x16xf32>
    %391 = arith.addf %385, %390 : vector<1x16x16xf32>
    %c71 = arith.constant 71 : index
    %392 = memref.load %arg1[%c71] : memref<98xf32, #tpu.memory_space<smem>>
    %393 = vector.extract_strided_slice %386 {offsets = [0, 0, 1], sizes = [1, 16, 16], strides = [1, 1, 1]} : vector<1x16x22xf32> to vector<1x16x16xf32>
    %394 = vector.broadcast %392 : f32 to vector<1x16x16xf32>
    %395 = arith.mulf %393, %394 : vector<1x16x16xf32>
    %396 = arith.addf %391, %395 : vector<1x16x16xf32>
    %c72 = arith.constant 72 : index
    %397 = memref.load %arg1[%c72] : memref<98xf32, #tpu.memory_space<smem>>
    %398 = vector.extract_strided_slice %386 {offsets = [0, 0, 2], sizes = [1, 16, 16], strides = [1, 1, 1]} : vector<1x16x22xf32> to vector<1x16x16xf32>
    %399 = vector.broadcast %397 : f32 to vector<1x16x16xf32>
    %400 = arith.mulf %398, %399 : vector<1x16x16xf32>
    %401 = arith.addf %396, %400 : vector<1x16x16xf32>
    %c73 = arith.constant 73 : index
    %402 = memref.load %arg1[%c73] : memref<98xf32, #tpu.memory_space<smem>>
    %403 = vector.extract_strided_slice %386 {offsets = [0, 0, 3], sizes = [1, 16, 16], strides = [1, 1, 1]} : vector<1x16x22xf32> to vector<1x16x16xf32>
    %404 = vector.broadcast %402 : f32 to vector<1x16x16xf32>
    %405 = arith.mulf %403, %404 : vector<1x16x16xf32>
    %406 = arith.addf %401, %405 : vector<1x16x16xf32>
    %c74 = arith.constant 74 : index
    %407 = memref.load %arg1[%c74] : memref<98xf32, #tpu.memory_space<smem>>
    %408 = vector.extract_strided_slice %386 {offsets = [0, 0, 4], sizes = [1, 16, 16], strides = [1, 1, 1]} : vector<1x16x22xf32> to vector<1x16x16xf32>
    %409 = vector.broadcast %407 : f32 to vector<1x16x16xf32>
    %410 = arith.mulf %408, %409 : vector<1x16x16xf32>
    %411 = arith.addf %406, %410 : vector<1x16x16xf32>
    %c75 = arith.constant 75 : index
    %412 = memref.load %arg1[%c75] : memref<98xf32, #tpu.memory_space<smem>>
    %413 = vector.extract_strided_slice %386 {offsets = [0, 0, 5], sizes = [1, 16, 16], strides = [1, 1, 1]} : vector<1x16x22xf32> to vector<1x16x16xf32>
    %414 = vector.broadcast %412 : f32 to vector<1x16x16xf32>
    %415 = arith.mulf %413, %414 : vector<1x16x16xf32>
    %416 = arith.addf %411, %415 : vector<1x16x16xf32>
    %c76 = arith.constant 76 : index
    %417 = memref.load %arg1[%c76] : memref<98xf32, #tpu.memory_space<smem>>
    %418 = vector.extract_strided_slice %386 {offsets = [0, 0, 6], sizes = [1, 16, 16], strides = [1, 1, 1]} : vector<1x16x22xf32> to vector<1x16x16xf32>
    %419 = vector.broadcast %417 : f32 to vector<1x16x16xf32>
    %420 = arith.mulf %418, %419 : vector<1x16x16xf32>
    %421 = arith.addf %416, %420 : vector<1x16x16xf32>
    %422 = vector.extract_strided_slice %277 {offsets = [0, 4, 0], sizes = [1, 16, 22], strides = [1, 1, 1]} : vector<1x22x22xf32> to vector<1x16x22xf32>
    %c77 = arith.constant 77 : index
    %423 = memref.load %arg1[%c77] : memref<98xf32, #tpu.memory_space<smem>>
    %424 = vector.extract_strided_slice %422 {offsets = [0, 0, 0], sizes = [1, 16, 16], strides = [1, 1, 1]} : vector<1x16x22xf32> to vector<1x16x16xf32>
    %425 = vector.broadcast %423 : f32 to vector<1x16x16xf32>
    %426 = arith.mulf %424, %425 : vector<1x16x16xf32>
    %427 = arith.addf %421, %426 : vector<1x16x16xf32>
    %c78 = arith.constant 78 : index
    %428 = memref.load %arg1[%c78] : memref<98xf32, #tpu.memory_space<smem>>
    %429 = vector.extract_strided_slice %422 {offsets = [0, 0, 1], sizes = [1, 16, 16], strides = [1, 1, 1]} : vector<1x16x22xf32> to vector<1x16x16xf32>
    %430 = vector.broadcast %428 : f32 to vector<1x16x16xf32>
    %431 = arith.mulf %429, %430 : vector<1x16x16xf32>
    %432 = arith.addf %427, %431 : vector<1x16x16xf32>
    %c79 = arith.constant 79 : index
    %433 = memref.load %arg1[%c79] : memref<98xf32, #tpu.memory_space<smem>>
    %434 = vector.extract_strided_slice %422 {offsets = [0, 0, 2], sizes = [1, 16, 16], strides = [1, 1, 1]} : vector<1x16x22xf32> to vector<1x16x16xf32>
    %435 = vector.broadcast %433 : f32 to vector<1x16x16xf32>
    %436 = arith.mulf %434, %435 : vector<1x16x16xf32>
    %437 = arith.addf %432, %436 : vector<1x16x16xf32>
    %c80 = arith.constant 80 : index
    %438 = memref.load %arg1[%c80] : memref<98xf32, #tpu.memory_space<smem>>
    %439 = vector.extract_strided_slice %422 {offsets = [0, 0, 3], sizes = [1, 16, 16], strides = [1, 1, 1]} : vector<1x16x22xf32> to vector<1x16x16xf32>
    %440 = vector.broadcast %438 : f32 to vector<1x16x16xf32>
    %441 = arith.mulf %439, %440 : vector<1x16x16xf32>
    %442 = arith.addf %437, %441 : vector<1x16x16xf32>
    %c81 = arith.constant 81 : index
    %443 = memref.load %arg1[%c81] : memref<98xf32, #tpu.memory_space<smem>>
    %444 = vector.extract_strided_slice %422 {offsets = [0, 0, 4], sizes = [1, 16, 16], strides = [1, 1, 1]} : vector<1x16x22xf32> to vector<1x16x16xf32>
    %445 = vector.broadcast %443 : f32 to vector<1x16x16xf32>
    %446 = arith.mulf %444, %445 : vector<1x16x16xf32>
    %447 = arith.addf %442, %446 : vector<1x16x16xf32>
    %c82 = arith.constant 82 : index
    %448 = memref.load %arg1[%c82] : memref<98xf32, #tpu.memory_space<smem>>
    %449 = vector.extract_strided_slice %422 {offsets = [0, 0, 5], sizes = [1, 16, 16], strides = [1, 1, 1]} : vector<1x16x22xf32> to vector<1x16x16xf32>
    %450 = vector.broadcast %448 : f32 to vector<1x16x16xf32>
    %451 = arith.mulf %449, %450 : vector<1x16x16xf32>
    %452 = arith.addf %447, %451 : vector<1x16x16xf32>
    %c83 = arith.constant 83 : index
    %453 = memref.load %arg1[%c83] : memref<98xf32, #tpu.memory_space<smem>>
    %454 = vector.extract_strided_slice %422 {offsets = [0, 0, 6], sizes = [1, 16, 16], strides = [1, 1, 1]} : vector<1x16x22xf32> to vector<1x16x16xf32>
    %455 = vector.broadcast %453 : f32 to vector<1x16x16xf32>
    %456 = arith.mulf %454, %455 : vector<1x16x16xf32>
    %457 = arith.addf %452, %456 : vector<1x16x16xf32>
    %458 = vector.extract_strided_slice %277 {offsets = [0, 5, 0], sizes = [1, 16, 22], strides = [1, 1, 1]} : vector<1x22x22xf32> to vector<1x16x22xf32>
    %c84 = arith.constant 84 : index
    %459 = memref.load %arg1[%c84] : memref<98xf32, #tpu.memory_space<smem>>
    %460 = vector.extract_strided_slice %458 {offsets = [0, 0, 0], sizes = [1, 16, 16], strides = [1, 1, 1]} : vector<1x16x22xf32> to vector<1x16x16xf32>
    %461 = vector.broadcast %459 : f32 to vector<1x16x16xf32>
    %462 = arith.mulf %460, %461 : vector<1x16x16xf32>
    %463 = arith.addf %457, %462 : vector<1x16x16xf32>
    %c85 = arith.constant 85 : index
    %464 = memref.load %arg1[%c85] : memref<98xf32, #tpu.memory_space<smem>>
    %465 = vector.extract_strided_slice %458 {offsets = [0, 0, 1], sizes = [1, 16, 16], strides = [1, 1, 1]} : vector<1x16x22xf32> to vector<1x16x16xf32>
    %466 = vector.broadcast %464 : f32 to vector<1x16x16xf32>
    %467 = arith.mulf %465, %466 : vector<1x16x16xf32>
    %468 = arith.addf %463, %467 : vector<1x16x16xf32>
    %c86 = arith.constant 86 : index
    %469 = memref.load %arg1[%c86] : memref<98xf32, #tpu.memory_space<smem>>
    %470 = vector.extract_strided_slice %458 {offsets = [0, 0, 2], sizes = [1, 16, 16], strides = [1, 1, 1]} : vector<1x16x22xf32> to vector<1x16x16xf32>
    %471 = vector.broadcast %469 : f32 to vector<1x16x16xf32>
    %472 = arith.mulf %470, %471 : vector<1x16x16xf32>
    %473 = arith.addf %468, %472 : vector<1x16x16xf32>
    %c87 = arith.constant 87 : index
    %474 = memref.load %arg1[%c87] : memref<98xf32, #tpu.memory_space<smem>>
    %475 = vector.extract_strided_slice %458 {offsets = [0, 0, 3], sizes = [1, 16, 16], strides = [1, 1, 1]} : vector<1x16x22xf32> to vector<1x16x16xf32>
    %476 = vector.broadcast %474 : f32 to vector<1x16x16xf32>
    %477 = arith.mulf %475, %476 : vector<1x16x16xf32>
    %478 = arith.addf %473, %477 : vector<1x16x16xf32>
    %c88 = arith.constant 88 : index
    %479 = memref.load %arg1[%c88] : memref<98xf32, #tpu.memory_space<smem>>
    %480 = vector.extract_strided_slice %458 {offsets = [0, 0, 4], sizes = [1, 16, 16], strides = [1, 1, 1]} : vector<1x16x22xf32> to vector<1x16x16xf32>
    %481 = vector.broadcast %479 : f32 to vector<1x16x16xf32>
    %482 = arith.mulf %480, %481 : vector<1x16x16xf32>
    %483 = arith.addf %478, %482 : vector<1x16x16xf32>
    %c89 = arith.constant 89 : index
    %484 = memref.load %arg1[%c89] : memref<98xf32, #tpu.memory_space<smem>>
    %485 = vector.extract_strided_slice %458 {offsets = [0, 0, 5], sizes = [1, 16, 16], strides = [1, 1, 1]} : vector<1x16x22xf32> to vector<1x16x16xf32>
    %486 = vector.broadcast %484 : f32 to vector<1x16x16xf32>
    %487 = arith.mulf %485, %486 : vector<1x16x16xf32>
    %488 = arith.addf %483, %487 : vector<1x16x16xf32>
    %c90 = arith.constant 90 : index
    %489 = memref.load %arg1[%c90] : memref<98xf32, #tpu.memory_space<smem>>
    %490 = vector.extract_strided_slice %458 {offsets = [0, 0, 6], sizes = [1, 16, 16], strides = [1, 1, 1]} : vector<1x16x22xf32> to vector<1x16x16xf32>
    %491 = vector.broadcast %489 : f32 to vector<1x16x16xf32>
    %492 = arith.mulf %490, %491 : vector<1x16x16xf32>
    %493 = arith.addf %488, %492 : vector<1x16x16xf32>
    %494 = vector.extract_strided_slice %277 {offsets = [0, 6, 0], sizes = [1, 16, 22], strides = [1, 1, 1]} : vector<1x22x22xf32> to vector<1x16x22xf32>
    %c91 = arith.constant 91 : index
    %495 = memref.load %arg1[%c91] : memref<98xf32, #tpu.memory_space<smem>>
    %496 = vector.extract_strided_slice %494 {offsets = [0, 0, 0], sizes = [1, 16, 16], strides = [1, 1, 1]} : vector<1x16x22xf32> to vector<1x16x16xf32>
    %497 = vector.broadcast %495 : f32 to vector<1x16x16xf32>
    %498 = arith.mulf %496, %497 : vector<1x16x16xf32>
    %499 = arith.addf %493, %498 : vector<1x16x16xf32>
    %c92 = arith.constant 92 : index
    %500 = memref.load %arg1[%c92] : memref<98xf32, #tpu.memory_space<smem>>
    %501 = vector.extract_strided_slice %494 {offsets = [0, 0, 1], sizes = [1, 16, 16], strides = [1, 1, 1]} : vector<1x16x22xf32> to vector<1x16x16xf32>
    %502 = vector.broadcast %500 : f32 to vector<1x16x16xf32>
    %503 = arith.mulf %501, %502 : vector<1x16x16xf32>
    %504 = arith.addf %499, %503 : vector<1x16x16xf32>
    %c93 = arith.constant 93 : index
    %505 = memref.load %arg1[%c93] : memref<98xf32, #tpu.memory_space<smem>>
    %506 = vector.extract_strided_slice %494 {offsets = [0, 0, 2], sizes = [1, 16, 16], strides = [1, 1, 1]} : vector<1x16x22xf32> to vector<1x16x16xf32>
    %507 = vector.broadcast %505 : f32 to vector<1x16x16xf32>
    %508 = arith.mulf %506, %507 : vector<1x16x16xf32>
    %509 = arith.addf %504, %508 : vector<1x16x16xf32>
    %c94 = arith.constant 94 : index
    %510 = memref.load %arg1[%c94] : memref<98xf32, #tpu.memory_space<smem>>
    %511 = vector.extract_strided_slice %494 {offsets = [0, 0, 3], sizes = [1, 16, 16], strides = [1, 1, 1]} : vector<1x16x22xf32> to vector<1x16x16xf32>
    %512 = vector.broadcast %510 : f32 to vector<1x16x16xf32>
    %513 = arith.mulf %511, %512 : vector<1x16x16xf32>
    %514 = arith.addf %509, %513 : vector<1x16x16xf32>
    %c95 = arith.constant 95 : index
    %515 = memref.load %arg1[%c95] : memref<98xf32, #tpu.memory_space<smem>>
    %516 = vector.extract_strided_slice %494 {offsets = [0, 0, 4], sizes = [1, 16, 16], strides = [1, 1, 1]} : vector<1x16x22xf32> to vector<1x16x16xf32>
    %517 = vector.broadcast %515 : f32 to vector<1x16x16xf32>
    %518 = arith.mulf %516, %517 : vector<1x16x16xf32>
    %519 = arith.addf %514, %518 : vector<1x16x16xf32>
    %c96 = arith.constant 96 : index
    %520 = memref.load %arg1[%c96] : memref<98xf32, #tpu.memory_space<smem>>
    %521 = vector.extract_strided_slice %494 {offsets = [0, 0, 5], sizes = [1, 16, 16], strides = [1, 1, 1]} : vector<1x16x22xf32> to vector<1x16x16xf32>
    %522 = vector.broadcast %520 : f32 to vector<1x16x16xf32>
    %523 = arith.mulf %521, %522 : vector<1x16x16xf32>
    %524 = arith.addf %519, %523 : vector<1x16x16xf32>
    %c97 = arith.constant 97 : index
    %525 = memref.load %arg1[%c97] : memref<98xf32, #tpu.memory_space<smem>>
    %526 = vector.extract_strided_slice %494 {offsets = [0, 0, 6], sizes = [1, 16, 16], strides = [1, 1, 1]} : vector<1x16x22xf32> to vector<1x16x16xf32>
    %527 = vector.broadcast %525 : f32 to vector<1x16x16xf32>
    %528 = arith.mulf %526, %527 : vector<1x16x16xf32>
    %529 = arith.addf %524, %528 : vector<1x16x16xf32>
    %c0_7 = arith.constant 0 : index
    %530 = memref.load %arg2[%c0_7] : memref<1xf32, #tpu.memory_space<smem>>
    %531 = vector.broadcast %530 : f32 to vector<1x16x16xf32>
    %532 = arith.addf %529, %531 : vector<1x16x16xf32>
    %533 = arith.negf %532 : vector<1x16x16xf32>
    %534 = math.exp %533 : vector<1x16x16xf32>
    %cst_8 = arith.constant 1.000000e+00 : f32
    %535 = vector.broadcast %cst_8 : f32 to vector<1x16x16xf32>
    %536 = arith.addf %535, %534 : vector<1x16x16xf32>
    %537 = arith.divf %535, %536 : vector<1x16x16xf32>
    %538 = vector.shape_cast %537 : vector<1x16x16xf32> to vector<1x1x256xf32>
    %539 = vector.broadcast %538 : vector<1x1x256xf32> to vector<1x4x256xf32>
    %540 = arith.mulf %0, %539 : vector<1x4x256xf32>
    %c0_9 = arith.constant 0 : index
    %c0_10 = arith.constant 0 : index
    %c0_11 = arith.constant 0 : index
    %541 = vector.load %arg4[%c0_9, %c0_10, %c0_11] : memref<1x4x256xf32, #tpu.memory_space<vmem>>, vector<1x4x256xf32>
    tpu.vector_store %arg4[%c0_9, %c0_10, %c0_11], %540 {strides = array<i32>} : memref<1x4x256xf32, #tpu.memory_space<vmem>>, vector<1x4x256xf32>,
    return
  }
  func.func @transform_0(%arg0: i32) -> i32 {
    %c0_i32 = arith.constant 0 : i32
    %c0_i32_0 = arith.constant 0 : i32
    return %c0_i32 : i32
  }
  func.func @transform_1(%arg0: i32) -> i32 {
    %c0_i32 = arith.constant 0 : i32
    %c0_i32_0 = arith.constant 0 : i32
    return %c0_i32 : i32
  }
  func.func @transform_2(%arg0: i32) -> (i32, i32, i32) {
    %c0_i32 = arith.constant 0 : i32
    %c0_i32_0 = arith.constant 0 : i32
    %c0_i32_1 = arith.constant 0 : i32
    return %arg0, %c0_i32, %c0_i32_0 : i32, i32, i32
  }
  func.func @transform_3(%arg0: i32) -> (i32, i32, i32) {
    %c0_i32 = arith.constant 0 : i32
    %c0_i32_0 = arith.constant 0 : i32
    %c0_i32_1 = arith.constant 0 : i32
    return %arg0, %c0_i32, %c0_i32_0 : i32, i32, i32
  }
}

</mosaic_0001>

<bundles_post_ra>
// kernel: tpu_custom_call.1
= control target key start
LH: loop header
LB: loop body
LE: loop exit
PB: predicated region body
PF: predicated region fallthrough
CT: control target
= control target key end

     0   :  { %s4290_s0 = inlined_call_operand.vmem [shape: f32[98], index: 0, kind: input, shape index: {}]   ;;  %s4291_s1 = inlined_call_operand.<no memory space> [shape: f32[1], index: 1, kind: input, shape index: {}]   ;;  %s4292_s2 = inlined_call_operand.hbm [shape: f32[2,4,256], index: 2, kind: input, shape index: {}]   ;;  %s4293_s3 = inlined_call_operand.hbm [shape: f32[2,4,256], index: 3, kind: output, shape index: {}]  }
   0x1   :  { %8 = sst [smem:[#allocation2]] %s4291_s1 }
   0x2   :  { %9 = vsyncpa [#allocation6], 0 }
   0x3   :  { %10 = vsyncpa [#allocation4], 0 }
   0x4   :  { %12 = vsyncpa [#allocation4 + $0x1], 0 }
   0x5   :  { %13 = vsyncpa [#allocation5], 0 }
   0x6   :  { %15 = vsyncpa [#allocation5 + $0x1], 0  ;;  %s3101_s14 = smov 0   ;;  %s3103_s15 = smov 0  }
   0x7   :  { %s3105_s16 = smov 0   ;;  %s3107_s17 = smov 0  }
   0x8 LB: > { %s3122_s1 = sadd.s32 4294967295, %s3059_s17   ;;  %s2746_s18 = sadd.s32 4294967294, %s3059_s17   ;;  %s3059_s17 = sphi %s3107_s17, %s4308_s17   ;;  %s3055_s16 = sphi %s3105_s16, %s4307_s16   ;;  %s3051_s15 = sphi %s3103_s15, %s4306_s15   ;;  %s3047_s14 = sphi %s3101_s14, %s4305_s14  }
   0x9   : > { %p83_p0 = scmp.ne.s32.totalorder %s3051_s15, %s3047_s14  ;;  %p84_p1 = scmp.eq.s32.totalorder %s3122_s1, 0 }
   0xa   : > { %p107_p2 = scmp.eq.s32.totalorder %s3122_s1, 1  ;;  %p113_p3 = scmp.eq.s32.totalorder %s2746_s18, 1 }
   0xb   : > { %p3131_p4 = por %p84_p1, %p83_p0  ;;  %p2747_p5 = scmp.ge.s32.totalorder %s3059_s17, 1 }
   0xc   : > { %p3136_p6 = por %p113_p3, %p83_p0  ;;  %p120_p7 = scmp.lt.s32.totalorder %s3059_s17, 3 }
   0xd   : > { %s132_s23 = sshll.u32 %s4290_s0, 4  ;;  %s3152_s25 = sadd.s32 1, %s3059_s17   ;;  %s133_s23 = int_to_ptr.vmem [resolvable:$true] %s132_s23 }
   0xe   : > { %p3144_p8 = pnand %p2747_p5, %p120_p7  ;;  %s67_s26 = ssub.s32 %s3059_s17, %s3152_s25 }
   0xf   : > { %p68_p12 = scmp.eq.s32.totalorder %s67_s26, 0  ;;  %s70_s27 = sadd.s32 1, %s3055_s16 }
  0x10   : > { %p2871_p10 = pneg %p3144_p8  ;;  %p77_p13 = scmp.ne.s32.totalorder %s3055_s16, %s3051_s15 }
  0x11   : > { %s3061_s28 = smov [#allocation3]   ;;  %p78_p0 = scmp.eq.s32.totalorder %s3059_s17, 0 }
  0x12   : > { %p2872_p11 = pnand %p2871_p10, %p84_p1  ;;  %p3167_p3 = por %p107_p2, %p77_p13 }
  0x13   : > { %s3162_s29 = scalar_select %p68_p12, %s3055_s16, %s70_s27  }
  0x14   : > { %2874 = dma.vmem_to_smem (!%p2872_p11), %s133_s23, 16, %s3061_s28, [#allocation6]  }
  0x15   : > { %s146_s4 = sand.u32 1, %s3055_s16   ;;  %p79_p5 = por %p78_p0, %p77_p13 }
  0x16   : > { %p2884_p7 = scmp.lt.s32.totalorder %s3059_s17, 2  ;;  %s2750_s5 = sshll.u32 %s146_s4, 3 }
  0x17   : > { %s2861_s6 = sshll.u32 %s3059_s17, 3  ;;  %s150_s11 = scalar_lea.vmem [#allocation7], %s2750_s5 }
  0x18   : > { %s155_s9 = scalar_lea.hbm %s4292_s2, %s2861_s6  ;;  %s159_s12 = sshll.u32 %s150_s11, 4  ;;  %s160_s12 = int_to_ptr.vmem [resolvable:$true] %s159_s12 }
  0x19   : > { %s157_s10 = sshll.u32 %s155_s9, 4  ;;  %p3177_p10 = pnand %p2884_p7, %p79_p5  ;;  %s158_s10 = int_to_ptr.hbm [resolvable:$true] %s157_s10 }
  0x1a   : > { %s147_s18 = scalar_lea.sflag [#allocation4], %s146_s4  ;;  %s2959_s21 = sshra.s32 %s158_s10, 4  ;;  %s2960_s21 = int_to_ptr.hbm [resolvable:$true] %s2959_s21 }
  0x1b   : > { %s2961_s22 = scalar_lea.hbm %s2960_s21, 8  ;;  %p2963_p11 = pneg %p3177_p10 }
  0x1c   : > { %p2962_p2 = scmp.ne.s32.totalorder %s2960_s21, %s2961_s22  ;;  %s2966_s27 = scalar_lea.hbm %s4292_s2, 16 }
  0x1d   : > { %p2967_p0 = scmp.lt.s32.totalorder %s2960_s21, %s4292_s2  ;;  %p2968_p5 = scmp.lt.s32.totalorder %s2966_s27, %s2961_s22 }
  0x1e   : > { %p2964_p12 = pnand %p2963_p11, %p2962_p2 }
  0x1f   : > { %p2969_p7 = por %p2968_p5, %p2967_p0 }
  0x20   : > { %p2965_p13 = pneg %p2964_p12 }
  0x22   : > { %p2970_p9 = pnand %p2969_p7, %p2965_p13 }
  0x24   : > { %2973 = shalt.err (!%p2970_p9)
}
  0x25   : > { %2878 = dma.hbm_to_vmem [thread:$0]  (!%p3177_p10), %s158_s10, 128, %s160_s12, %s147_s18  }
  0x26   : > { %168 = sbr.rel (%p3144_p8) target bundleno = 1204 (0x4b4), region = 32 }
  0x2b   : > { %3034 = dma.done.wait (%p84_p1), [#allocation6], 16  }
  0x2c   : > { %3036 = vsyncadd (%p84_p1), [#allocation6], 4294967280  ;;  %s3198_s4 = sand.u32 1, %s3051_s15  }
  0x2d   : > { %s4294_s6 = sshll.u32 %s3198_s4, 3  ;;  %s176_s7 = scalar_lea.sflag [#allocation4], %s3198_s4 }
  0x2e   : > { %s179_s8 = scalar_lea.vmem [#allocation7], %s4294_s6 }
  0x2f   : > { %3038 = dma.done.wait (%p3131_p4), %s176_s7, 128  }
  0x30   : > { %3040 = vsyncadd (%p3131_p4), %s176_s7, 4294967168 }
  0x31   : > { %185 = sfence }
  0x32   : > { %v3208_v0 = vld [vmem:[%s179_s8] sm:$0xff]  ;;  %vm211_vm0 = vcmask 1043456   ;;  %s3062_s19 = smov 80   ;;  %s4295_s24 = smov 112   ;;  %v3069_v40 = vmov 1983009808  }
  0x33   : > { %206 = vst [vmem:[#allocation1] ss:$2 sm:$0xff] %v3208_v0  ;;  %s3064_s9 = smov 48   ;;  %s3065_s10 = smov 64   ;;  %v295_v41 = vunpack.c.l.s4 %v3069_v40  ;;  %vm292_vm1 = vcmask 1047556   ;;  %vm490_vm2 = vcmask 1042432  }
  0x34   : > { %s3066_s11 = smov 96   ;;  %s3067_s12 = smov 32   ;;  %v3070_v55 = vmov 1934713408   ;;  %vm509_vm3 = vcmask 23552   ;;  %vm513_vm4 = vcmask 154624  }
  0x35   : > { %s3068_s13 = smov 16   ;;  %v3280_v46 = vunpack.c.0.s8 %v295_v41  ;;  %v319_v56 = vunpack.c.l.s4 %v3070_v55  ;;  %s3071_s18 = smov 3   ;;  %vm615_vm5 = vcmask 1046528   ;;  %vm759_vm6 = vcmask 1045504  }
  0x36   : > { %s2757_s21 = sld [smem:[#allocation3 + $0x1]]  ;;  %s3072_s26 = smov 127   ;;  %vm903_vm7 = vcmask 1044480   ;;  %vm1333_vm8 = vcmask 1041408  }
  0x37   : > { %v3291_v63 = vunpack.c.0.s8 %v319_v56  ;;  %s2758_s22 = sld [smem:[#allocation3 + $0x2]]  ;;  %s3073_s28 = smov 126  }
  0x38   : > { %s2759_s23 = sld [smem:[#allocation3 + $0x3]]  ;;  %s3074_s5 = smov 125  }
  0x39   : > { %s2760_s27 = sld [smem:[#allocation3 + $0x4]]  ;;  %s3076_s6 = smov 123  }
  0x3a   : > { %v207_v1 = vld.sshfl [vmem:[#allocation1] sm:$0xff pattern:$0x75316420]  ;;  %v208_v2 = vld.sshfl [vmem:[#allocation1 + $0x8] sm:$0xff pattern:$0x75316420] }
  0x3b   : > { %v212_v3 = vsel %vm211_vm0, %v207_v1, -inf  ;;  %226 = vst [vmem:[#allocation1] ss:$2 sm:$0xff] %v3208_v0  ;;  %v219_v5 = vsel %vm211_vm0, %v208_v2, -inf  ;;  %s2761_s7 = sld [smem:[#allocation3 + $0x5]] }
  0x3c   : > { %v213_v4 = vrot.slane %v212_v3, 4  ;;  %v220_v8 = vrot.slane %v219_v5, 4  ;;  %s2762_s8 = sld [smem:[#allocation3 + $0x6]] }
  0x3e   : > { %v214_v6 = vmax.f32 %v212_v3, %v213_v4  ;;  %v221_v11 = vmax.f32 %v219_v5, %v220_v8 }
  0x40   : > { %v215_v7 = vrot.slane %v214_v6, 2  ;;  %v222_v13 = vrot.slane %v221_v11, 2 }
  0x42   : > { %v216_v9 = vmax.f32 %v214_v6, %v215_v7  ;;  %v227_v14 = vld.sshfl [vmem:[#allocation1] sm:$0xff pattern:$0x75316420]  ;;  %v223_v15 = vmax.f32 %v221_v11, %v222_v13  ;;  %v228_v23 = vld.sshfl [vmem:[#allocation1 + $0x8] sm:$0xff pattern:$0x75316420] }
  0x43   : > { %v231_v16 = vsel %vm211_vm0, %v227_v14, 0.0  ;;  %v238_v25 = vsel %vm211_vm0, %v228_v23, 0.0 }
  0x44   : > { %v217_v10 = vrot.slane %v216_v9, 1  ;;  %v232_v17 = vrot.slane %v231_v16, 4  ;;  %v224_v18 = vrot.slane %v223_v15, 1  ;;  %v239_v27 = vrot.slane %v238_v25, 4 }
  0x46   : > { %v3214_v12 = vmax.f32 %v216_v9, %v217_v10  ;;  %v233_v19 = vadd.f32 %v232_v17, %v231_v16  ;;  %v3229_v20 = vmax.f32 %v223_v15, %v224_v18  ;;  %v240_v29 = vadd.f32 %v239_v27, %v238_v25 }
  0x48   : > { %254 = vrot.lane.b32.xlu1 %v3214_v12, %s3062_s19  ;;  %248 = vrot.lane.b32.xlu0 %v3214_v12, %s4295_s24  ;;  %v234_v21 = vrot.slane %v233_v19, 2  ;;  %v241_v30 = vrot.slane %v240_v29, 2 }
  0x49   : > { %260 = vrot.lane.b32.xlu2 %v3214_v12, %s3064_s9 }
  0x4a   : > { %v235_v22 = vadd.f32 %v234_v21, %v233_v19  ;;  %v242_v31 = vadd.f32 %v241_v30, %v240_v29 }
  0x4c   : > { %v236_v24 = vrot.slane %v235_v22, 1  ;;  %v243_v32 = vrot.slane %v242_v31, 1 }
  0x4e   : > { %v237_v26 = vadd.f32 %v236_v24, %v235_v22  ;;  %v244_v33 = vadd.f32 %v243_v32, %v242_v31 }
  0x50   : > { %257 = vrot.lane.b32.xlu1 %v3214_v12, %s3065_s10  ;;  %251 = vrot.lane.b32.xlu0 %v3214_v12, %s3066_s11  ;;  %v3244_v28 = vmul.f32 0.25, %v237_v26  ;;  %v3264_v34 = vmul.f32 0.25, %v244_v33 }
  0x51   : > { %263 = vrot.lane.b32.xlu2 %v3214_v12, %s3067_s12 }
  0x58   : > { %270 = vrot.lane.b32.xlu1 %v3229_v20, %s4295_s24  ;;  %266 = vrot.lane.b32.xlu0 %v3214_v12, %s3068_s13 }
  0x59   : > { %273 = vrot.lane.b32.xlu2 %v3229_v20, %s3066_s11 }
  0x60   : > { %279 = vrot.lane.b32.xlu1 %v3229_v20, %s3065_s10  ;;  %276 = vrot.lane.b32.xlu0 %v3229_v20, %s3062_s19 }
  0x61   : > { %282 = vrot.lane.b32.xlu2 %v3229_v20, %s3064_s9 }
  0x68   : > { %288 = vrot.lane.b32.xlu1 %v3229_v20, %s3068_s13  ;;  %285 = vrot.lane.b32.xlu0 %v3229_v20, %s3067_s12 }
  0x69   : > { %369 = vrot.lane.b32.xlu2 %v3244_v28, %s4295_s24 }
  0x70   : > { %372 = vrot.lane.b32.xlu0 %v3244_v28, %s3066_s11  ;;  %375 = vrot.lane.b32.xlu1 %v3244_v28, %s3062_s19 }
  0x71   : > { %378 = vrot.lane.b32.xlu2 %v3244_v28, %s3065_s10 }
  0x78   : > { %381 = vrot.lane.b32.xlu0 %v3244_v28, %s3064_s9  ;;  %384 = vrot.lane.b32.xlu1 %v3244_v28, %s3067_s12 }
  0x79   : > { %387 = vrot.lane.b32.xlu2 %v3244_v28, %s3068_s13 }
  0x80   : > { %391 = vrot.lane.b32.xlu0 %v3264_v34, %s4295_s24  ;;  %394 = vrot.lane.b32.xlu1 %v3264_v34, %s3066_s11  ;;  %s3077_s24 = smov 122  }
  0x81   : > { %397 = vrot.lane.b32.xlu2 %v3264_v34, %s3062_s19 }
  0x88   : > { %400 = vrot.lane.b32.xlu0 %v3264_v34, %s3065_s10  ;;  %403 = vrot.lane.b32.xlu1 %v3264_v34, %s3064_s9 }
  0x89   : > { %406 = vrot.lane.b32.xlu2 %v3264_v34, %s3067_s12 }
  0x90   : > { %409 = vrot.lane.b32.xlu0 %v3264_v34, %s3068_s13 }
  0xa3   : > { %v261_v35 = vpop.permute.xlu2 %260 }
  0xab   : > { %v264_v42 = vpop.permute.xlu2 %263 }
  0xac   : > { %v304_v45 = vrot.slane %v264_v42, 4 }
  0xb3   : > { %v274_v60 = vpop.permute.xlu2 %273 }
  0xb4   : > { %v330_v9 = vrot.slane %v274_v60, 4 }
  0xb6   : > { %v331_v18 = vsel %vm292_vm1, %v330_v9, %v3229_v20 }
  0xb7   : > { %v335_v24 = vperm.slane %v331_v18, %v3280_v46 }
  0xba   : > { %v255_v36 = vpop.permute.xlu1 %254  ;;  %v249_v37 = vpop.permute.xlu0 %248 }
  0xbb   : > { %v298_v43 = vrot.slane %v255_v36, 4  ;;  %v283_v13 = vpop.permute.xlu2 %282 }
  0xbd   : > { %v299_v47 = vsel %vm292_vm1, %v298_v43, %v249_v37 }
  0xbe   : > { %v303_v53 = vperm.slane %v299_v47, %v3280_v46 }
  0xc0   : > { %v316_v61 = vrot.slane %v303_v53, 4  ;;  %v524_v53 = vstv %s2757_s21  ;;  %s2764_s21 = sld [smem:[#allocation3 + $0x8]] }
  0xc2   : > { %v258_v38 = vpop.permute.xlu1 %257  ;;  %v252_v39 = vpop.permute.xlu0 %251 }
  0xc3   : > { %v291_v44 = vrot.slane %v252_v39, 4  ;;  %v305_v52 = vsel %vm292_vm1, %v304_v45, %v258_v38  ;;  %v3318_v39 = vpop.permute.xlu2 %369 }
  0xc4   : > { %v309_v59 = vperm.slane %v305_v52, %v3280_v46 }
  0xc5   : > { %v293_v50 = vsel %vm292_vm1, %v291_v44, %v3214_v12 }
  0xc6   : > { %v297_v57 = vperm.slane %v293_v50, %v3280_v46 }
  0xc8   : > { %v317_v3 = vsel %vm292_vm1, %v316_v61, %v297_v57  ;;  %v538_v61 = vstv %s2758_s22  ;;  %s3075_s22 = smov 124  }
  0xc9   : > { %v321_v7 = vperm.slane %v317_v3, %v3291_v63 }
  0xca   : > { %v271_v48 = vpop.permute.xlu1 %270  ;;  %v267_v49 = vpop.permute.xlu0 %266 }
  0xcb   : > { %v310_v51 = vrot.slane %v267_v49, 4  ;;  %v3320_v40 = vpop.permute.xlu2 %378 }
  0xcd   : > { %v311_v54 = vsel %vm292_vm1, %v310_v51, %v261_v35 }
  0xce   : > { %v315_v58 = vperm.slane %v311_v54, %v3280_v46 }
  0xd0   : > { %v322_v62 = vrot.slane %v315_v58, 4 }
  0xd2   : > { %v280_v1 = vpop.permute.xlu1 %279  ;;  %v277_v2 = vpop.permute.xlu0 %276  ;;  %v323_v4 = vsel %vm292_vm1, %v322_v62, %v309_v59  ;;  %v552_v62 = vstv %s2759_s23  ;;  %s2765_s23 = sld [smem:[#allocation3 + $0x9]] }
  0xd3   : > { %v336_v5 = vrot.slane %v277_v2, 4  ;;  %v327_v6 = vperm.slane %v323_v4, %v3291_v63  ;;  %v3324_v42 = vpop.permute.xlu2 %387 }
  0xd5   : > { %v328_v8 = vrot.slane %v327_v6, 4  ;;  %v337_v10 = vsel %vm292_vm1, %v336_v5, %v271_v48  ;;  %v566_v5 = vstv %s2760_s27  ;;  %s2766_s27 = sld [smem:[#allocation3 + $0xa]] }
  0xd6   : > { %v341_v14 = vperm.slane %v337_v10, %v3280_v46 }
  0xd7   : > { %v329_v11 = vsel %vm292_vm1, %v328_v8, %v321_v7 }
  0xd8   : > { %v491_v12 = vrot.slane %v329_v11, 5  ;;  %v354_v25 = vrot.slane %v341_v14, 4 }
  0xda   : > { %v289_v15 = vpop.permute.xlu1 %288  ;;  %v496_v16 = vsel %vm490_vm2, 0.0, %v491_v12  ;;  %v286_v17 = vpop.permute.xlu0 %285  ;;  %v355_v30 = vsel %vm292_vm1, %v354_v25, %v335_v24  ;;  %v647_v25 = vstv %s2765_s23  ;;  %s2771_s23 = sld [smem:[#allocation3 + $0xf]] }
  0xdb   : > { %v348_v19 = vrot.slane %v289_v15, 4  ;;  %500 = vrot.lane.b32.xlu1 %v496_v16, %s3071_s18  ;;  %v342_v21 = vrot.slane %v286_v17, 4  ;;  %v359_v32 = vperm.slane %v355_v30, %v3291_v63  ;;  %v3330_v45 = vpop.permute.xlu2 %397  ;;  %v594_v15 = vstv %s2762_s8  ;;  %s2768_s8 = sld [smem:[#allocation3 + $0xc]] }
  0xdc   : > { %v626_v17 = vstv %s2764_s21  ;;  %s2769_s21 = sld [smem:[#allocation3 + $0xd]] }
  0xdd   : > { %v349_v22 = vsel %vm292_vm1, %v348_v19, %v283_v13  ;;  %v343_v23 = vsel %vm292_vm1, %v342_v21, %v280_v1 }
  0xde   : > { %v353_v26 = vperm.slane %v349_v22, %v3280_v46  ;;  %v347_v27 = vperm.slane %v343_v23, %v3280_v46 }
  0xe0   : > { %v360_v29 = vrot.slane %v353_v26, 4 }
  0xe2   : > { %v361_v20 = vsel %vm292_vm1, %v360_v29, %v347_v27  ;;  %v3322_v41 = vpop.permute.xlu1 %375  ;;  %v3326_v43 = vpop.permute.xlu0 %372  ;;  %v668_v29 = vstv %s2766_s27  ;;  %s2772_s27 = sld [smem:[#allocation3 + $0x10]] }
  0xe3   : > { %v365_v31 = vperm.slane %v361_v20, %v3291_v63  ;;  %v3336_v49 = vpop.permute.xlu2 %406 }
  0xe5   : > { %v366_v33 = vrot.slane %v365_v31, 4 }
  0xe7   : > { %v367_v35 = vsel %vm292_vm1, %v366_v33, %v359_v32 }
  0xe8   : > { %v492_v36 = vrot.slane %v367_v35, 5 }
  0xea   : > { %v497_v37 = vsel %vm490_vm2, %v492_v36, 0.0  ;;  %v493_v38 = vsel %vm490_vm2, %v491_v12, %v492_v36  ;;  %v3328_v44 = vpop.permute.xlu1 %384  ;;  %v3332_v47 = vpop.permute.xlu0 %381  ;;  %v580_v12 = vstv %s2761_s7  ;;  %s2767_s7 = sld [smem:[#allocation3 + $0xb]] }
  0xeb   : > { %504 = vrot.lane.b32.xlu0 %v497_v37, %s3071_s18  ;;  %502 = vrot.lane.b32.xlu2 %v493_v38, %s3071_s18 }
  0xf2   : > { %v3334_v48 = vpop.permute.xlu1 %394  ;;  %v3338_v50 = vpop.permute.xlu0 %391 }
  0xfa   : > { %v3340_v51 = vpop.permute.xlu1 %403  ;;  %v3348_v57 = vpop.permute.xlu0 %400 }
 0x102   : > { %v3360_v4 = vpop.permute.xlu0 %409 }
 0x145   : > { %v503_v52 = vpop.permute.xlu2 %502 }
 0x146   : > { %v511_v54 = vsel %vm509_vm3, 0.0, %v503_v52  ;;  %v689_v52 = vstv %s2767_s7  ;;  %s2773_s7 = sld [smem:[#allocation3 + $0x11]] }
 0x147   : > { %v3344_v55 = vsel %vm513_vm4, %v511_v54, 0.0 }
 0x148   : > { %v526_v56 = vmul.f32 %v524_v53, %v3344_v55  ;;  %v554_v6 = vmul.f32 %v552_v62, %v3344_v55  ;;  %v540_v7 = vmul.f32 %v538_v61, %v3344_v55  ;;  %v568_v8 = vmul.f32 %v566_v5, %v3344_v55 }
 0x149   : > { %v628_v19 = vmul.f32 %v626_v17, %v3344_v55  ;;  %v596_v22 = vmul.f32 %v594_v15, %v3344_v55  ;;  %v582_v23 = vmul.f32 %v580_v12, %v3344_v55  ;;  %v649_v31 = vmul.f32 %v647_v25, %v3344_v55 }
 0x14a   : > { %531 = vrot.lane.b32.xlu2 %v526_v56, %s3072_s26  ;;  %v670_v32 = vmul.f32 %v668_v29, %v3344_v55 }
 0x14b   : > { %v634_v24 = vrot.slane %v628_v19, 1  ;;  %v655_v37 = vrot.slane %v649_v31, 1 }
 0x14c   : > { %v676_v38 = vrot.slane %v670_v32, 1 }
 0x14d   : > { %v501_v58 = vpop.permute.xlu1 %500 }
 0x14e   : > { %v510_v59 = vsel %vm509_vm3, 0.0, %v501_v58 }
 0x14f   : > { %v3352_v60 = vsel %vm513_vm4, %v510_v59, 0.0 }
 0x150   : > { %v525_v1 = vmul.f32 %v524_v53, %v3352_v60  ;;  %v539_v2 = vmul.f32 %v538_v61, %v3352_v60  ;;  %v553_v3 = vmul.f32 %v552_v62, %v3352_v60  ;;  %v581_v13 = vmul.f32 %v580_v12, %v3352_v60 }
 0x151   : > { %v567_v14 = vmul.f32 %v566_v5, %v3352_v60  ;;  %v595_v16 = vmul.f32 %v594_v15, %v3352_v60  ;;  %v648_v26 = vmul.f32 %v647_v25, %v3352_v60  ;;  %v627_v27 = vmul.f32 %v626_v17, %v3352_v60 }
 0x152   : > { %529 = vrot.lane.b32.xlu1 %v525_v1, %s3072_s26  ;;  %543 = vrot.lane.b32.xlu0 %v539_v2, %s3073_s28  ;;  %v669_v20 = vmul.f32 %v668_v29, %v3352_v60  ;;  %v691_v62 = vmul.f32 %v689_v52, %v3344_v55  ;;  %v690_v12 = vmul.f32 %v689_v52, %v3352_v60 }
 0x153   : > { %557 = vrot.lane.b32.xlu2 %v553_v3, %s3074_s5  ;;  %v654_v33 = vrot.slane %v648_v26, 1  ;;  %v633_v35 = vrot.slane %v627_v27, 1 }
 0x154   : > { %v675_v36 = vrot.slane %v669_v20, 1  ;;  %v697_v5 = vrot.slane %v691_v62, 1 }
 0x155   : > { %v656_v53 = vsel %vm615_vm5, %v654_v33, %v655_v37  ;;  %v635_v54 = vsel %vm615_vm5, %v633_v35, %v634_v24 }
 0x156   : > { %v677_v59 = vsel %vm615_vm5, %v675_v36, %v676_v38  ;;  %v791_v36 = vstv %s2772_s27  ;;  %s2778_s27 = sld [smem:[#allocation3 + $0x16]] }
 0x15a   : > { %559 = vrot.lane.b32.xlu0 %v554_v6, %s3074_s5  ;;  %545 = vrot.lane.b32.xlu1 %v540_v7, %s3073_s28  ;;  %v710_v6 = vstv %s2768_s8  ;;  %v731_v7 = vstv %s2769_s21  ;;  %s2774_s8 = sld [smem:[#allocation3 + $0x12]] }
 0x15b   : > { %573 = vrot.lane.b32.xlu2 %v568_v8, %s3075_s22  ;;  %v712_v15 = vmul.f32 %v710_v6, %v3344_v55  ;;  %s2775_s21 = sld [smem:[#allocation3 + $0x13]] }
 0x15d   : > { %v505_v9 = vpop.permute.xlu0 %504 }
 0x15e   : > { %v512_v10 = vsel %vm509_vm3, 0.0, %v505_v9 }
 0x15f   : > { %v3370_v11 = vsel %vm513_vm4, %v512_v10, 0.0  ;;  %v711_v10 = vmul.f32 %v710_v6, %v3352_v60 }
 0x160   : > { %v629_v18 = vmul.f32 %v626_v17, %v3370_v11  ;;  %v671_v56 = vmul.f32 %v668_v29, %v3370_v11  ;;  %v650_v58 = vmul.f32 %v647_v25, %v3370_v11  ;;  %v692_v61 = vmul.f32 %v689_v52, %v3370_v11 }
 0x161   : > { %v717_v17 = vrot.slane %v711_v10, 1  ;;  %v734_v26 = vmul.f32 %v731_v7, %v3370_v11  ;;  %v713_v27 = vmul.f32 %v710_v6, %v3370_v11  ;;  %v833_v6 = vstv %s2774_s8  ;;  %s2780_s8 = sld [smem:[#allocation3 + $0x18]] }
 0x162   : > { %585 = vrot.lane.b32.xlu0 %v581_v13, %s3076_s6  ;;  %571 = vrot.lane.b32.xlu1 %v567_v14, %s3075_s22  ;;  %v636_v21 = vrot.slane %v629_v18, 1  ;;  %v678_v1 = vrot.slane %v671_v56, 1  ;;  %v657_v2 = vrot.slane %v650_v58, 1  ;;  %v699_v3 = vrot.slane %v692_v61, 1 }
 0x163   : > { %599 = vrot.lane.b32.xlu2 %v595_v16, %s3077_s24  ;;  %v732_v14 = vmul.f32 %v731_v7, %v3352_v60  ;;  %v733_v16 = vmul.f32 %v731_v7, %v3344_v55  ;;  %v696_v18 = vrot.slane %v690_v12, 1  ;;  %v741_v31 = vrot.slane %v734_v26, 1 }
 0x164   : > { %v637_v30 = vsel %vm615_vm5, %v634_v24, %v636_v21  ;;  %v679_v8 = vsel %vm615_vm5, %v676_v38, %v678_v1  ;;  %v658_v9 = vsel %vm615_vm5, %v655_v37, %v657_v2  ;;  %v700_v13 = vsel %vm615_vm5, %v697_v5, %v699_v3 }
 0x165   : > { %v738_v19 = vrot.slane %v732_v14, 1  ;;  %v718_v21 = vrot.slane %v712_v15, 1  ;;  %v698_v25 = vsel %vm615_vm5, %v696_v18, %v697_v5  ;;  %v720_v32 = vrot.slane %v713_v27, 1 }
 0x166   : > { %v812_v37 = vstv %s2773_s7  ;;  %v794_v10 = vmul.f32 %v791_v36, %v3370_v11  ;;  %v835_v14 = vmul.f32 %v833_v6, %v3344_v55  ;;  %s2779_s7 = sld [smem:[#allocation3 + $0x17]] }
 0x167   : > { %v719_v24 = vsel %vm615_vm5, %v717_v17, %v718_v21  ;;  %v721_v52 = vsel %vm615_vm5, %v718_v21, %v720_v32  ;;  %v813_v58 = vmul.f32 %v812_v37, %v3352_v60  ;;  %v814_v61 = vmul.f32 %v812_v37, %v3344_v55 }
 0x168   : > { %v841_v18 = vrot.slane %v835_v14, 2 }
 0x169   : > { %v819_v2 = vrot.slane %v813_v58, 2  ;;  %v820_v5 = vrot.slane %v814_v61, 2 }
 0x16a   : > { %601 = vrot.lane.b32.xlu0 %v596_v22, %s3077_s24  ;;  %587 = vrot.lane.b32.xlu1 %v582_v23, %s3076_s6  ;;  %v739_v22 = vrot.slane %v733_v16, 1  ;;  %v770_v23 = vstv %s2771_s23  ;;  %s2776_s23 = sld [smem:[#allocation3 + $0x14]]  ;;  %v801_v16 = vrot.slane %v794_v10, 2 }
 0x16b   : > { %640 = vrot.lane.b32.xlu2 %v637_v30, %s3072_s26  ;;  %v773_v30 = vmul.f32 %v770_v23, %v3370_v11  ;;  %v772_v20 = vmul.f32 %v770_v23, %v3344_v55  ;;  %v821_v12 = vsel %vm759_vm6, %v819_v2, %v820_v5 }
 0x16c   : > { %v740_v29 = vsel %vm615_vm5, %v738_v19, %v739_v22  ;;  %v742_v38 = vsel %vm615_vm5, %v739_v22, %v741_v31  ;;  %v854_v19 = vstv %s2775_s21  ;;  %s2781_s21 = sld [smem:[#allocation3 + $0x19]] }
 0x16d   : > { %v780_v33 = vrot.slane %v773_v30, 2  ;;  %v778_v35 = vrot.slane %v772_v20, 2 }
 0x16f   : > { %v781_v56 = vsel %vm759_vm6, %v778_v35, %v780_v33 }
 0x170   : > { %v875_v21 = vstv %s2776_s23  ;;  %s2782_s23 = sld [smem:[#allocation3 + $0x1a]] }
 0x171   : > { %v876_v27 = vmul.f32 %v875_v21, %v3352_v60  ;;  %v877_v30 = vmul.f32 %v875_v21, %v3344_v55 }
 0x172   : > { %659 = vrot.lane.b32.xlu0 %v656_v53, %s3073_s28  ;;  %638 = vrot.lane.b32.xlu1 %v635_v54, %s3072_s26  ;;  %v792_v53 = vmul.f32 %v791_v36, %v3352_v60  ;;  %v771_v54 = vmul.f32 %v770_v23, %v3352_v60 }
 0x173   : > { %680 = vrot.lane.b32.xlu2 %v677_v59, %s3074_s5  ;;  %v793_v59 = vmul.f32 %v791_v36, %v3344_v55  ;;  %v882_v32 = vrot.slane %v876_v27, 2  ;;  %v914_v36 = vstv %s2778_s27  ;;  %s2783_s27 = sld [smem:[#allocation3 + $0x1b]] }
 0x174   : > { %v798_v62 = vrot.slane %v792_v53, 2  ;;  %v777_v1 = vrot.slane %v771_v54, 2  ;;  %v857_v53 = vmul.f32 %v854_v19, %v3370_v11 }
 0x175   : > { %v799_v3 = vrot.slane %v793_v59, 2  ;;  %v916_v59 = vmul.f32 %v914_v36, %v3344_v55 }
 0x177   : > { %v800_v7 = vsel %vm759_vm6, %v798_v62, %v799_v3  ;;  %v802_v23 = vsel %vm759_vm6, %v799_v3, %v801_v16  ;;  %v864_v62 = vrot.slane %v857_v53, 2  ;;  %v922_v2 = vrot.slane %v916_v59, 3 }
 0x178   : > { %v935_v3 = vstv %s2779_s7  ;;  %s2785_s7 = sld [smem:[#allocation3 + $0x1d]] }
 0x17a   : > { %682 = vrot.lane.b32.xlu0 %v679_v8, %s3074_s5  ;;  %661 = vrot.lane.b32.xlu1 %v658_v9, %s3073_s28  ;;  %v779_v8 = vsel %vm759_vm6, %v777_v1, %v778_v35  ;;  %v815_v9 = vmul.f32 %v812_v37, %v3370_v11  ;;  %v883_v35 = vrot.slane %v877_v30, 2 }
 0x17b   : > { %703 = vrot.lane.b32.xlu2 %v700_v13, %s3075_s22  ;;  %v836_v13 = vmul.f32 %v833_v6, %v3370_v11 }
 0x17c   : > { %v822_v15 = vrot.slane %v815_v9, 2  ;;  %v884_v54 = vsel %vm759_vm6, %v882_v32, %v883_v35  ;;  %v915_v9 = vmul.f32 %v914_v36, %v3352_v60 }
 0x17d   : > { %v843_v17 = vrot.slane %v836_v13, 2  ;;  %v937_v13 = vmul.f32 %v935_v3, %v3344_v55 }
 0x17e   : > { %v823_v22 = vsel %vm759_vm6, %v820_v5, %v822_v15  ;;  %v956_v5 = vstv %s2780_s8  ;;  %s2786_s8 = sld [smem:[#allocation3 + $0x1e]] }
 0x17f   : > { %v844_v26 = vsel %vm759_vm6, %v841_v18, %v843_v17  ;;  %v958_v14 = vmul.f32 %v956_v5, %v3344_v55  ;;  %v921_v17 = vrot.slane %v915_v9, 3 }
 0x182   : > { %722 = vrot.lane.b32.xlu0 %v719_v24, %s3076_s6  ;;  %701 = vrot.lane.b32.xlu1 %v698_v25, %s3075_s22  ;;  %v855_v24 = vmul.f32 %v854_v19, %v3352_v60  ;;  %v834_v25 = vmul.f32 %v833_v6, %v3352_v60 }
 0x183   : > { %743 = vrot.lane.b32.xlu2 %v740_v29, %s3077_s24  ;;  %v856_v29 = vmul.f32 %v854_v19, %v3344_v55  ;;  %v943_v19 = vrot.slane %v937_v13, 3  ;;  %v1057_v13 = vstv %s2785_s7  ;;  %s2790_s7 = sld [smem:[#allocation3 + $0x22]] }
 0x184   : > { %v861_v20 = vrot.slane %v855_v24, 2  ;;  %v840_v31 = vrot.slane %v834_v25, 2  ;;  %v923_v24 = vsel %vm903_vm7, %v921_v17, %v922_v2  ;;  %v959_v25 = vmul.f32 %v956_v5, %v3370_v11 }
 0x185   : > { %v862_v33 = vrot.slane %v856_v29, 2 }
 0x187   : > { %v863_v37 = vsel %vm759_vm6, %v861_v20, %v862_v33 }
 0x18a   : > { %745 = vrot.lane.b32.xlu0 %v742_v38, %s3077_s24  ;;  %724 = vrot.lane.b32.xlu1 %v721_v52, %s3076_s6  ;;  %v842_v38 = vsel %vm759_vm6, %v840_v31, %v841_v18  ;;  %v878_v52 = vmul.f32 %v875_v21, %v3370_v11  ;;  %v964_v21 = vrot.slane %v958_v14, 3  ;;  %v966_v31 = vrot.slane %v959_v25, 3 }
 0x18b   : > { %784 = vrot.lane.b32.xlu2 %v781_v56, %s3072_s26  ;;  %v917_v56 = vmul.f32 %v914_v36, %v3370_v11 }
 0x18c   : > { %v885_v61 = vrot.slane %v878_v52, 2 }
 0x18d   : > { %v924_v1 = vrot.slane %v917_v56, 3 }
 0x18e   : > { %v886_v6 = vsel %vm759_vm6, %v883_v35, %v885_v61  ;;  %v998_v35 = vstv %s2782_s23  ;;  %s2788_s23 = sld [smem:[#allocation3 + $0x20]] }
 0x18f   : > { %v925_v10 = vsel %vm903_vm7, %v922_v2, %v924_v1  ;;  %v1000_v59 = vmul.f32 %v998_v35, %v3344_v55 }
 0x192   : > { %803 = vrot.lane.b32.xlu0 %v800_v7, %s3073_s28  ;;  %782 = vrot.lane.b32.xlu1 %v779_v8, %s3072_s26  ;;  %v865_v7 = vsel %vm759_vm6, %v862_v33, %v864_v62  ;;  %v936_v8 = vmul.f32 %v935_v3, %v3352_v60 }
 0x193   : > { %824 = vrot.lane.b32.xlu2 %v821_v12, %s3074_s5  ;;  %v957_v12 = vmul.f32 %v956_v5, %v3352_v60  ;;  %v1006_v5 = vrot.slane %v1000_v59, 3 }
 0x194   : > { %v942_v16 = vrot.slane %v936_v8, 3 }
 0x195   : > { %v963_v18 = vrot.slane %v957_v12, 3  ;;  %v1001_v12 = vmul.f32 %v998_v35, %v3370_v11 }
 0x197   : > { %v965_v27 = vsel %vm903_vm7, %v963_v18, %v964_v21 }
 0x19a   : > { %826 = vrot.lane.b32.xlu0 %v823_v22, %s3074_s5  ;;  %805 = vrot.lane.b32.xlu1 %v802_v23, %s3073_s28  ;;  %v977_v22 = vstv %s2781_s21  ;;  %v944_v23 = vsel %vm903_vm7, %v942_v16, %v943_v19  ;;  %s2787_s21 = sld [smem:[#allocation3 + $0x1f]]  ;;  %v1060_v16 = vmul.f32 %v1057_v13, %v3370_v11 }
 0x19b   : > { %847 = vrot.lane.b32.xlu2 %v844_v26, %s3075_s22  ;;  %v938_v26 = vmul.f32 %v935_v3, %v3370_v11  ;;  %v980_v29 = vmul.f32 %v977_v22, %v3370_v11  ;;  %v979_v30 = vmul.f32 %v977_v22, %v3344_v55  ;;  %v978_v53 = vmul.f32 %v977_v22, %v3352_v60 }
 0x19d   : > { %v945_v32 = vrot.slane %v938_v26, 3  ;;  %v987_v33 = vrot.slane %v980_v29, 3  ;;  %v985_v36 = vrot.slane %v979_v30, 3  ;;  %v984_v3 = vrot.slane %v978_v53, 3 }
 0x19e   : > { %v1078_v26 = vstv %s2786_s8  ;;  %s3541_s8 = sld [smem:[#allocation3]] }
 0x19f   : > { %v946_v52 = vsel %vm903_vm7, %v943_v19, %v945_v32  ;;  %v988_v56 = vsel %vm903_vm7, %v985_v36, %v987_v33  ;;  %v986_v9 = vsel %vm903_vm7, %v984_v3, %v985_v36  ;;  %v1059_v19 = vmul.f32 %v1057_v13, %v3344_v55 }
 0x1a0   : > { %v1099_v32 = vstv %s2787_s21  ;;  %v1080_v36 = vmul.f32 %v1078_v26, %v3344_v55  ;;  %s2792_s21 = sld [smem:[#allocation3 + $0x24]] }
 0x1a1   : > { %v1065_v25 = vrot.slane %v1059_v19, 4 }
 0x1a2   : > { %866 = vrot.lane.b32.xlu0 %v863_v37, %s3076_s6  ;;  %845 = vrot.lane.b32.xlu1 %v842_v38, %s3075_s22  ;;  %v999_v37 = vmul.f32 %v998_v35, %v3352_v60  ;;  %v967_v38 = vsel %vm903_vm7, %v964_v21, %v966_v31  ;;  %v1079_v31 = vmul.f32 %v1078_v26, %v3352_v60 }
 0x1a3   : > { %887 = vrot.lane.b32.xlu2 %v884_v54, %s3077_s24  ;;  %v1019_v54 = vstv %s2783_s27  ;;  %v1100_v35 = vmul.f32 %v1099_v32, %v3352_v60  ;;  %s2789_s27 = sld [smem:[#allocation3 + $0x21]] }
 0x1a4   : > { %v3463_v58 = vpop.permute.xlu2 %531  ;;  %v1020_v61 = vmul.f32 %v1019_v54, %v3352_v60  ;;  %v1005_v62 = vrot.slane %v999_v37, 3  ;;  %v1021_v1 = vmul.f32 %v1019_v54, %v3344_v55 }
 0x1a5   : > { %v1106_v59 = vrot.slane %v1100_v35, 4 }
 0x1a6   : > { %v1027_v8 = vrot.slane %v1021_v1, 3  ;;  %v1081_v1 = vmul.f32 %v1078_v26, %v3370_v11 }
 0x1aa   : > { %889 = vrot.lane.b32.xlu0 %v886_v6, %s3077_s24  ;;  %868 = vrot.lane.b32.xlu1 %v865_v7, %s3076_s6  ;;  %v1026_v6 = vrot.slane %v1020_v61, 3  ;;  %v1007_v7 = vsel %vm903_vm7, %v1005_v62, %v1006_v5  ;;  %v1086_v61 = vrot.slane %v1080_v36, 4 }
 0x1ab   : > { %928 = vrot.lane.b32.xlu2 %v925_v10, %s3072_s26  ;;  %v1022_v10 = vmul.f32 %v1019_v54, %v3370_v11  ;;  %v1085_v54 = vrot.slane %v1079_v31, 4  ;;  %v518_v31 = vstv %s3541_s8  ;;  %s2795_s8 = sld [smem:[#allocation3 + $0x27]] }
 0x1ac   : > { %v1028_v14 = vsel %vm903_vm7, %v1026_v6, %v1027_v8  ;;  %v1102_v6 = vmul.f32 %v1099_v32, %v3370_v11  ;;  %v519_v35 = vmul.f32 %v518_v31, %v3352_v60 }
 0x1ad   : > { %v3477_v15 = vpop.permute.xlu2 %557  ;;  %v1029_v22 = vrot.slane %v1022_v10, 3  ;;  %v1087_v3 = vsel %vm211_vm0, %v1085_v54, %v1086_v61 }
 0x1ae   : > { %v1109_v19 = vrot.slane %v1102_v6, 4  ;;  %v520_v6 = vmul.f32 %v518_v31, %v3344_v55 }
 0x1af   : > { %v1030_v29 = vsel %vm903_vm7, %v1027_v8, %v1029_v22 }
 0x1b2   : > { %947 = vrot.lane.b32.xlu0 %v944_v23, %s3073_s28  ;;  %926 = vrot.lane.b32.xlu1 %v923_v24, %s3072_s26  ;;  %v1008_v23 = vrot.slane %v1001_v12, 3  ;;  %v1067_v24 = vrot.slane %v1060_v16, 4 }
 0x1b3   : > { %968 = vrot.lane.b32.xlu2 %v965_v27, %s3074_s5  ;;  %v1058_v27 = vmul.f32 %v1057_v13, %v3352_v60  ;;  %v1088_v13 = vrot.slane %v1081_v1, 4 }
 0x1b4   : > { %v1009_v30 = vsel %vm903_vm7, %v1006_v5, %v1008_v23  ;;  %v1068_v33 = vsel %vm211_vm0, %v1065_v25, %v1067_v24 }
 0x1b5   : > { %v3489_v20 = vpop.permute.xlu2 %573  ;;  %v1089_v23 = vsel %vm211_vm0, %v1086_v61, %v1088_v13 }
 0x1ba   : > { %970 = vrot.lane.b32.xlu0 %v967_v38, %s3074_s5  ;;  %949 = vrot.lane.b32.xlu1 %v946_v52, %s3073_s28  ;;  %v1101_v52 = vmul.f32 %v1099_v32, %v3344_v55 }
 0x1bb   : > { %991 = vrot.lane.b32.xlu2 %v988_v56, %s3075_s22  ;;  %v1064_v56 = vrot.slane %v1058_v27, 4 }
 0x1bc   : > { %v1107_v62 = vrot.slane %v1101_v52, 4 }
 0x1bd   : > { %v3502_v2 = vpop.permute.xlu2 %599  ;;  %v1066_v5 = vsel %vm211_vm0, %v1064_v56, %v1065_v25  ;;  %v1141_v25 = vstv %s2789_s27  ;;  %s2793_s27 = sld [smem:[#allocation3 + $0x25]] }
 0x1be   : > { %v1108_v8 = vsel %vm211_vm0, %v1106_v59, %v1107_v62  ;;  %v1110_v26 = vsel %vm211_vm0, %v1107_v62, %v1109_v19  ;;  %v1142_v27 = vmul.f32 %v1141_v25, %v3352_v60  ;;  %v1143_v36 = vmul.f32 %v1141_v25, %v3344_v55 }
 0x1bf   : > { %v1200_v19 = vstv %s2792_s21  ;;  %s2796_s21 = sld [smem:[#allocation3 + $0x28]] }
 0x1c0   : > { %v1148_v62 = vrot.slane %v1142_v27, 4 }
 0x1c2   : > { %1010 = vrot.lane.b32.xlu0 %v1007_v7, %s3076_s6  ;;  %989 = vrot.lane.b32.xlu1 %v986_v9, %s3075_s22  ;;  %v1120_v7 = vstv %s2788_s23  ;;  %s2763_s23 = sld [smem:[#allocation3 + $0x7]] }
 0x1c3   : > { %1031 = vrot.lane.b32.xlu2 %v1028_v14, %s3077_s24  ;;  %v1123_v9 = vmul.f32 %v1120_v7, %v3370_v11  ;;  %v1122_v14 = vmul.f32 %v1120_v7, %v3344_v55 }
 0x1c4   : > { %v3513_v17 = vpop.permute.xlu1 %529  ;;  %v3515_v18 = vpop.permute.xlu0 %543 }
 0x1c5   : > { %v3518_v21 = vpop.permute.xlu2 %640  ;;  %v1130_v22 = vrot.slane %v1123_v9, 4  ;;  %v1128_v24 = vrot.slane %v1122_v14, 4  ;;  %v535_v59 = vadd.f32 %v3513_v17, %v519_v35  ;;  %v1144_v9 = vmul.f32 %v1141_v25, %v3370_v11 }
 0x1c7   : > { %v1131_v32 = vsel %vm211_vm0, %v1128_v24, %v1130_v22  ;;  %v549_v13 = vadd.f32 %v3515_v18, %v535_v59  ;;  %v1151_v27 = vrot.slane %v1144_v9, 4  ;;  %v1221_v59 = vstv %s2793_s27  ;;  %s2770_s27 = sld [smem:[#allocation3 + $0xe]] }
 0x1ca   : > { %1033 = vrot.lane.b32.xlu0 %v1030_v29, %s3077_s24  ;;  %1012 = vrot.lane.b32.xlu1 %v1009_v30, %s3076_s6  ;;  %v1121_v29 = vmul.f32 %v1120_v7, %v3352_v60  ;;  %v1162_v30 = vstv %s2790_s7  ;;  %s2794_s7 = sld [smem:[#allocation3 + $0x26]] }
 0x1cb   : > { %1071 = vrot.lane.b32.xlu2 %v1068_v33, %s3072_s26  ;;  %v1163_v33 = vmul.f32 %v1162_v30, %v3352_v60  ;;  %v1164_v56 = vmul.f32 %v1162_v30, %v3344_v55 }
 0x1cc   : > { %v3530_v37 = vpop.permute.xlu1 %545  ;;  %v3532_v38 = vpop.permute.xlu0 %559  ;;  %v1127_v1 = vrot.slane %v1121_v29, 4  ;;  %v563_v29 = vadd.f32 %v3477_v15, %v549_v13  ;;  %v1222_v15 = vmul.f32 %v1221_v59, %v3352_v60 }
 0x1cd   : > { %v3535_v53 = vpop.permute.xlu2 %680  ;;  %v1170_v7 = vrot.slane %v1164_v56, 4 }
 0x1ce   : > { %v1129_v17 = vsel %vm211_vm0, %v1127_v1, %v1128_v24  ;;  %v1202_v24 = vmul.f32 %v1200_v19, %v3344_v55 }
 0x1d0   : > { %v1208_v56 = vrot.slane %v1202_v24, 5 }
 0x1d2   : > { %1090 = vrot.lane.b32.xlu0 %v1087_v3, %s3073_s28  ;;  %1069 = vrot.lane.b32.xlu1 %v1066_v5, %s3072_s26  ;;  %v1169_v3 = vrot.slane %v1163_v33, 4  ;;  %v1149_v5 = vrot.slane %v1143_v36, 4  ;;  %v608_v36 = vstv %s2763_s23  ;;  %s2797_s23 = sld [smem:[#allocation3 + $0x29]] }
 0x1d3   : > { %1111 = vrot.lane.b32.xlu2 %v1108_v8, %s3074_s5  ;;  %v1165_v8 = vmul.f32 %v1162_v30, %v3370_v11 }
 0x1d4   : > { %v572_v10 = vpop.permute.xlu1 %571  ;;  %v3548_v12 = vpop.permute.xlu0 %585  ;;  %v1150_v14 = vsel %vm211_vm0, %v1148_v62, %v1149_v5  ;;  %v1171_v22 = vsel %vm211_vm0, %v1169_v3, %v1170_v7  ;;  %v1201_v62 = vmul.f32 %v1200_v19, %v3352_v60 }
 0x1d5   : > { %v3551_v16 = vpop.permute.xlu2 %703  ;;  %v577_v35 = vadd.f32 %v572_v10, %v563_v29 }
 0x1da   : > { %1113 = vrot.lane.b32.xlu0 %v1110_v26, %s3074_s5  ;;  %1092 = vrot.lane.b32.xlu1 %v1089_v23, %s3073_s28  ;;  %v1203_v23 = vmul.f32 %v1200_v19, %v3370_v11  ;;  %v536_v26 = vadd.f32 %v3463_v58, %v520_v6  ;;  %v1152_v58 = vsel %vm211_vm0, %v1149_v5, %v1151_v27  ;;  %v1242_v6 = vstv %s2794_s7  ;;  %s2799_s7 = sld [smem:[#allocation3 + $0x2b]] }
 0x1db   : > { %1134 = vrot.lane.b32.xlu2 %v1131_v32, %s3075_s22  ;;  %v1172_v32 = vrot.slane %v1165_v8, 4  ;;  %v1243_v5 = vmul.f32 %v1242_v6, %v3352_v60  ;;  %v591_v8 = vadd.f32 %v3548_v12, %v577_v35  ;;  %v611_v12 = vmul.f32 %v608_v36, %v3370_v11 }
 0x1dc   : > { %v3565_v52 = vpop.permute.xlu1 %587  ;;  %v3567_v54 = vpop.permute.xlu0 %601  ;;  %v550_v30 = vadd.f32 %v3530_v37, %v536_v26  ;;  %v1210_v33 = vrot.slane %v1203_v23, 5  ;;  %v609_v37 = vmul.f32 %v608_v36, %v3352_v60  ;;  %v1207_v23 = vrot.slane %v1201_v62, 5 }
 0x1dd   : > { %v3571_v61 = vpop.permute.xlu2 %743  ;;  %v1173_v3 = vsel %vm211_vm0, %v1170_v7, %v1172_v32  ;;  %v610_v7 = vmul.f32 %v608_v36, %v3344_v55  ;;  %v1249_v27 = vrot.slane %v1243_v5, 5  ;;  %v605_v24 = vadd.f32 %v3502_v2, %v591_v8 }
 0x1de   : > { %v564_v1 = vadd.f32 %v3532_v38, %v550_v30  ;;  %v1211_v10 = vsel %vm490_vm2, %v1208_v56, %v1210_v33  ;;  %v1223_v38 = vmul.f32 %v1221_v59, %v3344_v55  ;;  %v616_v26 = vrot.slane %v609_v37, 1 }
 0x1df   : > { %v617_v32 = vrot.slane %v610_v7, 1  ;;  %v1245_v35 = vmul.f32 %v1242_v6, %v3370_v11  ;;  %v1224_v62 = vmul.f32 %v1221_v59, %v3370_v11 }
 0x1e0   : > { %v1229_v30 = vrot.slane %v1223_v38, 5 }
 0x1e1   : > { %v618_v36 = vsel %vm615_vm5, %v616_v26, %v617_v32  ;;  %v1252_v37 = vrot.slane %v1245_v35, 5  ;;  %v1231_v38 = vrot.slane %v1224_v62, 5 }
 0x1e2   : > { %1153 = vrot.lane.b32.xlu0 %v1150_v14, %s3076_s6  ;;  %1132 = vrot.lane.b32.xlu1 %v1129_v17, %s3075_s22  ;;  %v1244_v14 = vmul.f32 %v1242_v6, %v3344_v55  ;;  %v578_v17 = vadd.f32 %v3489_v20, %v564_v1  ;;  %v1263_v1 = vstv %s2795_s8  ;;  %s3656_s8 = sld [smem:[#allocation3 + $0x2c]] }
 0x1e3   : > { %1174 = vrot.lane.b32.xlu2 %v1171_v22, %s3077_s24  ;;  %v1228_v22 = vrot.slane %v1222_v15, 5  ;;  %v623_v15 = vadd.f32 %v618_v36, %v605_v24  ;;  %v1305_v24 = vstv %s2797_s23  ;;  %s3700_s23 = sld [smem:[#allocation3 + $0x2e]] }
 0x1e4   : > { %v3585_v25 = vpop.permute.xlu1 %638  ;;  %v3587_v18 = vpop.permute.xlu0 %659  ;;  %v592_v29 = vadd.f32 %v3565_v52, %v578_v17  ;;  %v1250_v33 = vrot.slane %v1244_v14, 5  ;;  %v1266_v52 = vmul.f32 %v1263_v1, %v3370_v11 }
 0x1e5   : > { %v3592_v31 = vpop.permute.xlu2 %784  ;;  %v1230_v20 = vsel %vm490_vm2, %v1228_v22, %v1229_v30  ;;  %v644_v5 = vadd.f32 %v3585_v25, %v623_v15  ;;  %v1284_v22 = vstv %s2796_s21  ;;  %v1264_v25 = vmul.f32 %v1263_v1, %v3352_v60  ;;  %s3661_s21 = sld [smem:[#allocation3 + $0x2d]] }
 0x1e6   : > { %v1251_v2 = vsel %vm490_vm2, %v1249_v27, %v1250_v33  ;;  %v606_v6 = vadd.f32 %v3567_v54, %v592_v29  ;;  %v1273_v14 = vrot.slane %v1266_v52, 5  ;;  %v1253_v54 = vsel %vm490_vm2, %v1250_v33, %v1252_v37 }
 0x1e7   : > { %v1285_v26 = vmul.f32 %v1284_v22, %v3352_v60  ;;  %v1232_v27 = vsel %vm490_vm2, %v1229_v30, %v1231_v38  ;;  %v418_v15 = vrot.slane %v3322_v41, 4  ;;  %v1308_v38 = vmul.f32 %v1305_v24, %v3370_v11 }
 0x1e9   : > { %v1291_v36 = vrot.slane %v1285_v26, 5  ;;  %v3678_v26 = vsel %vm292_vm1, %v418_v15, %v3318_v39  ;;  %v462_v39 = vrot.slane %v3336_v49, 4 }
 0x1ea   : > { %1176 = vrot.lane.b32.xlu0 %v1173_v3, %s3077_s24  ;;  %1155 = vrot.lane.b32.xlu1 %v1152_v58, %s3076_s6  ;;  %v1209_v58 = vsel %vm490_vm2, %v1207_v23, %v1208_v56  ;;  %v619_v3 = vrot.slane %v611_v12, 1  ;;  %v665_v12 = vadd.f32 %v3587_v18, %v644_v5  ;;  %v1286_v18 = vmul.f32 %v1284_v22, %v3344_v55 }
 0x1eb   : > { %1214 = vrot.lane.b32.xlu2 %v1211_v10, %s3072_s26  ;;  %v1265_v10 = vmul.f32 %v1263_v1, %v3344_v55 }
 0x1ec   : > { %v662_v9 = vpop.permute.xlu1 %661  ;;  %v3608_v13 = vpop.permute.xlu0 %682  ;;  %v620_v7 = vsel %vm615_vm5, %v617_v32, %v619_v3  ;;  %v1306_v32 = vmul.f32 %v1305_v24, %v3352_v60  ;;  %v1270_v3 = vrot.slane %v1264_v25, 5  ;;  %v1292_v37 = vrot.slane %v1286_v18, 5 }
 0x1ed   : > { %v3612_v19 = vpop.permute.xlu2 %824  ;;  %v624_v17 = vadd.f32 %v620_v7, %v606_v6  ;;  %v1271_v23 = vrot.slane %v1265_v10, 5  ;;  %v752_v10 = vstv %s2770_s27  ;;  %s3728_s27 = sld [smem:[#allocation3 + $0x15]] }
 0x1ee   : > { %v1312_v52 = vrot.slane %v1306_v32, 5  ;;  %v1293_v7 = vsel %vm490_vm2, %v1291_v36, %v1292_v37  ;;  %v753_v41 = vmul.f32 %v752_v10, %v3352_v60 }
 0x1ef   : > { %v1274_v29 = vsel %vm490_vm2, %v1271_v23, %v1273_v14  ;;  %v645_v33 = vadd.f32 %v3518_v21, %v624_v17  ;;  %v412_v21 = vrot.slane %v3326_v43, 4  ;;  %v1344_v14 = vstv %s2799_s7  ;;  %s3733_s7 = sld [smem:[#allocation3 + $0x2f]] }
 0x1f0   : > { %v456_v17 = vrot.slane %v3330_v45, 4  ;;  %v760_v32 = vrot.slane %v753_v41, 2  ;;  %v1345_v36 = vmul.f32 %v1344_v14, %v3352_v60 }
 0x1f1   : > { %v666_v62 = vadd.f32 %v662_v9, %v645_v33 }
 0x1f2   : > { %1233 = vrot.lane.b32.xlu0 %v1230_v20, %s3073_s28  ;;  %1212 = vrot.lane.b32.xlu1 %v1209_v58, %s3072_s26  ;;  %v1307_v20 = vmul.f32 %v1305_v24, %v3344_v55  ;;  %v686_v58 = vadd.f32 %v3535_v53, %v665_v12  ;;  %v1287_v53 = vmul.f32 %v1284_v22, %v3370_v11 }
 0x1f3   : > { %1254 = vrot.lane.b32.xlu2 %v1251_v2, %s3074_s5  ;;  %v430_v2 = vrot.slane %v3324_v42, 4  ;;  %v687_v9 = vadd.f32 %v3608_v13, %v666_v62  ;;  %v1272_v42 = vsel %vm490_vm2, %v1270_v3, %v1271_v23  ;;  %v468_v13 = vrot.slane %v3360_v4, 4 }
 0x1f4   : > { %v702_v56 = vpop.permute.xlu1 %701  ;;  %v723_v59 = vpop.permute.xlu0 %722  ;;  %v1313_v5 = vrot.slane %v1307_v20, 5  ;;  %v754_v22 = vmul.f32 %v752_v10, %v3344_v55  ;;  %v3674_v23 = vsel %vm292_vm1, %v412_v21, %v3244_v28  ;;  %v1346_v4 = vmul.f32 %v1344_v14, %v3344_v55 }
 0x1f5   : > { %v3630_v8 = vpop.permute.xlu2 %847  ;;  %v707_v6 = vadd.f32 %v702_v56, %v686_v58  ;;  %v1347_v56 = vmul.f32 %v1344_v14, %v3370_v11  ;;  %v3682_v12 = vsel %vm292_vm1, %v430_v2, %v3332_v47  ;;  %v708_v25 = vadd.f32 %v3551_v16, %v687_v9 }
 0x1f6   : > { %v1314_v43 = vsel %vm490_vm2, %v1312_v52, %v1313_v5  ;;  %v1315_v28 = vrot.slane %v1308_v38, 5  ;;  %v755_v47 = vmul.f32 %v752_v10, %v3370_v11  ;;  %v469_v18 = vsel %vm292_vm1, %v468_v13, %v3340_v51 }
 0x1f7   : > { %v1354_v33 = vrot.slane %v1347_v56, 6  ;;  %v761_v20 = vrot.slane %v754_v22, 2  ;;  %v1352_v16 = vrot.slane %v1346_v4, 6  ;;  %v1365_v62 = vstv %s3656_s8  ;;  %s3740_s8 = sld [smem:[#allocation3 + $0x30]] }
 0x1f8   : > { %v1316_v3 = vsel %vm490_vm2, %v1313_v5, %v1315_v28  ;;  %v1366_v2 = vmul.f32 %v1365_v62, %v3352_v60  ;;  %v1386_v52 = vstv %s3661_s21  ;;  %v763_v21 = vrot.slane %v755_v47, 2  ;;  %s2784_s21 = sld [smem:[#allocation3 + $0x1c]] }
 0x1f9   : > { %v762_v51 = vsel %vm759_vm6, %v760_v32, %v761_v20  ;;  %v3712_v10 = vmul.f32 %v1365_v62, %v3344_v55  ;;  %v463_v5 = vsel %vm292_vm1, %v462_v39, %v3348_v57  ;;  %v473_v38 = vperm.slane %v469_v18, %v3280_v46 }
 0x1fa   : > { %1256 = vrot.lane.b32.xlu0 %v1253_v54, %s3074_s5  ;;  %1235 = vrot.lane.b32.xlu1 %v1232_v27, %s3073_s28  ;;  %v728_v54 = vadd.f32 %v723_v59, %v707_v6  ;;  %v424_v59 = vrot.slane %v3328_v44, 4  ;;  %v457_v57 = vsel %vm292_vm1, %v456_v17, %v3338_v50  ;;  %v764_v13 = vsel %vm759_vm6, %v761_v20, %v763_v21 }
 0x1fb   : > { %1277 = vrot.lane.b32.xlu2 %v1274_v29, %s3075_s22  ;;  %v1294_v29 = vrot.slane %v1287_v53, 5  ;;  %v480_v4 = vrot.slane %v473_v38, 4  ;;  %v1389_v50 = vmul.f32 %v1386_v52, %v3370_v11  ;;  %v1407_v39 = vstv %s3700_s23  ;;  %s2798_s23 = sld [smem:[#allocation3 + $0x2a]] }
 0x1fc   : > { %v725_v35 = vpop.permute.xlu1 %724  ;;  %v3645_v30 = vpop.permute.xlu0 %745  ;;  %v749_v58 = vadd.f32 %v3571_v61, %v728_v54  ;;  %v1355_v61 = vsel %vm1333_vm8, %v1352_v16, %v1354_v33  ;;  %v425_v15 = vsel %vm292_vm1, %v424_v59, %v3320_v40  ;;  %v423_v40 = vperm.slane %v3678_v26, %v3280_v46 }
 0x1fd   : > { %v3649_v1 = vpop.permute.xlu2 %887  ;;  %v729_v44 = vadd.f32 %v725_v35, %v708_v25  ;;  %v1295_v49 = vsel %vm490_vm2, %v1292_v37, %v1294_v29  ;;  %v1387_v35 = vmul.f32 %v1386_v52, %v3352_v60  ;;  %v429_v56 = vperm.slane %v425_v15, %v3280_v46 }
 0x1fe   : > { %v767_v6 = vadd.f32 %v762_v51, %v749_v58  ;;  %v450_v54 = vrot.slane %v3334_v48, 4  ;;  %v467_v26 = vperm.slane %v463_v5, %v3280_v46  ;;  %v1368_v29 = vmul.f32 %v1365_v62, %v3370_v11 }
 0x1ff   : > { %v750_v37 = vadd.f32 %v3645_v30, %v729_v44  ;;  %v435_v30 = vperm.slane %v3682_v12, %v3280_v46  ;;  %v1393_v22 = vrot.slane %v1387_v35, 6  ;;  %v461_v32 = vperm.slane %v457_v57, %v3280_v46 }
 0x200   : > { %v1410_v33 = vmul.f32 %v1407_v39, %v3370_v11  ;;  %v417_v20 = vperm.slane %v3674_v23, %v3280_v46  ;;  %v481_v58 = vsel %vm292_vm1, %v480_v4, %v467_v26  ;;  %v1396_v62 = vrot.slane %v1389_v50, 6 }
 0x201   : > { %v768_v12 = vadd.f32 %v764_v13, %v750_v37  ;;  %v442_v48 = vrot.slane %v435_v30, 4  ;;  %v474_v23 = vrot.slane %v461_v32, 4  ;;  %v896_v15 = vstv %s3728_s27  ;;  %s3826_s27 = sld [smem:[#allocation3 + $0x32]] }
 0x202   : > { %1296 = vrot.lane.b32.xlu0 %v1293_v7, %s3076_s6  ;;  %1275 = vrot.lane.b32.xlu1 %v1272_v42, %s3075_s22  ;;  %v1351_v7 = vrot.slane %v1345_v36, 6  ;;  %v1388_v42 = vmul.f32 %v1386_v52, %v3344_v55  ;;  %v1409_v36 = vmul.f32 %v1407_v39, %v3344_v55  ;;  %v1417_v21 = vrot.slane %v1410_v33, 6 }
 0x203   : > { %1317 = vrot.lane.b32.xlu2 %v1314_v43, %s3077_s24  ;;  %v1372_v43 = vrot.slane %v1366_v2, 6  ;;  %v789_v18 = vadd.f32 %v3592_v31, %v768_v12  ;;  %v1375_v31 = vrot.slane %v1368_v29, 6  ;;  %v443_v52 = vsel %vm292_vm1, %v442_v48, %v429_v56 }
 0x204   : > { %v783_v45 = vpop.permute.xlu1 %782  ;;  %v804_v27 = vpop.permute.xlu0 %803  ;;  %v1353_v59 = vsel %vm1333_vm8, %v1351_v7, %v1352_v16  ;;  %v1394_v25 = vrot.slane %v1388_v42, 6  ;;  %v897_v37 = vmul.f32 %v896_v15, %v3352_v60  ;;  %v1408_v5 = vmul.f32 %v1407_v39, %v3352_v60 }
 0x205   : > { %v3687_v24 = vpop.permute.xlu2 %928  ;;  %v788_v14 = vadd.f32 %v783_v45, %v767_v6  ;;  %v1373_v45 = vrot.slane %v3712_v10, 6  ;;  %v1428_v6 = vstv %s3733_s7  ;;  %v1415_v10 = vrot.slane %v1409_v36, 6  ;;  %s2807_s7 = sld [smem:[#allocation3 + $0x33]] }
 0x206   : > { %v1395_v47 = vsel %vm1333_vm8, %v1393_v22, %v1394_v25  ;;  %v1429_v7 = vmul.f32 %v1428_v6, %v3352_v60  ;;  %v1449_v42 = vstv %s3740_s8  ;;  %v1430_v30 = vmul.f32 %v1428_v6, %v3344_v55  ;;  %s2808_s8 = sld [smem:[#allocation3 + $0x34]] }
 0x207   : > { %v809_v17 = vadd.f32 %v804_v27, %v788_v14  ;;  %v1374_v28 = vsel %vm1333_vm8, %v1372_v43, %v1373_v45  ;;  %v451_v27 = vsel %vm292_vm1, %v450_v54, %v3264_v34  ;;  %v1450_v14 = vmul.f32 %v1449_v42, %v3352_v60 }
 0x208   : > { %v455_v51 = vperm.slane %v451_v27, %v3280_v46  ;;  %v447_v56 = vperm.slane %v443_v52, %v3291_v63  ;;  %v898_v22 = vmul.f32 %v896_v15, %v3344_v55  ;;  %v1451_v12 = vmul.f32 %v1449_v42, %v3344_v55 }
 0x209   : > { %v904_v4 = vrot.slane %v897_v37, 3  ;;  %v1414_v50 = vrot.slane %v1408_v5, 6  ;;  %v1456_v29 = vrot.slane %v1450_v14, 6 }
 0x20a   : > { %1319 = vrot.lane.b32.xlu0 %v1316_v3, %s3077_s24  ;;  %1298 = vrot.lane.b32.xlu1 %v1295_v49, %s3076_s6  ;;  %v436_v3 = vrot.slane %v423_v40, 4  ;;  %v830_v49 = vadd.f32 %v3612_v19, %v809_v17  ;;  %v1397_v19 = vsel %vm1333_vm8, %v1394_v25, %v1396_v62  ;;  %v1418_v40 = vsel %vm1333_vm8, %v1415_v10, %v1417_v21 }
 0x20b   : > { %1358 = vrot.lane.b32.xlu2 %v1355_v61, %s3072_s26  ;;  %v485_v61 = vperm.slane %v481_v58, %v3291_v63  ;;  %v475_v57 = vsel %vm292_vm1, %v474_v23, %v455_v51  ;;  %v1435_v25 = vrot.slane %v1429_v7, 6  ;;  %v899_v17 = vmul.f32 %v896_v15, %v3370_v11 }
 0x20c   : > { %v806_v53 = vpop.permute.xlu1 %805  ;;  %v827_v9 = vpop.permute.xlu0 %826  ;;  %v479_v33 = vperm.slane %v475_v57, %v3291_v63  ;;  %v905_v27 = vrot.slane %v898_v22, 3  ;;  %v1452_v58 = vmul.f32 %v1449_v42, %v3370_v11 }
 0x20d   : > { %v3722_v41 = vpop.permute.xlu2 %968  ;;  %v810_v34 = vadd.f32 %v806_v53, %v789_v18  ;;  %v1376_v53 = vsel %vm1333_vm8, %v1373_v45, %v1375_v31  ;;  %v486_v13 = vrot.slane %v485_v61, 4  ;;  %v1457_v18 = vrot.slane %v1451_v12, 6 }
 0x20e   : > { %v907_v62 = vrot.slane %v899_v17, 3  ;;  %v1459_v21 = vrot.slane %v1452_v58, 6 }
 0x20f   : > { %v831_v38 = vadd.f32 %v827_v9, %v810_v34  ;;  %v437_v9 = vsel %vm292_vm1, %v436_v3, %v417_v20  ;;  %v1416_v20 = vsel %vm1333_vm8, %v1414_v50, %v1415_v10  ;;  %v487_v34 = vsel %vm292_vm1, %v486_v13, %v479_v33 }
 0x210   : > { %v441_v39 = vperm.slane %v437_v9, %v3291_v63  ;;  %v1460_v5 = vsel %vm1333_vm8, %v1457_v18, %v1459_v21 }
 0x211   : > { %v852_v45 = vadd.f32 %v3630_v8, %v831_v38 }
 0x212   : > { %1377 = vrot.lane.b32.xlu0 %v1374_v28, %s3073_s28  ;;  %1356 = vrot.lane.b32.xlu1 %v1353_v59, %s3072_s26  ;;  %v1436_v28 = vrot.slane %v1430_v30, 6 }
 0x213   : > { %1398 = vrot.lane.b32.xlu2 %v1395_v47, %s3074_s5  ;;  %v448_v47 = vrot.slane %v447_v56, 4 }
 0x214   : > { %v846_v44 = vpop.permute.xlu1 %845  ;;  %v867_v16 = vpop.permute.xlu0 %866  ;;  %v1437_v8 = vsel %vm1333_vm8, %v1435_v25, %v1436_v28 }
 0x215   : > { %v3756_v2 = vpop.permute.xlu2 %991  ;;  %v851_v35 = vadd.f32 %v846_v44, %v830_v49  ;;  %v1431_v44 = vmul.f32 %v1428_v6, %v3370_v11  ;;  %v449_v49 = vsel %vm292_vm1, %v448_v47, %v441_v39  ;;  %v1472_v6 = vrot.slane %v487_v34, 5 }
 0x216   : > { %v1471_v15 = vrot.slane %v449_v49, 5 }
 0x217   : > { %v872_v43 = vadd.f32 %v867_v16, %v851_v35  ;;  %v906_v16 = vsel %vm903_vm7, %v904_v4, %v905_v27  ;;  %v1438_v61 = vrot.slane %v1431_v44, 6  ;;  %v908_v35 = vsel %vm903_vm7, %v905_v27, %v907_v62 }
 0x218   : > { %v1477_v9 = vsel %vm490_vm2, %v1472_v6, 0.0  ;;  %v1476_v56 = vsel %vm490_vm2, 0.0, %v1471_v15 }
 0x219   : > { %v893_v48 = vadd.f32 %v3649_v1, %v872_v43  ;;  %v1458_v1 = vsel %vm1333_vm8, %v1456_v29, %v1457_v18  ;;  %v1439_v38 = vsel %vm1333_vm8, %v1436_v28, %v1438_v61 }
 0x21a   : > { %1400 = vrot.lane.b32.xlu0 %v1397_v19, %s3074_s5  ;;  %1379 = vrot.lane.b32.xlu1 %v1376_v53, %s3073_s28  ;;  %v1473_v53 = vsel %vm490_vm2, %v1471_v15, %v1472_v6 }
 0x21b   : > { %1421 = vrot.lane.b32.xlu2 %v1418_v40, %s3075_s22  ;;  %v911_v36 = vadd.f32 %v906_v16, %v893_v48 }
 0x21c   : > { %v869_v54 = vpop.permute.xlu1 %868  ;;  %v890_v26 = vpop.permute.xlu0 %889 }
 0x21d   : > { %v3781_v59 = vpop.permute.xlu2 %1031  ;;  %v873_v32 = vadd.f32 %v869_v54, %v852_v45  ;;  %v1040_v54 = vstv %s2784_s21  ;;  %s2809_s21 = sld [smem:[#allocation3 + $0x35]] }
 0x21e   : > { %v1043_v12 = vmul.f32 %v1040_v54, %v3370_v11  ;;  %v1042_v4 = vmul.f32 %v1040_v54, %v3344_v55 }
 0x21f   : > { %v894_v3 = vadd.f32 %v890_v26, %v873_v32 }
 0x220   : > { %v1050_v50 = vrot.slane %v1043_v12, 4  ;;  %v1048_v48 = vrot.slane %v1042_v4, 4 }
 0x221   : > { %v912_v37 = vadd.f32 %v908_v35, %v894_v3 }
 0x222   : > { %1440 = vrot.lane.b32.xlu0 %v1437_v8, %s3076_s6  ;;  %1419 = vrot.lane.b32.xlu1 %v1416_v20, %s3075_s22  ;;  %v1051_v47 = vsel %vm211_vm0, %v1048_v48, %v1050_v50 }
 0x223   : > { %1461 = vrot.lane.b32.xlu2 %v1458_v1, %s3077_s24  ;;  %v933_v7 = vadd.f32 %v3687_v24, %v912_v37 }
 0x224   : > { %v927_v31 = vpop.permute.xlu1 %926  ;;  %v948_v52 = vpop.permute.xlu0 %947 }
 0x225   : > { %v932_v23 = vadd.f32 %v927_v31, %v911_v36  ;;  %v1072_v51 = vpop.permute.xlu2 %1071 }
 0x227   : > { %v953_v19 = vadd.f32 %v948_v52, %v932_v23 }
 0x229   : > { %v974_v10 = vadd.f32 %v3722_v41, %v953_v19 }
 0x22a   : > { %1463 = vrot.lane.b32.xlu0 %v1460_v5, %s3077_s24  ;;  %1442 = vrot.lane.b32.xlu1 %v1439_v38, %s3076_s6 }
 0x22b   : > { %1482 = vrot.lane.b32.xlu2 %v1473_v53, %s3071_s18 }
 0x22c   : > { %v950_v42 = vpop.permute.xlu1 %949  ;;  %v971_v40 = vpop.permute.xlu0 %970 }
 0x22d   : > { %v954_v30 = vadd.f32 %v950_v42, %v933_v7  ;;  %v1112_v14 = vpop.permute.xlu2 %1111 }
 0x22f   : > { %v975_v43 = vadd.f32 %v971_v40, %v954_v30 }
 0x231   : > { %v996_v41 = vadd.f32 %v3756_v2, %v975_v43  ;;  %v1041_v2 = vmul.f32 %v1040_v54, %v3352_v60 }
 0x232   : > { %1484 = vrot.lane.b32.xlu0 %v1477_v9, %s3071_s18  ;;  %1480 = vrot.lane.b32.xlu1 %v1476_v56, %s3071_s18  ;;  %s2791_s18 = sld [smem:[#allocation3 + $0x23]] }
 0x233   : > { %v1047_v39 = vrot.slane %v1041_v2, 4 }
 0x234   : > { %v990_v57 = vpop.permute.xlu1 %989  ;;  %v1011_v24 = vpop.permute.xlu0 %1010 }
 0x235   : > { %v995_v13 = vadd.f32 %v990_v57, %v974_v10  ;;  %v1135_v22 = vpop.permute.xlu2 %1134  ;;  %v1049_v27 = vsel %vm211_vm0, %v1047_v39, %v1048_v48  ;;  %v1326_v48 = vstv %s2798_s23  ;;  %s2811_s23 = sld [smem:[#allocation3 + $0x37]] }
 0x237   : > { %v1016_v26 = vadd.f32 %v1011_v24, %v995_v13 }
 0x238   : > { %v1183_v35 = vstv %s2791_s18  ;;  %s2810_s18 = sld [smem:[#allocation3 + $0x36]] }
 0x239   : > { %v1037_v45 = vadd.f32 %v3781_v59, %v1016_v26  ;;  %v1184_v37 = vmul.f32 %v1183_v35, %v3352_v60  ;;  %v1185_v19 = vmul.f32 %v1183_v35, %v3344_v55 }
 0x23b   : > { %v1054_v18 = vadd.f32 %v1049_v27, %v1037_v45  ;;  %v1190_v42 = vrot.slane %v1184_v37, 5  ;;  %v1191_v40 = vrot.slane %v1185_v19, 5  ;;  %v1327_v27 = vmul.f32 %v1326_v48, %v3352_v60 }
 0x23c   : > { %v1013_v25 = vpop.permute.xlu1 %1012  ;;  %v1034_v17 = vpop.permute.xlu0 %1033 }
 0x23d   : > { %v1017_v28 = vadd.f32 %v1013_v25, %v996_v41  ;;  %v1175_v29 = vpop.permute.xlu2 %1174  ;;  %v1192_v41 = vsel %vm490_vm2, %v1190_v42, %v1191_v40 }
 0x23f   : > { %v1038_v32 = vadd.f32 %v1034_v17, %v1017_v28 }
 0x241   : > { %v1055_v33 = vadd.f32 %v1051_v47, %v1038_v32  ;;  %v1329_v47 = vmul.f32 %v1326_v48, %v3370_v11 }
 0x243   : > { %v1076_v8 = vadd.f32 %v1072_v51, %v1055_v33  ;;  %v1186_v51 = vmul.f32 %v1183_v35, %v3370_v11 }
 0x244   : > { %v1070_v59 = vpop.permute.xlu1 %1069  ;;  %v1091_v20 = vpop.permute.xlu0 %1090 }
 0x245   : > { %v1075_v58 = vadd.f32 %v1070_v59, %v1054_v18  ;;  %v1215_v44 = vpop.permute.xlu2 %1214  ;;  %v1193_v5 = vrot.slane %v1186_v51, 5  ;;  %v1328_v18 = vmul.f32 %v1326_v48, %v3344_v55  ;;  %v1337_v59 = vrot.slane %v1329_v47, 6 }
 0x246   : > { %v1572_v48 = vstv %s2811_s23  ;;  %s2818_s23 = sld [smem:[#allocation3 + $0x3e]] }
 0x247   : > { %v1096_v16 = vadd.f32 %v1091_v20, %v1075_v58 }
 0x249   : > { %v1117_v62 = vadd.f32 %v1112_v14, %v1096_v16  ;;  %v1194_v14 = vsel %vm490_vm2, %v1191_v40, %v1193_v5  ;;  %v1334_v16 = vrot.slane %v1327_v27, 6 }
 0x24c   : > { %v1093_v1 = vpop.permute.xlu1 %1092  ;;  %v1114_v36 = vpop.permute.xlu0 %1113 }
 0x24d   : > { %v1097_v3 = vadd.f32 %v1093_v1, %v1076_v8  ;;  %v1255_v49 = vpop.permute.xlu2 %1254 }
 0x24f   : > { %v1118_v34 = vadd.f32 %v1114_v36, %v1097_v3 }
 0x251   : > { %v1139_v31 = vadd.f32 %v1135_v22, %v1118_v34 }
 0x254   : > { %v1133_v52 = vpop.permute.xlu1 %1132  ;;  %v1154_v23 = vpop.permute.xlu0 %1153 }
 0x255   : > { %v1138_v21 = vadd.f32 %v1133_v52, %v1117_v62  ;;  %v1278_v61 = vpop.permute.xlu2 %1277  ;;  %v1335_v62 = vrot.slane %v1328_v18, 6 }
 0x257   : > { %v1159_v15 = vadd.f32 %v1154_v23, %v1138_v21  ;;  %v1338_v36 = vsel %vm1333_vm8, %v1335_v62, %v1337_v59  ;;  %v1336_v11 = vsel %vm1333_vm8, %v1334_v16, %v1335_v62  ;;  %v1502_v23 = vstv %s3826_s27  ;;  %s2813_s27 = sld [smem:[#allocation3 + $0x39]] }
 0x259   : > { %v1180_v6 = vadd.f32 %v1175_v29, %v1159_v15 }
 0x25b   : > { %v1197_v9 = vadd.f32 %v1192_v41, %v1180_v6 }
 0x25c   : > { %v1156_v10 = vpop.permute.xlu1 %1155  ;;  %v1177_v38 = vpop.permute.xlu0 %1176 }
 0x25d   : > { %v1160_v53 = vadd.f32 %v1156_v10, %v1139_v31  ;;  %v1318_v7 = vpop.permute.xlu2 %1317  ;;  %v1603_v47 = vstv %s2813_s27  ;;  %s2820_s27 = sld [smem:[#allocation3 + $0x40]] }
 0x25f   : > { %v1181_v30 = vadd.f32 %v1177_v38, %v1160_v53 }
 0x261   : > { %v1198_v43 = vadd.f32 %v1194_v14, %v1181_v30 }
 0x263   : > { %v1219_v56 = vadd.f32 %v1215_v44, %v1198_v43 }
 0x264   : > { %v1213_v57 = vpop.permute.xlu1 %1212  ;;  %v1234_v24 = vpop.permute.xlu0 %1233 }
 0x265   : > { %v1218_v13 = vadd.f32 %v1213_v57, %v1197_v9  ;;  %v1359_v22 = vpop.permute.xlu2 %1358 }
 0x267   : > { %v1239_v54 = vadd.f32 %v1234_v24, %v1218_v13  ;;  %v1516_v24 = vstv %s2807_s7  ;;  %v1530_v13 = vstv %s2808_s8  ;;  %s2814_s7 = sld [smem:[#allocation3 + $0x3a]] }
 0x268   : > { %s2815_s8 = sld [smem:[#allocation3 + $0x3b]] }
 0x269   : > { %v1260_v26 = vadd.f32 %v1255_v49, %v1239_v54 }
 0x26c   : > { %v1236_v12 = vpop.permute.xlu1 %1235  ;;  %v1257_v45 = vpop.permute.xlu0 %1256 }
 0x26d   : > { %v1240_v2 = vadd.f32 %v1236_v12, %v1219_v56  ;;  %v1399_v4 = vpop.permute.xlu2 %1398  ;;  %v1544_v12 = vstv %s2809_s21  ;;  %s2816_s21 = sld [smem:[#allocation3 + $0x3c]] }
 0x26e   : > { %v1645_v62 = vstv %s2815_s8  ;;  %s2821_s8 = sld [smem:[#allocation3 + $0x41]] }
 0x26f   : > { %v1261_v25 = vadd.f32 %v1257_v45, %v1240_v2 }
 0x271   : > { %v1282_v50 = vadd.f32 %v1278_v61, %v1261_v25 }
 0x274   : > { %v1276_v17 = vpop.permute.xlu1 %1275  ;;  %v1297_v28 = vpop.permute.xlu0 %1296 }
 0x275   : > { %v1281_v29 = vadd.f32 %v1276_v17, %v1260_v26  ;;  %v1422_v39 = vpop.permute.xlu2 %1421 }
 0x277   : > { %v1302_v32 = vadd.f32 %v1297_v28, %v1281_v29  ;;  %v1558_v28 = vstv %s2810_s18  ;;  %s2817_s18 = sld [smem:[#allocation3 + $0x3d]] }
 0x279   : > { %v1323_v33 = vadd.f32 %v1318_v7, %v1302_v32 }
 0x27b   : > { %v1341_v49 = vadd.f32 %v1336_v11, %v1323_v33 }
 0x27c   : > { %v1299_v8 = vpop.permute.xlu1 %1298  ;;  %v1320_v20 = vpop.permute.xlu0 %1319 }
 0x27d   : > { %v1303_v58 = vadd.f32 %v1299_v8, %v1282_v50  ;;  %v1462_v44 = vpop.permute.xlu2 %1461 }
 0x27f   : > { %v1324_v1 = vadd.f32 %v1320_v20, %v1303_v58  ;;  %v1624_v58 = vstv %s2814_s7  ;;  %s3901_s7 = sld [smem:[#allocation3 + $0x31]] }
 0x281   : > { %v1342_v3 = vadd.f32 %v1338_v36, %v1324_v1 }
 0x283   : > { %v1363_v60 = vadd.f32 %v1359_v22, %v1342_v3 }
 0x284   : > { %v1357_v34 = vpop.permute.xlu1 %1356  ;;  %v1378_v55 = vpop.permute.xlu0 %1377 }
 0x285   : > { %v1362_v31 = vadd.f32 %v1357_v34, %v1341_v49  ;;  %v1483_v52 = vpop.permute.xlu2 %1482 }
 0x286   : > { %v1490_v21 = vsel %vm509_vm3, 0.0, %v1483_v52 }
 0x287   : > { %v3833_v61 = vsel %vm513_vm4, %v1490_v21, 0.0  ;;  %v1383_v35 = vadd.f32 %v1378_v55, %v1362_v31 }
 0x288   : > { %v1504_v15 = vmul.f32 %v1502_v23, %v3833_v61  ;;  %v1532_v45 = vmul.f32 %v1530_v13, %v3833_v61  ;;  %v1518_v2 = vmul.f32 %v1516_v24, %v3833_v61  ;;  %v1546_v25 = vmul.f32 %v1544_v12, %v3833_v61 }
 0x289   : > { %v1404_v51 = vadd.f32 %v1399_v4, %v1383_v35  ;;  %v1605_v27 = vmul.f32 %v1603_v47, %v3833_v61  ;;  %v1574_v8 = vmul.f32 %v1572_v48, %v3833_v61  ;;  %v1560_v59 = vmul.f32 %v1558_v28, %v3833_v61 }
 0x28a   : > { %1509 = vrot.lane.b32.xlu2 %v1504_v15, %s3072_s26  ;;  %v1626_v3 = vmul.f32 %v1624_v58, %v3833_v61  ;;  %v1647_v11 = vmul.f32 %v1645_v62, %v3833_v61  ;;  %v1666_v15 = vstv %s2816_s21  ;;  %s2822_s21 = sld [smem:[#allocation3 + $0x42]] }
 0x28b   : > { %v1611_v20 = vrot.slane %v1605_v27, 1  ;;  %v1496_v27 = vstv %s3901_s7  ;;  %s2837_s7 = sld [smem:[#allocation3 + $0x51]] }
 0x28c   : > { %v1380_v6 = vpop.permute.xlu1 %1379  ;;  %v1401_v37 = vpop.permute.xlu0 %1400  ;;  %v1632_v55 = vrot.slane %v1626_v3, 1  ;;  %v1653_v31 = vrot.slane %v1647_v11, 1 }
 0x28d   : > { %v1384_v19 = vadd.f32 %v1380_v6, %v1363_v60 }
 0x28f   : > { %v1405_v10 = vadd.f32 %v1401_v37, %v1384_v19  ;;  %v1668_v19 = vmul.f32 %v1666_v15, %v3833_v61 }
 0x291   : > { %v1426_v5 = vadd.f32 %v1422_v39, %v1405_v10 }
 0x294   : > { %v1420_v38 = vpop.permute.xlu1 %1419  ;;  %v1441_v53 = vpop.permute.xlu0 %1440 }
 0x295   : > { %v1425_v7 = vadd.f32 %v1420_v38, %v1404_v51 }
 0x297   : > { %v1446_v42 = vadd.f32 %v1441_v53, %v1425_v7  ;;  %v1674_v53 = vrot.slane %v1668_v19, 1  ;;  %v1687_v7 = vstv %s2817_s18  ;;  %s2823_s18 = sld [smem:[#allocation3 + $0x43]] }
 0x299   : > { %v3837_v40 = vadd.f32 %v1462_v44, %v1446_v42 }
 0x29c   : > { %v1443_v30 = vpop.permute.xlu1 %1442  ;;  %v1464_v43 = vpop.permute.xlu0 %1463 }
 0x29d   : > { %v1447_v14 = vadd.f32 %v1443_v30, %v1426_v5 }
 0x29f   : > { %v3839_v41 = vadd.f32 %v1464_v43, %v1447_v14  ;;  %v1708_v43 = vstv %s2818_s23  ;;  %s2824_s23 = sld [smem:[#allocation3 + $0x44]] }
 0x2a4   : > { %v1481_v9 = vpop.permute.xlu1 %1480  ;;  %v1485_v4 = vpop.permute.xlu0 %1484 }
 0x2a5   : > { %v1489_v56 = vsel %vm509_vm3, 0.0, %v1481_v9  ;;  %v1491_v50 = vsel %vm509_vm3, 0.0, %v1485_v4  ;;  %vm2617_vm3 = vcmask 130048  }
 0x2a6   : > { %v3843_v57 = vsel %vm513_vm4, %v1489_v56, 0.0  ;;  %v3859_v17 = vsel %vm513_vm4, %v1491_v50, 0.0  ;;  %vm2619_vm4 = vcmask 261120  }
 0x2a7   : > { %v1517_v22 = vmul.f32 %v1516_v24, %v3843_v57  ;;  %v1503_v54 = vmul.f32 %v1502_v23, %v3843_v57  ;;  %v1531_v26 = vmul.f32 %v1530_v13, %v3843_v57  ;;  %v1559_v29 = vmul.f32 %v1558_v28, %v3843_v57 }
 0x2a8   : > { %v1545_v39 = vmul.f32 %v1544_v12, %v3843_v57  ;;  %v1573_v32 = vmul.f32 %v1572_v48, %v3843_v57  ;;  %v1606_v33 = vmul.f32 %v1603_v47, %v3859_v17  ;;  %v1625_v44 = vmul.f32 %v1624_v58, %v3843_v57 }
 0x2a9   : > { %1521 = vrot.lane.b32.xlu0 %v1517_v22, %s3073_s28  ;;  %1507 = vrot.lane.b32.xlu1 %v1503_v54, %s3072_s26  ;;  %v1604_v16 = vmul.f32 %v1603_v47, %v3843_v57  ;;  %v1646_v36 = vmul.f32 %v1645_v62, %v3843_v57  ;;  %v1648_v52 = vmul.f32 %v1645_v62, %v3859_v17  ;;  %v1746_v28 = vstv %s2820_s27  ;;  %s2825_s27 = sld [smem:[#allocation3 + $0x45]] }
 0x2aa   : > { %1535 = vrot.lane.b32.xlu2 %v1531_v26, %s3074_s5  ;;  %v1613_v18 = vrot.slane %v1606_v33, 1  ;;  %v1631_v49 = vrot.slane %v1625_v44, 1  ;;  %v1627_v35 = vmul.f32 %v1624_v58, %v3859_v17  ;;  %v1669_v6 = vmul.f32 %v1666_v15, %v3859_v17 }
 0x2ab   : > { %v1610_v60 = vrot.slane %v1604_v16, 1  ;;  %v1652_v34 = vrot.slane %v1646_v36, 1  ;;  %v1655_v37 = vrot.slane %v1648_v52, 1  ;;  %v1688_v30 = vmul.f32 %v1687_v7, %v3843_v57 }
 0x2ac   : > { %v1614_v1 = vsel %vm615_vm5, %v1611_v20, %v1613_v18  ;;  %v1633_v23 = vsel %vm615_vm5, %v1631_v49, %v1632_v55  ;;  %v1634_v10 = vrot.slane %v1627_v35, 1  ;;  %v1676_v5 = vrot.slane %v1669_v6, 1 }
 0x2ad   : > { %v1612_v21 = vsel %vm615_vm5, %v1610_v60, %v1611_v20  ;;  %v1654_v51 = vsel %vm615_vm5, %v1652_v34, %v1653_v31  ;;  %v1656_v38 = vsel %vm615_vm5, %v1653_v31, %v1655_v37  ;;  %v1667_v14 = vmul.f32 %v1666_v15, %v3843_v57 }
 0x2ae   : > { %v1635_v42 = vsel %vm615_vm5, %v1632_v55, %v1634_v10  ;;  %v1677_v9 = vsel %vm615_vm5, %v1674_v53, %v1676_v5  ;;  %v1709_v56 = vmul.f32 %v1708_v43, %v3843_v57  ;;  %v1689_v24 = vmul.f32 %v1687_v7, %v3833_v61 }
 0x2af   : > { %v1710_v13 = vmul.f32 %v1708_v43, %v3833_v61  ;;  %v1694_v22 = vrot.slane %v1688_v30, 1  ;;  %v1673_v54 = vrot.slane %v1667_v14, 1  ;;  %v1690_v50 = vmul.f32 %v1687_v7, %v3859_v17 }
 0x2b0   : > { %v1715_v26 = vrot.slane %v1709_v56, 1  ;;  %v1695_v12 = vrot.slane %v1689_v24, 1  ;;  %v1747_v44 = vmul.f32 %v1746_v28, %v3843_v57  ;;  %v1788_v16 = vstv %s2822_s21  ;;  %s2828_s21 = sld [smem:[#allocation3 + $0x48]] }
 0x2b1   : > { %1537 = vrot.lane.b32.xlu0 %v1532_v45, %s3074_s5  ;;  %1523 = vrot.lane.b32.xlu1 %v1518_v2, %s3073_s28  ;;  %v1716_v45 = vrot.slane %v1710_v13, 1  ;;  %v1711_v2 = vmul.f32 %v1708_v43, %v3859_v17  ;;  %v1697_v47 = vrot.slane %v1690_v50, 1  ;;  %v1789_v36 = vmul.f32 %v1788_v16, %v3843_v57 }
 0x2b2   : > { %1551 = vrot.lane.b32.xlu2 %v1546_v25, %s3075_s22  ;;  %v1696_v4 = vsel %vm615_vm5, %v1694_v22, %v1695_v12  ;;  %v1675_v25 = vsel %vm615_vm5, %v1673_v54, %v1674_v53  ;;  %v1790_v49 = vmul.f32 %v1788_v16, %v3833_v61  ;;  %v1753_v55 = vrot.slane %v1747_v44, 2 }
 0x2b3   : > { %v1718_v48 = vrot.slane %v1711_v2, 1  ;;  %v1698_v20 = vsel %vm615_vm5, %v1695_v12, %v1697_v47  ;;  %v1795_v52 = vrot.slane %v1789_v36, 2  ;;  %v1791_v35 = vmul.f32 %v1788_v16, %v3859_v17 }
 0x2b4   : > { %v1830_v30 = vstv %s2824_s23  ;;  %v1851_v56 = vstv %s2825_s27  ;;  %s2830_s23 = sld [smem:[#allocation3 + $0x4a]] }
 0x2b5   : > { %v1719_v18 = vsel %vm615_vm5, %v1716_v45, %v1718_v48  ;;  %v1798_v10 = vrot.slane %v1791_v35, 2  ;;  %v1831_v43 = vmul.f32 %v1830_v30, %v3843_v57  ;;  %v1852_v13 = vmul.f32 %v1851_v56, %v3843_v57  ;;  %s2831_s27 = sld [smem:[#allocation3 + $0x4b]] }
 0x2b6   : > { %v1832_v22 = vmul.f32 %v1830_v30, %v3833_v61  ;;  %v1853_v54 = vmul.f32 %v1851_v56, %v3833_v61 }
 0x2b8   : > { %v1838_v2 = vrot.slane %v1832_v22, 2 }
 0x2b9   : > { %1563 = vrot.lane.b32.xlu0 %v1559_v29, %s3076_s6  ;;  %1549 = vrot.lane.b32.xlu1 %v1545_v39, %s3075_s22  ;;  %v1717_v29 = vsel %vm615_vm5, %v1715_v26, %v1716_v45  ;;  %v1749_v39 = vmul.f32 %v1746_v28, %v3859_v17  ;;  %v1837_v26 = vrot.slane %v1831_v43, 2  ;;  %v1858_v45 = vrot.slane %v1852_v13, 2 }
 0x2ba   : > { %1577 = vrot.lane.b32.xlu2 %v1573_v32, %s3077_s24  ;;  %v1748_v32 = vmul.f32 %v1746_v28, %v3833_v61  ;;  %v1952_v35 = vstv %s2830_s23  ;;  %s2836_s23 = sld [smem:[#allocation3 + $0x50]] }
 0x2bb   : > { %v1756_v33 = vrot.slane %v1749_v39, 2  ;;  %v1839_v50 = vsel %vm759_vm6, %v1837_v26, %v1838_v2  ;;  %v1833_v39 = vmul.f32 %v1830_v30, %v3859_v17  ;;  %v1973_v30 = vstv %s2831_s27  ;;  %s2812_s27 = sld [smem:[#allocation3 + $0x38]] }
 0x2c1   : > { %1579 = vrot.lane.b32.xlu0 %v1574_v8, %s3077_s24  ;;  %1565 = vrot.lane.b32.xlu1 %v1560_v59, %s3076_s6  ;;  %v1754_v8 = vrot.slane %v1748_v32, 2  ;;  %v1767_v59 = vstv %s2821_s8  ;;  %s2827_s8 = sld [smem:[#allocation3 + $0x47]] }
 0x2c2   : > { %1617 = vrot.lane.b32.xlu2 %v1614_v1, %s3072_s26  ;;  %v1768_v58 = vmul.f32 %v1767_v59, %v3843_v57  ;;  %v1498_v1 = vmul.f32 %v1496_v27, %v3833_v61  ;;  %v1769_v3 = vmul.f32 %v1767_v59, %v3833_v61  ;;  %v1770_v6 = vmul.f32 %v1767_v59, %v3859_v17 }
 0x2c3   : > { %v1757_v62 = vsel %vm759_vm6, %v1754_v8, %v1756_v33 }
 0x2c4   : > { %v1500_v11 = vadd.f32 %v1498_v1, %v3839_v41  ;;  %v1774_v34 = vrot.slane %v1768_v58, 2  ;;  %v1809_v41 = vstv %s2823_s18  ;;  %s2829_s18 = sld [smem:[#allocation3 + $0x49]] }
 0x2c5   : > { %v1812_v19 = vmul.f32 %v1809_v41, %v3859_v17  ;;  %v1811_v5 = vmul.f32 %v1809_v41, %v3833_v61 }
 0x2c7   : > { %v1819_v53 = vrot.slane %v1812_v19, 2  ;;  %v1953_v19 = vmul.f32 %v1952_v35, %v3843_v57 }
 0x2c9   : > { %1636 = vrot.lane.b32.xlu0 %v1633_v23, %s3073_s28  ;;  %1615 = vrot.lane.b32.xlu1 %v1612_v21, %s3072_s26  ;;  %v1775_v23 = vrot.slane %v1769_v3, 2  ;;  %v1796_v21 = vrot.slane %v1790_v49, 2 }
 0x2ca   : > { %1657 = vrot.lane.b32.xlu2 %v1654_v51, %s3074_s5  ;;  %v1755_v51 = vsel %vm759_vm6, %v1753_v55, %v1754_v8  ;;  %v1931_v58 = vstv %s2829_s18  ;;  %s2835_s18 = sld [smem:[#allocation3 + $0x4f]] }
 0x2cb   : > { %v1776_v15 = vsel %vm759_vm6, %v1774_v34, %v1775_v23  ;;  %v1797_v37 = vsel %vm759_vm6, %v1795_v52, %v1796_v21  ;;  %v1799_v7 = vsel %vm759_vm6, %v1796_v21, %v1798_v10  ;;  %v1934_v3 = vmul.f32 %v1931_v58, %v3859_v17 }
 0x2cc   : > { %v1933_v49 = vmul.f32 %v1931_v58, %v3833_v61  ;;  %v1954_v10 = vmul.f32 %v1952_v35, %v3833_v61 }
 0x2cd   : > { %v1941_v52 = vrot.slane %v1934_v3, 3 }
 0x2ce   : > { %v1939_v21 = vrot.slane %v1933_v49, 3 }
 0x2d0   : > { %v2053_v3 = vstv %s2835_s18  ;;  %s2841_s18 = sld [smem:[#allocation3 + $0x55]] }
 0x2d1   : > { %1659 = vrot.lane.b32.xlu0 %v1656_v38, %s3074_s5  ;;  %1638 = vrot.lane.b32.xlu1 %v1635_v42, %s3073_s28  ;;  %v1777_v38 = vrot.slane %v1770_v6, 2  ;;  %v1817_v42 = vrot.slane %v1811_v5, 2  ;;  %v1932_v6 = vmul.f32 %v1931_v58, %v3843_v57  ;;  %v2056_v49 = vmul.f32 %v2053_v3, %v3859_v17 }
 0x2d2   : > { %1680 = vrot.lane.b32.xlu2 %v1677_v9, %s3075_s22  ;;  %v1810_v9 = vmul.f32 %v1809_v41, %v3843_v57 }
 0x2d3   : > { %v1778_v14 = vsel %vm759_vm6, %v1775_v23, %v1777_v38  ;;  %v1820_v24 = vsel %vm759_vm6, %v1817_v42, %v1819_v53  ;;  %v1938_v38 = vrot.slane %v1932_v6, 3 }
 0x2d4   : > { %v1816_v12 = vrot.slane %v1810_v9, 2 }
 0x2d5   : > { %v1940_v43 = vsel %vm903_vm7, %v1938_v38, %v1939_v21 }
 0x2d6   : > { %v1818_v28 = vsel %vm759_vm6, %v1816_v12, %v1817_v42  ;;  %v1960_v42 = vrot.slane %v1954_v10, 3 }
 0x2d9   : > { %1699 = vrot.lane.b32.xlu0 %v1696_v4, %s3076_s6  ;;  %1678 = vrot.lane.b32.xlu1 %v1675_v25, %s3075_s22  ;;  %v1859_v4 = vrot.slane %v1853_v54, 2  ;;  %v1889_v25 = vstv %s2827_s8  ;;  %s2832_s8 = sld [smem:[#allocation3 + $0x4c]]  ;;  %v1975_v54 = vmul.f32 %v1973_v30, %v3833_v61 }
 0x2da   : > { %1720 = vrot.lane.b32.xlu2 %v1717_v29, %s3077_s24  ;;  %v1854_v29 = vmul.f32 %v1851_v56, %v3859_v17  ;;  %v1892_v32 = vmul.f32 %v1889_v25, %v3859_v17  ;;  %v1891_v47 = vmul.f32 %v1889_v25, %v3833_v61  ;;  %v1890_v1 = vmul.f32 %v1889_v25, %v3843_v57 }
 0x2db   : > { %v1860_v48 = vsel %vm759_vm6, %v1858_v45, %v1859_v4  ;;  %v1976_v56 = vmul.f32 %v1973_v30, %v3859_v17  ;;  %v1981_v25 = vrot.slane %v1975_v54, 3 }
 0x2dc   : > { %v1861_v33 = vrot.slane %v1854_v29, 2  ;;  %v1899_v8 = vrot.slane %v1892_v32, 3  ;;  %v1897_v59 = vrot.slane %v1891_v47, 3  ;;  %v1896_v55 = vrot.slane %v1890_v1, 3 }
 0x2dd   : > { %v1983_v45 = vrot.slane %v1976_v56, 3  ;;  %v1974_v47 = vmul.f32 %v1973_v30, %v3843_v57 }
 0x2de   : > { %v1862_v44 = vsel %vm759_vm6, %v1859_v4, %v1861_v33  ;;  %v1900_v36 = vsel %vm903_vm7, %v1897_v59, %v1899_v8 }
 0x2e1   : > { %1722 = vrot.lane.b32.xlu0 %v1719_v18, %s3077_s24  ;;  %1701 = vrot.lane.b32.xlu1 %v1698_v20, %s3076_s6  ;;  %v1840_v18 = vrot.slane %v1833_v39, 2  ;;  %v1910_v20 = vstv %s2828_s21  ;;  %s2834_s21 = sld [smem:[#allocation3 + $0x4e]]  ;;  %v1984_v39 = vsel %vm903_vm7, %v1981_v25, %v1983_v45 }
 0x2e2   : > { %1760 = vrot.lane.b32.xlu2 %v1757_v62, %s3072_s26  ;;  %v1913_v62 = vmul.f32 %v1910_v20, %v3859_v17  ;;  %v1911_v41 = vmul.f32 %v1910_v20, %v3843_v57 }
 0x2e3   : > { %v1841_v16 = vsel %vm759_vm6, %v1838_v2, %v1840_v18 }
 0x2e4   : > { %v1510_v60 = vpop.permute.xlu2 %1509  ;;  %v1920_v34 = vrot.slane %v1913_v62, 3  ;;  %v1917_v53 = vrot.slane %v1911_v41, 3  ;;  %v1980_v62 = vrot.slane %v1974_v47, 3 }
 0x2e5   : > { %v3929_v31 = vadd.f32 %v1510_v60, %v1500_v11  ;;  %v1912_v11 = vmul.f32 %v1910_v20, %v3833_v61 }
 0x2e7   : > { %v1918_v23 = vrot.slane %v1912_v11, 3  ;;  %v2032_v29 = vstv %s2834_s21  ;;  %s2839_s21 = sld [smem:[#allocation3 + $0x53]] }
 0x2e8   : > { %v2034_v20 = vmul.f32 %v2032_v29, %v3833_v61 }
 0x2e9   : > { %1779 = vrot.lane.b32.xlu0 %v1776_v15, %s3073_s28  ;;  %1758 = vrot.lane.b32.xlu1 %v1755_v51, %s3072_s26  ;;  %v1921_v15 = vsel %vm903_vm7, %v1918_v23, %v1920_v34  ;;  %v1898_v51 = vsel %vm903_vm7, %v1896_v55, %v1897_v59  ;;  %v1919_v9 = vsel %vm903_vm7, %v1917_v53, %v1918_v23  ;;  %v2074_v34 = vstv %s2836_s23  ;;  %s2842_s23 = sld [smem:[#allocation3 + $0x56]] }
 0x2ea   : > { %1800 = vrot.lane.b32.xlu2 %v1797_v37, %s3074_s5  ;;  %v1942_v37 = vsel %vm903_vm7, %v1939_v21, %v1941_v52  ;;  %v2040_v11 = vrot.slane %v2034_v20, 4  ;;  %v2035_v52 = vmul.f32 %v2032_v29, %v3859_v17  ;;  %v2076_v41 = vmul.f32 %v2074_v34, %v3833_v61 }
 0x2eb   : > { %v2075_v30 = vmul.f32 %v2074_v34, %v3843_v57 }
 0x2ec   : > { %v2042_v10 = vrot.slane %v2035_v52, 4 }
 0x2f1   : > { %1802 = vrot.lane.b32.xlu0 %v1799_v7, %s3074_s5  ;;  %1781 = vrot.lane.b32.xlu1 %v1778_v14, %s3073_s28  ;;  %v1959_v7 = vrot.slane %v1953_v19, 3  ;;  %v1994_v14 = vstv %s2832_s8  ;;  %s2838_s8 = sld [smem:[#allocation3 + $0x52]] }
 0x2f2   : > { %1823 = vrot.lane.b32.xlu2 %v1820_v24, %s3075_s22  ;;  %v1955_v24 = vmul.f32 %v1952_v35, %v3859_v17  ;;  %v1997_v22 = vmul.f32 %v1994_v14, %v3859_v17  ;;  %v1996_v26 = vmul.f32 %v1994_v14, %v3833_v61  ;;  %v1995_v32 = vmul.f32 %v1994_v14, %v3843_v57 }
 0x2f3   : > { %v1961_v13 = vsel %vm903_vm7, %v1959_v7, %v1960_v42  ;;  %v2077_v35 = vmul.f32 %v2074_v34, %v3859_v17  ;;  %v2095_v14 = vstv %s2837_s7  ;;  %s2843_s7 = sld [smem:[#allocation3 + $0x57]] }
 0x2f4   : > { %v1962_v2 = vrot.slane %v1955_v24, 3  ;;  %v2004_v4 = vrot.slane %v1997_v22, 3  ;;  %v2097_v45 = vmul.f32 %v2095_v14, %v3833_v61 }
 0x2f5   : > { %v2084_v38 = vrot.slane %v2077_v35, 4 }
 0x2f9   : > { %1842 = vrot.lane.b32.xlu0 %v1839_v50, %s3076_s6  ;;  %1821 = vrot.lane.b32.xlu1 %v1818_v28, %s3075_s22  ;;  %v1497_v50 = vmul.f32 %v1496_v27, %v3843_v57  ;;  %v2002_v28 = vrot.slane %v1996_v26, 3  ;;  %v2033_v27 = vmul.f32 %v2032_v29, %v3843_v57  ;;  %v2081_v26 = vrot.slane %v2075_v30, 4 }
 0x2fa   : > { %1863 = vrot.lane.b32.xlu2 %v1860_v48, %s3077_s24  ;;  %v1963_v48 = vsel %vm903_vm7, %v1960_v42, %v1962_v2  ;;  %v2082_v42 = vrot.slane %v2076_v41, 4  ;;  %v2116_v29 = vstv %s2838_s8  ;;  %v2175_v41 = vstv %s2841_s18  ;;  %s2819_s8 = sld [smem:[#allocation3 + $0x3f]] }
 0x2fb   : > { %v2005_v33 = vsel %vm903_vm7, %v2002_v28, %v2004_v4  ;;  %v1499_v18 = vadd.f32 %v1497_v50, %v3837_v40  ;;  %v2039_v1 = vrot.slane %v2033_v27, 4  ;;  %v1982_v40 = vsel %vm903_vm7, %v1980_v62, %v1981_v25  ;;  %s2846_s18 = sld [smem:[#allocation3 + $0x5a]] }
 0x2fc   : > { %v2085_v24 = vsel %vm211_vm0, %v2082_v42, %v2084_v38  ;;  %v2117_v38 = vmul.f32 %v2116_v29, %v3843_v57 }
 0x2fd   : > { %v2041_v21 = vsel %vm211_vm0, %v2039_v1, %v2040_v11 }
 0x301   : > { %1865 = vrot.lane.b32.xlu0 %v1862_v44, %s3077_s24  ;;  %1844 = vrot.lane.b32.xlu1 %v1841_v16, %s3076_s6  ;;  %v2001_v16 = vrot.slane %v1995_v32, 3  ;;  %v2103_v32 = vrot.slane %v2097_v45, 4  ;;  %v2196_v45 = vstv %s2842_s23  ;;  %s2848_s23 = sld [smem:[#allocation3 + $0x5c]] }
 0x302   : > { %1903 = vrot.lane.b32.xlu2 %v1900_v36, %s3072_s26 }
 0x303   : > { %v2003_v55 = vsel %vm903_vm7, %v2001_v16, %v2002_v28 }
 0x304   : > { %v3973_v60 = vpop.permute.xlu2 %1535 }
 0x309   : > { %1924 = vrot.lane.b32.xlu0 %v1921_v15, %s3073_s28  ;;  %1901 = vrot.lane.b32.xlu1 %v1898_v51, %s3072_s26  ;;  %v2055_v15 = vmul.f32 %v2053_v3, %v3833_v61 }
 0x30a   : > { %1945 = vrot.lane.b32.xlu2 %v1942_v37, %s3074_s5 }
 0x30b   : > { %v2061_v7 = vrot.slane %v2055_v15, 4 }
 0x30c   : > { %v3985_v5 = vpop.permute.xlu2 %1551 }
 0x311   : > { %1943 = vrot.lane.b32.xlu0 %v1940_v43, %s3074_s5  ;;  %1922 = vrot.lane.b32.xlu1 %v1919_v9, %s3073_s28  ;;  %v2043_v9 = vsel %vm211_vm0, %v2040_v11, %v2042_v10 }
 0x312   : > { %1964 = vrot.lane.b32.xlu2 %v1961_v13, %s3075_s22  ;;  %v2096_v13 = vmul.f32 %v2095_v14, %v3843_v57 }
 0x314   : > { %v3998_v12 = vpop.permute.xlu2 %1577  ;;  %v2102_v50 = vrot.slane %v2096_v13, 4 }
 0x316   : > { %v2104_v20 = vsel %vm211_vm0, %v2102_v50, %v2103_v32 }
 0x319   : > { %1987 = vrot.lane.b32.xlu0 %v1984_v39, %s3076_s6  ;;  %1966 = vrot.lane.b32.xlu1 %v1963_v48, %s3075_s22  ;;  %v2137_v39 = vstv %s2839_s21  ;;  %v2083_v48 = vsel %vm211_vm0, %v2081_v26, %v2082_v42  ;;  %v2176_v42 = vmul.f32 %v2175_v41, %v3843_v57  ;;  %s2845_s21 = sld [smem:[#allocation3 + $0x59]] }
 0x31a   : > { %2008 = vrot.lane.b32.xlu2 %v2005_v33, %s3077_s24 }
 0x31b   : > { %v1508_v8 = vpop.permute.xlu1 %1507  ;;  %v1522_v59 = vpop.permute.xlu0 %1521 }
 0x31c   : > { %v1513_v58 = vadd.f32 %v1508_v8, %v1499_v18  ;;  %v4014_v44 = vpop.permute.xlu2 %1617  ;;  %v2119_v8 = vmul.f32 %v2116_v29, %v3859_v17 }
 0x31e   : > { %v1527_v36 = vadd.f32 %v1522_v59, %v1513_v58  ;;  %v2098_v59 = vmul.f32 %v2095_v14, %v3859_v17  ;;  %v2140_v58 = vmul.f32 %v2137_v39, %v3859_v17  ;;  %v2126_v34 = vrot.slane %v2119_v8, 4 }
 0x320   : > { %v1541_v23 = vadd.f32 %v3973_v60, %v1527_v36  ;;  %v2063_v60 = vrot.slane %v2056_v49, 4  ;;  %v2147_v52 = vrot.slane %v2140_v58, 4 }
 0x321   : > { %2006 = vrot.lane.b32.xlu0 %v2003_v55, %s3077_s24  ;;  %1985 = vrot.lane.b32.xlu1 %v1982_v40, %s3076_s6  ;;  %v2105_v55 = vrot.slane %v2098_v59, 4 }
 0x322   : > { %2044 = vrot.lane.b32.xlu2 %v2041_v21, %s3072_s26  ;;  %v2064_v43 = vsel %vm211_vm0, %v2061_v7, %v2063_v60 }
 0x323   : > { %v1524_v51 = vpop.permute.xlu1 %1523  ;;  %v1538_v6 = vpop.permute.xlu0 %1537  ;;  %v2106_v10 = vsel %vm211_vm0, %v2103_v32, %v2105_v55 }
 0x324   : > { %v1528_v37 = vadd.f32 %v1524_v51, %v3929_v31  ;;  %v4029_v19 = vpop.permute.xlu2 %1657  ;;  %v2054_v31 = vmul.f32 %v2053_v3, %v3843_v57  ;;  %v2139_v3 = vmul.f32 %v2137_v39, %v3833_v61 }
 0x326   : > { %v1542_v53 = vadd.f32 %v1538_v6, %v1528_v37  ;;  %v2060_v25 = vrot.slane %v2054_v31, 4  ;;  %v2145_v51 = vrot.slane %v2139_v3, 4  ;;  %v2138_v6 = vmul.f32 %v2137_v39, %v3843_v57 }
 0x327   : > { %v2177_v31 = vmul.f32 %v2175_v41, %v3833_v61 }
 0x328   : > { %v1556_v56 = vadd.f32 %v3985_v5, %v1542_v53  ;;  %v1586_v5 = vstv %s2812_s27  ;;  %v2062_v18 = vsel %vm211_vm0, %v2060_v25, %v2061_v7  ;;  %v2148_v53 = vsel %vm211_vm0, %v2145_v51, %v2147_v52  ;;  %s2844_s27 = sld [smem:[#allocation3 + $0x58]] }
 0x329   : > { %2067 = vrot.lane.b32.xlu0 %v2064_v43, %s3073_s28  ;;  %2046 = vrot.lane.b32.xlu1 %v2043_v9, %s3072_s26  ;;  %v1588_v47 = vmul.f32 %v1586_v5, %v3833_v61  ;;  %v1589_v33 = vmul.f32 %v1586_v5, %v3859_v17  ;;  %v1587_v16 = vmul.f32 %v1586_v5, %v3843_v57  ;;  %v2144_v13 = vrot.slane %v2138_v6, 4 }
 0x32a   : > { %2088 = vrot.lane.b32.xlu2 %v2085_v24, %s3074_s5  ;;  %v2199_v25 = vmul.f32 %v2196_v45, %v3859_v17  ;;  %v2217_v5 = vstv %s2843_s7  ;;  %s2849_s7 = sld [smem:[#allocation3 + $0x5d]] }
 0x32b   : > { %v1550_v22 = vpop.permute.xlu1 %1549  ;;  %v1564_v54 = vpop.permute.xlu0 %1563  ;;  %v1596_v1 = vrot.slane %v1589_v33, 1  ;;  %v1594_v40 = vrot.slane %v1588_v47, 1  ;;  %v2146_v50 = vsel %vm211_vm0, %v2144_v13, %v2145_v51  ;;  %v2220_v32 = vmul.f32 %v2217_v5, %v3859_v17 }
 0x32c   : > { %v1555_v2 = vadd.f32 %v1550_v22, %v1541_v23  ;;  %v4042_v4 = vpop.permute.xlu2 %1680  ;;  %v1593_v23 = vrot.slane %v1587_v16, 1  ;;  %v2123_v22 = vrot.slane %v2117_v38, 4  ;;  %v2218_v3 = vmul.f32 %v2217_v5, %v3843_v57 }
 0x32d   : > { %v1597_v15 = vsel %vm615_vm5, %v1594_v40, %v1596_v1  ;;  %v2227_v58 = vrot.slane %v2220_v32, 5  ;;  %v2280_v38 = vstv %s2846_s18  ;;  %s2852_s18 = sld [smem:[#allocation3 + $0x60]] }
 0x32e   : > { %v1569_v28 = vadd.f32 %v1564_v54, %v1555_v2  ;;  %v1595_v7 = vsel %vm615_vm5, %v1593_v23, %v1594_v40  ;;  %v2182_v54 = vrot.slane %v2176_v42, 5  ;;  %v2183_v2 = vrot.slane %v2177_v31, 5 }
 0x32f   : > { %v2238_v1 = vstv %s2844_s27  ;;  %v2224_v6 = vrot.slane %v2218_v3, 5  ;;  %v2283_v13 = vmul.f32 %v2280_v38, %v3859_v17  ;;  %s2850_s27 = sld [smem:[#allocation3 + $0x5e]]  ;;  %vm2621_vm5 = vcmask 392192  }
 0x330   : > { %v1583_v27 = vadd.f32 %v3998_v12, %v1569_v28  ;;  %v2118_v12 = vmul.f32 %v2116_v29, %v3833_v61  ;;  %v2178_v28 = vmul.f32 %v2175_v41, %v3859_v17  ;;  %v2184_v39 = vsel %vm490_vm2, %v2182_v54, %v2183_v2 }
 0x331   : > { %2086 = vrot.lane.b32.xlu0 %v2083_v48, %s3074_s5  ;;  %2065 = vrot.lane.b32.xlu1 %v2062_v18, %s3073_s28  ;;  %v2198_v48 = vmul.f32 %v2196_v45, %v3833_v61  ;;  %v2219_v18 = vmul.f32 %v2217_v5, %v3833_v61  ;;  %v2239_v40 = vmul.f32 %v2238_v1, %v3843_v57  ;;  %v2259_v41 = vstv %s2845_s21  ;;  %s2826_s21 = sld [smem:[#allocation3 + $0x46]] }
 0x332   : > { %2107 = vrot.lane.b32.xlu2 %v2104_v20, %s3075_s22  ;;  %v2124_v35 = vrot.slane %v2118_v12, 4  ;;  %v1600_v30 = vadd.f32 %v1595_v7, %v1583_v27  ;;  %v2206_v27 = vrot.slane %v2199_v25, 5  ;;  %v2185_v59 = vrot.slane %v2178_v28, 5 }
 0x333   : > { %v1566_v62 = vpop.permute.xlu1 %1565  ;;  %v1580_v36 = vpop.permute.xlu0 %1579  ;;  %v2204_v20 = vrot.slane %v2198_v48, 5  ;;  %v2240_v52 = vmul.f32 %v2238_v1, %v3833_v61  ;;  %v2261_v42 = vmul.f32 %v2259_v41, %v3833_v61  ;;  %v2241_v31 = vmul.f32 %v2238_v1, %v3859_v17 }
 0x334   : > { %v1570_v11 = vadd.f32 %v1566_v62, %v1556_v56  ;;  %v4059_v49 = vpop.permute.xlu2 %1720  ;;  %v2127_v60 = vsel %vm211_vm0, %v2124_v35, %v2126_v34  ;;  %v2225_v62 = vrot.slane %v2219_v18, 5 }
 0x335   : > { %v2207_v12 = vsel %vm490_vm2, %v2204_v20, %v2206_v27  ;;  %v2267_v28 = vrot.slane %v2261_v42, 5  ;;  %v2318_v27 = vstv %s2848_s23  ;;  %s2853_s23 = sld [smem:[#allocation3 + $0x61]] }
 0x336   : > { %v1584_v21 = vadd.f32 %v1580_v36, %v1570_v11  ;;  %v2186_v36 = vsel %vm490_vm2, %v2183_v2, %v2185_v59  ;;  %v2197_v11 = vmul.f32 %v2196_v45, %v3843_v57  ;;  %v2228_v55 = vsel %vm490_vm2, %v2225_v62, %v2227_v58 }
 0x337   : > { %v2282_v2 = vmul.f32 %v2280_v38, %v3833_v61  ;;  %v2281_v59 = vmul.f32 %v2280_v38, %v3843_v57 }
 0x338   : > { %v1601_v37 = vadd.f32 %v1597_v15, %v1584_v21 }
 0x339   : > { %2130 = vrot.lane.b32.xlu0 %v2127_v60, %s3076_s6  ;;  %2109 = vrot.lane.b32.xlu1 %v2106_v10, %s3075_s22  ;;  %v2246_v10 = vrot.slane %v2240_v52, 5 }
 0x33a   : > { %2151 = vrot.lane.b32.xlu2 %v2148_v53, %s3077_s24  ;;  %v1622_v14 = vadd.f32 %v4014_v44, %v1601_v37  ;;  %v2125_v44 = vsel %vm211_vm0, %v2123_v22, %v2124_v35  ;;  %v1729_v35 = vstv %s2819_s8  ;;  %v2245_v37 = vrot.slane %v2239_v40, 5  ;;  %s2851_s8 = sld [smem:[#allocation3 + $0x5f]] }
 0x33b   : > { %v1616_v43 = vpop.permute.xlu1 %1615  ;;  %v1637_v9 = vpop.permute.xlu0 %1636  ;;  %v1731_v53 = vmul.f32 %v1729_v35, %v3833_v61  ;;  %v1732_v7 = vmul.f32 %v1729_v35, %v3859_v17  ;;  %v1730_v22 = vmul.f32 %v1729_v35, %v3843_v57  ;;  %v2287_v40 = vrot.slane %v2281_v59, 5 }
 0x33c   : > { %v1621_v56 = vadd.f32 %v1616_v43, %v1600_v30  ;;  %v4074_v24 = vpop.permute.xlu2 %1760  ;;  %v2262_v30 = vmul.f32 %v2259_v41, %v3859_v17  ;;  %v2226_v43 = vsel %vm490_vm2, %v2224_v6, %v2225_v62  ;;  %v2339_v35 = vstv %s2849_s7  ;;  %s2648_s7 = scalar_lea.sflag [#allocation5], %s3198_s4 }
 0x33d   : > { %v2342_v6 = vmul.f32 %v2339_v35, %v3859_v17 }
 0x33e   : > { %v1642_v26 = vadd.f32 %v1637_v9, %v1621_v56  ;;  %v2247_v56 = vsel %vm490_vm2, %v2245_v37, %v2246_v10  ;;  %v2269_v45 = vrot.slane %v2262_v30, 5  ;;  %v2321_v37 = vmul.f32 %v2318_v27, %v3859_v17 }
 0x340   : > { %v1663_v29 = vadd.f32 %v4029_v19, %v1642_v26 }
 0x341   : > { %2149 = vrot.lane.b32.xlu0 %v2146_v50, %s3077_s24  ;;  %2128 = vrot.lane.b32.xlu1 %v2125_v44, %s3076_s6  ;;  %v2248_v50 = vrot.slane %v2241_v31, 5  ;;  %v1737_v44 = vrot.slane %v1731_v53, 2  ;;  %v2341_v53 = vmul.f32 %v2339_v35, %v3833_v61 }
 0x342   : > { %2187 = vrot.lane.b32.xlu2 %v2184_v39, %s3072_s26  ;;  %v1736_v39 = vrot.slane %v1730_v22, 2 }
 0x343   : > { %v1639_v47 = vpop.permute.xlu1 %1638  ;;  %v1660_v33 = vpop.permute.xlu0 %1659 }
 0x344   : > { %v1643_v8 = vadd.f32 %v1639_v47, %v1622_v14  ;;  %v4088_v19 = vpop.permute.xlu2 %1800  ;;  %v2270_v47 = vsel %vm490_vm2, %v2267_v28, %v2269_v45 }
 0x346   : > { %v1664_v16 = vadd.f32 %v1660_v33, %v1643_v8  ;;  %v2288_v33 = vrot.slane %v2282_v2, 5  ;;  %v2249_v8 = vsel %vm490_vm2, %v2246_v10, %v2248_v50  ;;  %v2340_v2 = vmul.f32 %v2339_v35, %v3843_v57 }
 0x348   : > { %v1685_v34 = vadd.f32 %v4042_v4, %v1664_v16  ;;  %v2203_v4 = vrot.slane %v2197_v11, 5  ;;  %v1738_v16 = vsel %vm759_vm6, %v1736_v39, %v1737_v44  ;;  %v2320_v11 = vmul.f32 %v2318_v27, %v3833_v61 }
 0x349   : > { %2210 = vrot.lane.b32.xlu0 %v2207_v12, %s3073_s28  ;;  %2189 = vrot.lane.b32.xlu1 %v2186_v36, %s3072_s26  ;;  %v2319_v12 = vmul.f32 %v2318_v27, %v3843_v57  ;;  %v2402_v27 = vstv %s2852_s18 }
 0x34a   : > { %2231 = vrot.lane.b32.xlu2 %v2228_v55, %s3074_s5  ;;  %v2205_v9 = vsel %vm490_vm2, %v2203_v4, %v2204_v20  ;;  %v2260_v20 = vmul.f32 %v2259_v41, %v3843_v57  ;;  %v2360_v4 = vstv %s2850_s27  ;;  %v2289_v41 = vsel %vm490_vm2, %v2287_v40, %v2288_v33 }
 0x34b   : > { %v1679_v23 = vpop.permute.xlu1 %1678  ;;  %v1700_v21 = vpop.permute.xlu0 %1699  ;;  %v2363_v38 = vmul.f32 %v2360_v4, %v3859_v17  ;;  %v2362_v30 = vmul.f32 %v2360_v4, %v3833_v61 }
 0x34c   : > { %v1684_v15 = vadd.f32 %v1679_v23, %v1663_v29  ;;  %v4101_v51 = vpop.permute.xlu2 %1823  ;;  %v2290_v29 = vrot.slane %v2283_v13, 5  ;;  %v2266_v52 = vrot.slane %v2260_v20, 5  ;;  %v2325_v23 = vrot.slane %v2319_v12, 6 }
 0x34d   : > { %v2370_v31 = vrot.slane %v2363_v38, 6  ;;  %v2347_v13 = vrot.slane %v2341_v53, 6  ;;  %v2368_v22 = vrot.slane %v2362_v30, 6  ;;  %v2423_v20 = vstv %s2853_s23  ;;  %s3009_s23 = scalar_lea.hbm %s4293_s3, 16 }
 0x34e   : > { %v1705_v60 = vadd.f32 %v1700_v21, %v1684_v15  ;;  %v2291_v58 = vsel %vm490_vm2, %v2288_v33, %v2290_v29  ;;  %v2326_v15 = vrot.slane %v2320_v11, 6  ;;  %v2404_v12 = vmul.f32 %v2402_v27, %v3833_v61 }
 0x34f   : > { %v2371_v50 = vsel %vm1333_vm8, %v2368_v22, %v2370_v31  ;;  %v2426_v40 = vmul.f32 %v2423_v20, %v3859_v17 }
 0x350   : > { %v1726_v14 = vadd.f32 %v4059_v49, %v1705_v60  ;;  %v1739_v49 = vrot.slane %v1732_v7, 2  ;;  %v2327_v10 = vsel %vm1333_vm8, %v2325_v23, %v2326_v15 }
 0x351   : > { %2229 = vrot.lane.b32.xlu0 %v2226_v43, %s3074_s5  ;;  %2208 = vrot.lane.b32.xlu1 %v2205_v9, %s3073_s28  ;;  %v2328_v9 = vrot.slane %v2321_v37, 6  ;;  %v2433_v37 = vrot.slane %v2426_v40, 6 }
 0x352   : > { %2250 = vrot.lane.b32.xlu2 %v2247_v56, %s3075_s22  ;;  %v1740_v32 = vsel %vm759_vm6, %v1737_v44, %v1739_v49  ;;  %v1743_v62 = vadd.f32 %v1738_v16, %v1726_v14  ;;  %v2381_v49 = vstv %s2851_s8  ;;  %vm2625_vm6 = vcmask 654336  }
 0x353   : > { %v1702_v54 = vpop.permute.xlu1 %1701  ;;  %v1723_v26 = vpop.permute.xlu0 %1722  ;;  %v2329_v45 = vsel %vm1333_vm8, %v2326_v15, %v2328_v9  ;;  %v2382_v44 = vmul.f32 %v2381_v49, %v3843_v57  ;;  %v2383_v39 = vmul.f32 %v2381_v49, %v3833_v61  ;;  %v2384_v11 = vmul.f32 %v2381_v49, %v3859_v17 }
 0x354   : > { %v1706_v25 = vadd.f32 %v1702_v54, %v1685_v34  ;;  %v4118_v5 = vpop.permute.xlu2 %1863  ;;  %v2361_v54 = vmul.f32 %v2360_v4, %v3843_v57  ;;  %v2425_v15 = vmul.f32 %v2423_v20, %v3833_v61  ;;  %v2403_v9 = vmul.f32 %v2402_v27, %v3843_v57 }
 0x355   : > { %v2391_v4 = vrot.slane %v2384_v11, 6 }
 0x356   : > { %v1727_v48 = vadd.f32 %v1723_v26, %v1706_v25  ;;  %v2367_v33 = vrot.slane %v2361_v54, 6 }
 0x358   : > { %v1744_v18 = vadd.f32 %v1740_v32, %v1727_v48  ;;  %v1872_v48 = vstv %s2826_s21 }
 0x359   : > { %2273 = vrot.lane.b32.xlu0 %v2270_v47, %s3076_s6  ;;  %2252 = vrot.lane.b32.xlu1 %v2249_v8, %s3075_s22  ;;  %v1874_v59 = vmul.f32 %v1872_v48, %v3833_v61  ;;  %v1875_v16 = vmul.f32 %v1872_v48, %v3859_v17 }
 0x35a   : > { %2294 = vrot.lane.b32.xlu2 %v2291_v58, %s3077_s24  ;;  %v1765_v1 = vadd.f32 %v4074_v24, %v1744_v18  ;;  %v2268_v24 = vsel %vm490_vm2, %v2266_v52, %v2267_v28  ;;  %v2388_v18 = vrot.slane %v2382_v44, 6  ;;  %v2389_v58 = vrot.slane %v2383_v39, 6 }
 0x35b   : > { %v1759_v36 = vpop.permute.xlu1 %1758  ;;  %v1780_v3 = vpop.permute.xlu0 %1779  ;;  %v1873_v52 = vmul.f32 %v1872_v48, %v3843_v57 }
 0x35c   : > { %v1764_v34 = vadd.f32 %v1759_v36, %v1743_v62  ;;  %v4133_v55 = vpop.permute.xlu2 %1903  ;;  %v2405_v62 = vmul.f32 %v2402_v27, %v3859_v17  ;;  %v2369_v36 = vsel %vm1333_vm8, %v2367_v33, %v2368_v22 }
 0x35e   : > { %v1785_v21 = vadd.f32 %v1780_v3, %v1764_v34  ;;  %v2390_v34 = vsel %vm1333_vm8, %v2388_v18, %v2389_v58  ;;  %v2412_v35 = vrot.slane %v2405_v62, 6 }
 0x360   : > { %v1806_v60 = vadd.f32 %v4088_v19, %v1785_v21  ;;  %v2349_v19 = vrot.slane %v2342_v6, 6 }
 0x361   : > { %2292 = vrot.lane.b32.xlu0 %v2289_v41, %s3077_s24  ;;  %2271 = vrot.lane.b32.xlu1 %v2268_v24, %s3076_s6  ;;  %v1880_v41 = vrot.slane %v1874_v59, 3  ;;  %v2410_v24 = vrot.slane %v2404_v12, 6 }
 0x362   : > { %2330 = vrot.lane.b32.xlu2 %v2327_v10, %s3072_s26  ;;  %v2350_v26 = vsel %vm1333_vm8, %v2347_v13, %v2349_v19  ;;  %v2424_v19 = vmul.f32 %v2423_v20, %v3843_v57 }
 0x363   : > { %v1782_v7 = vpop.permute.xlu1 %1781  ;;  %v1803_v42 = vpop.permute.xlu0 %1802 }
 0x364   : > { %v1786_v14 = vadd.f32 %v1782_v7, %v1765_v1  ;;  %v4147_v43 = vpop.permute.xlu2 %1945  ;;  %v2413_v7 = vsel %vm1333_vm8, %v2410_v24, %v2412_v35 }
 0x366   : > { %v1807_v56 = vadd.f32 %v1803_v42, %v1786_v14  ;;  %v2431_v42 = vrot.slane %v2425_v15, 6  ;;  %v2392_v14 = vsel %vm1333_vm8, %v2389_v58, %v2391_v4 }
 0x368   : > { %v1828_v25 = vadd.f32 %v4101_v51, %v1807_v56  ;;  %v2346_v51 = vrot.slane %v2340_v2, 6  ;;  %v2434_v31 = vsel %vm1333_vm8, %v2431_v42, %v2433_v37  ;;  %v2430_v2 = vrot.slane %v2424_v19, 6 }
 0x369   : > { %2353 = vrot.lane.b32.xlu0 %v2350_v26, %s3073_s28  ;;  %2332 = vrot.lane.b32.xlu1 %v2329_v45, %s3072_s26  ;;  %s2833_s26 = sld [smem:[#allocation3 + $0x4d]] }
 0x36a   : > { %2374 = vrot.lane.b32.xlu2 %v2371_v50, %s3074_s5  ;;  %v2348_v3 = vsel %vm1333_vm8, %v2346_v51, %v2347_v13 }
 0x36b   : > { %v1822_v28 = vpop.permute.xlu1 %1821  ;;  %v1843_v29 = vpop.permute.xlu0 %1842 }
 0x36c   : > { %v1827_v32 = vadd.f32 %v1822_v28, %v1806_v60  ;;  %v4160_v47 = vpop.permute.xlu2 %1964  ;;  %v1879_v60 = vrot.slane %v1873_v52, 3  ;;  %v2432_v28 = vsel %vm1333_vm8, %v2430_v2, %v2431_v42 }
 0x36e   : > { %v1848_v8 = vadd.f32 %v1843_v29, %v1827_v32  ;;  %v1881_v56 = vsel %vm903_vm7, %v1879_v60, %v1880_v41 }
 0x370   : > { %v1869_v1 = vadd.f32 %v4118_v5, %v1848_v8  ;;  %v1882_v5 = vrot.slane %v1875_v16, 3 }
 0x371   : > { %2372 = vrot.lane.b32.xlu0 %v2369_v36, %s3074_s5  ;;  %2351 = vrot.lane.b32.xlu1 %v2348_v3, %s3073_s28  ;;  %v2015_v36 = vstv %s2833_s26  ;;  %s2443_s28 = sld [smem:[#allocation2]] }
 0x372   : > { %2393 = vrot.lane.b32.xlu2 %v2390_v34, %s3075_s22  ;;  %v1883_v53 = vsel %vm903_vm7, %v1880_v41, %v1882_v5  ;;  %v1886_v13 = vadd.f32 %v1881_v56, %v1869_v1  ;;  %v2018_v3 = vmul.f32 %v2015_v36, %v3859_v17  ;;  %v2016_v40 = vmul.f32 %v2015_v36, %v3843_v57 }
 0x373   : > { %v1845_v23 = vpop.permute.xlu1 %1844  ;;  %v1866_v21 = vpop.permute.xlu0 %1865  ;;  %vm2627_vm7 = vcmask 785408  }
 0x374   : > { %v1849_v6 = vadd.f32 %v1845_v23, %v1828_v25  ;;  %v2009_v10 = vpop.permute.xlu2 %2008  ;;  %v2409_v25 = vrot.slane %v2403_v9, 6  ;;  %v2025_v52 = vrot.slane %v2018_v3, 4 }
 0x376   : > { %v1870_v38 = vadd.f32 %v1866_v21, %v1849_v6  ;;  %v2411_v29 = vsel %vm1333_vm8, %v2409_v25, %v2410_v24  ;;  %v2022_v6 = vrot.slane %v2016_v40, 4 }
 0x378   : > { %v1887_v30 = vadd.f32 %v1883_v53, %v1870_v38 }
 0x379   : > { %2416 = vrot.lane.b32.xlu0 %v2413_v7, %s3076_s6  ;;  %2395 = vrot.lane.b32.xlu1 %v2392_v14, %s3075_s22 }
 0x37a   : > { %2437 = vrot.lane.b32.xlu2 %v2434_v31, %s3077_s24  ;;  %v1908_v22 = vadd.f32 %v4133_v55, %v1887_v30 }
 0x37b   : > { %v1902_v54 = vpop.permute.xlu1 %1901  ;;  %v1925_v49 = vpop.permute.xlu0 %1924 }
 0x37c   : > { %v1907_v26 = vadd.f32 %v1902_v54, %v1886_v13  ;;  %v1929_v45 = vadd.f32 %v1925_v49, %v1908_v22  ;;  %v2045_v44 = vpop.permute.xlu2 %2044 }
 0x37e   : > { %v1950_v50 = vadd.f32 %v4147_v43, %v1929_v45 }
 0x381   : > { %2435 = vrot.lane.b32.xlu0 %v2432_v28, %s3077_s24  ;;  %2414 = vrot.lane.b32.xlu1 %v2411_v29, %s3076_s6  ;;  %s2840_s6 = sld [smem:[#allocation3 + $0x54]] }
 0x382   : > { %s2847_s24 = sld [smem:[#allocation3 + $0x5b]] }
 0x383   : > { %v1923_v39 = vpop.permute.xlu1 %1922  ;;  %v1944_v48 = vpop.permute.xlu0 %1943 }
 0x384   : > { %v1928_v55 = vadd.f32 %v1923_v39, %v1907_v26  ;;  %v2089_v51 = vpop.permute.xlu2 %2088 }
 0x386   : > { %v1949_v32 = vadd.f32 %v1944_v48, %v1928_v55 }
 0x387   : > { %v2158_v54 = vstv %s2840_s6 }
 0x388   : > { %v1970_v33 = vadd.f32 %v4160_v47, %v1949_v32  ;;  %v2017_v47 = vmul.f32 %v2015_v36, %v3833_v61  ;;  %v2161_v49 = vmul.f32 %v2158_v54, %v3859_v17  ;;  %v2160_v45 = vmul.f32 %v2158_v54, %v3833_v61 }
 0x389   : > { %v2159_v25 = vmul.f32 %v2158_v54, %v3843_v57  ;;  %v2301_v40 = vstv %s2847_s24 }
 0x38a   : > { %v2023_v15 = vrot.slane %v2017_v47, 4  ;;  %v2166_v48 = vrot.slane %v2160_v45, 5  ;;  %v2444_v45 = vstv %s2443_s28 }
 0x38b   : > { %v1967_v27 = vpop.permute.xlu1 %1966  ;;  %v1988_v18 = vpop.permute.xlu0 %1987  ;;  %v2165_v32 = vrot.slane %v2159_v25, 5 }
 0x38c   : > { %v2108_v59 = vpop.permute.xlu2 %2107  ;;  %v1971_v1 = vadd.f32 %v1967_v27, %v1950_v50  ;;  %v2026_v4 = vsel %vm211_vm0, %v2023_v15, %v2025_v52  ;;  %v2024_v38 = vsel %vm211_vm0, %v2022_v6, %v2023_v15  ;;  %v2168_v50 = vrot.slane %v2161_v49, 5 }
 0x38d   : > { %v2304_v52 = vmul.f32 %v2301_v40, %v3859_v17  ;;  %v2302_v15 = vmul.f32 %v2301_v40, %v3843_v57 }
 0x38e   : > { %v1992_v11 = vadd.f32 %v1988_v18, %v1971_v1 }
 0x38f   : > { %v2311_v6 = vrot.slane %v2304_v52, 6 }
 0x390   : > { %v2013_v21 = vadd.f32 %v2009_v10, %v1992_v11 }
 0x392   : > { %v2030_v24 = vadd.f32 %v2026_v4, %v2013_v21 }
 0x393   : > { %v1986_v8 = vpop.permute.xlu1 %1985  ;;  %v2007_v43 = vpop.permute.xlu0 %2006 }
 0x394   : > { %v2152_v16 = vpop.permute.xlu2 %2151  ;;  %v1991_v35 = vadd.f32 %v1986_v8, %v1970_v33  ;;  %v2169_v33 = vsel %vm490_vm2, %v2166_v48, %v2168_v50  ;;  %v2167_v8 = vsel %vm490_vm2, %v2165_v32, %v2166_v48 }
 0x396   : > { %v2012_v41 = vadd.f32 %v2007_v43, %v1991_v35 }
 0x398   : > { %v2029_v42 = vadd.f32 %v2024_v38, %v2012_v41 }
 0x39a   : > { %v2050_v14 = vadd.f32 %v2045_v44, %v2029_v42 }
 0x39b   : > { %v2047_v20 = vpop.permute.xlu1 %2046  ;;  %v2068_v58 = vpop.permute.xlu0 %2067 }
 0x39c   : > { %v2188_v34 = vpop.permute.xlu2 %2187  ;;  %v2051_v37 = vadd.f32 %v2047_v20, %v2030_v24 }
 0x39e   : > { %v2072_v30 = vadd.f32 %v2068_v58, %v2051_v37 }
 0x3a0   : > { %v2093_v9 = vadd.f32 %v2089_v51, %v2072_v30 }
 0x3a3   : > { %v2066_v12 = vpop.permute.xlu1 %2065  ;;  %v2087_v62 = vpop.permute.xlu0 %2086 }
 0x3a4   : > { %v2232_v60 = vpop.permute.xlu2 %2231  ;;  %v2071_v19 = vadd.f32 %v2066_v12, %v2050_v14 }
 0x3a6   : > { %v2092_v22 = vadd.f32 %v2087_v62, %v2071_v19 }
 0x3a8   : > { %v2113_v2 = vadd.f32 %v2108_v59, %v2092_v22 }
 0x3ab   : > { %v2110_v23 = vpop.permute.xlu1 %2109  ;;  %v2131_v5 = vpop.permute.xlu0 %2130 }
 0x3ac   : > { %v2114_v56 = vadd.f32 %v2110_v23, %v2093_v9  ;;  %v2251_v13 = vpop.permute.xlu2 %2250 }
 0x3ae   : > { %v2135_v26 = vadd.f32 %v2131_v5, %v2114_v56  ;;  %v2303_v5 = vmul.f32 %v2301_v40, %v3833_v61 }
 0x3b0   : > { %v2156_v44 = vadd.f32 %v2152_v16, %v2135_v26  ;;  %v2309_v37 = vrot.slane %v2303_v5, 6 }
 0x3b2   : > { %v2173_v27 = vadd.f32 %v2169_v33, %v2156_v44  ;;  %v2312_v38 = vsel %vm1333_vm8, %v2309_v37, %v2311_v6 }
 0x3b3   : > { %v2129_v53 = vpop.permute.xlu1 %2128  ;;  %v2150_v7 = vpop.permute.xlu0 %2149 }
 0x3b4   : > { %v2134_v39 = vadd.f32 %v2129_v53, %v2113_v2  ;;  %v2295_v55 = vpop.permute.xlu2 %2294 }
 0x3b6   : > { %v2155_v51 = vadd.f32 %v2150_v7, %v2134_v39 }
 0x3b8   : > { %v2172_v59 = vadd.f32 %v2167_v8, %v2155_v51 }
 0x3ba   : > { %v2193_v62 = vadd.f32 %v2188_v34, %v2172_v59 }
 0x3bb   : > { %v2190_v10 = vpop.permute.xlu1 %2189  ;;  %v2211_v31 = vpop.permute.xlu0 %2210 }
 0x3bc   : > { %v2194_v18 = vadd.f32 %v2190_v10, %v2173_v27  ;;  %v2331_v12 = vpop.permute.xlu2 %2330 }
 0x3be   : > { %v2215_v58 = vadd.f32 %v2211_v31, %v2194_v18 }
 0x3c0   : > { %v2236_v16 = vadd.f32 %v2232_v60, %v2215_v58  ;;  %v2308_v60 = vrot.slane %v2302_v15, 6 }
 0x3c2   : > { %v2310_v17 = vsel %vm1333_vm8, %v2308_v60, %v2309_v37  ;;  %vm2629_vm8 = vcmask 916480  }
 0x3c3   : > { %v2209_v28 = vpop.permute.xlu1 %2208  ;;  %v2230_v29 = vpop.permute.xlu0 %2229 }
 0x3c4   : > { %v2214_v1 = vadd.f32 %v2209_v28, %v2193_v62  ;;  %v2375_v21 = vpop.permute.xlu2 %2374 }
 0x3c6   : > { %v2235_v47 = vadd.f32 %v2230_v29, %v2214_v1 }
 0x3c8   : > { %v2256_v35 = vadd.f32 %v2251_v13, %v2235_v47 }
 0x3cb   : > { %v2253_v43 = vpop.permute.xlu1 %2252  ;;  %v2274_v20 = vpop.permute.xlu0 %2273 }
 0x3cc   : > { %v2257_v11 = vadd.f32 %v2253_v43, %v2236_v16  ;;  %v2394_v19 = vpop.permute.xlu2 %2393 }
 0x3ce   : > { %v2278_v23 = vadd.f32 %v2274_v20, %v2257_v11 }
 0x3d0   : > { %v2299_v34 = vadd.f32 %v2295_v55, %v2278_v23 }
 0x3d2   : > { %v2316_v7 = vadd.f32 %v2312_v38, %v2299_v34 }
 0x3d3   : > { %v2272_v36 = vpop.permute.xlu1 %2271  ;;  %v2293_v3 = vpop.permute.xlu0 %2292 }
 0x3d4   : > { %v2277_v24 = vadd.f32 %v2272_v36, %v2256_v35  ;;  %v2438_v26 = vpop.permute.xlu2 %2437 }
 0x3d6   : > { %v2298_v53 = vadd.f32 %v2293_v3, %v2277_v24 }
 0x3d8   : > { %v2315_v14 = vadd.f32 %v2310_v17, %v2298_v53 }
 0x3da   : > { %v2336_v57 = vadd.f32 %v2331_v12, %v2315_v14 }
 0x3db   : > { %v2333_v4 = vpop.permute.xlu1 %2332  ;;  %v2354_v41 = vpop.permute.xlu0 %2353 }
 0x3dc   : > { %v2337_v42 = vadd.f32 %v2333_v4, %v2316_v7 }
 0x3de   : > { %v2358_v9 = vadd.f32 %v2354_v41, %v2337_v42 }
 0x3e0   : > { %v2379_v31 = vadd.f32 %v2375_v21, %v2358_v9 }
 0x3e3   : > { %v2352_v30 = vpop.permute.xlu1 %2351  ;;  %v2373_v61 = vpop.permute.xlu0 %2372 }
 0x3e4   : > { %v2357_v10 = vadd.f32 %v2352_v30, %v2336_v57 }
 0x3e6   : > { %v2378_v54 = vadd.f32 %v2373_v61, %v2357_v10 }
 0x3e8   : > { %v2399_v25 = vadd.f32 %v2394_v19, %v2378_v54 }
 0x3eb   : > { %v2396_v56 = vpop.permute.xlu1 %2395  ;;  %v2417_v13 = vpop.permute.xlu0 %2416 }
 0x3ec   : > { %v2400_v22 = vadd.f32 %v2396_v56, %v2379_v31 }
 0x3ee   : > { %v2421_v49 = vadd.f32 %v2417_v13, %v2400_v22 }
 0x3f0   : > { %v2442_v2 = vadd.f32 %v2438_v26, %v2421_v49 }
 0x3f2   : > { %v2446_v50 = vadd.f32 %v2444_v45, %v2442_v2 }
 0x3f3   : > { %v2415_v28 = vpop.permute.xlu1 %2414  ;;  %v2436_v39 = vpop.permute.xlu0 %2435 }
 0x3f4   : > { %v2420_v29 = vadd.f32 %v2415_v28, %v2399_v25  ;;  %v2855_v44 = vmul.f32 -1.442695, %v2446_v50 }
 0x3f6   : > { %2936 = vpow2.f32 %v2855_v44  ;;  %v2441_v48 = vadd.f32 %v2436_v39, %v2420_v29 }
 0x3f8   : > { %v2445_v55 = vadd.f32 %v2444_v45, %v2441_v48 }
 0x3fa   : > { %v2854_v32 = vmul.f32 -1.442695, %v2445_v55 }
 0x3fc   : > { %v2937_v33 = vpop.eup %2936  ;;  %2938 = vpow2.f32 %v2854_v32 }
 0x3fd   : > { %v2454_v51 = vadd.f32 1.0, %v2937_v33 }
 0x3ff   : > { %2940 = vrcp.f32 %v2454_v51  ;;  %v2481_v59 = vand.u32 2147483648, %v2454_v51  ;;  %v2479_v12 = vand.u32 2147483647, %v2454_v51  ;;  %vm2475_vm10 = vweird.f32 %v2454_v51 }
 0x401   : > { %v2482_v36 = vor.u32 1.1754944e-38, %v2481_v59  ;;  %vm2480_vm12 = vcmp.eq.f32.partialorder %v2479_v12, 8.507059e+37 }
 0x402   : > { %v2939_v27 = vpop.eup %2938 }
 0x403   : > { %v2453_v18 = vadd.f32 1.0, %v2939_v27 }
 0x405   : > { %v2941_v8 = vpop.eup %2940  ;;  %2942 = vrcp.f32 %v2453_v18  ;;  %v2466_v40 = vand.u32 2147483648, %v2453_v18  ;;  %v2464_v5 = vand.u32 2147483647, %v2453_v18  ;;  %vm2460_vm14 = vweird.f32 %v2453_v18 }
 0x406   : > { %v2471_v43 = vmul.f32 %v2941_v8, %v2454_v51  ;;  %vm2476_vm9 = vweird.f32 %v2941_v8 }
 0x407   : > { %vm2477_vm11 = vmor %vm2475_vm10, %vm2476_vm9  ;;  %v2467_v4 = vor.u32 1.1754944e-38, %v2466_v40  ;;  %vm2465_vm2 = vcmp.eq.f32.partialorder %v2464_v5, 8.507059e+37 }
 0x408   : > { %v2472_v20 = vsub.f32 1.0, %v2471_v43 }
 0x40a   : > { %v2473_v58 = vmul.f32 %v2941_v8, %v2472_v20 }
 0x40b   : > { %v2943_v62 = vpop.eup %2942 }
 0x40c   : > { %v2456_v1 = vmul.f32 %v2943_v62, %v2453_v18  ;;  %v2474_v16 = vadd.f32 %v2941_v8, %v2473_v58  ;;  %vm2461_vm13 = vweird.f32 %v2943_v62 }
 0x40d   : > { %vm2462_vm15 = vmor %vm2460_vm14, %vm2461_vm13 }
 0x40e   : > { %v2457_v3 = vsub.f32 1.0, %v2456_v1  ;;  %v2478_v11 = vsel %vm2477_vm11, %v2941_v8, %v2474_v16 }
 0x40f   : > { %v2483_v47 = vsel %vm2480_vm12, %v2482_v36, %v2478_v11 }
 0x410   : > { %v2528_v52 = vperm.slane %v2483_v47, %v3280_v46  ;;  %v2458_v23 = vmul.f32 %v2943_v62, %v2457_v3  ;;  %v2523_v6 = vrot.slane %v2483_v47, 4 }
 0x412   : > { %v4211_v21 = vperm.slane %v2528_v52, %v3291_v63  ;;  %v2533_v35 = vrot.slane %v2528_v52, 4  ;;  %v2459_v15 = vadd.f32 %v2943_v62, %v2458_v23  ;;  %v2524_v7 = vsel %vm292_vm1, 0.0, %v2523_v6 }
 0x413   : > { %v2532_v19 = vperm.slane %v2524_v7, %v3280_v46 }
 0x414   : > { %v2553_v41 = vrot.slane %v4211_v21, 4  ;;  %v2534_v34 = vsel %vm292_vm1, 0.0, %v2533_v35  ;;  %v2463_v24 = vsel %vm2462_vm15, %v2943_v62, %v2459_v15 }
 0x415   : > { %v2542_v37 = vperm.slane %v2534_v34, %v3291_v63  ;;  %v2468_v60 = vsel %vm2465_vm2, %v2467_v4, %v2463_v24  ;;  %v2548_v56 = vperm.slane %v2532_v19, %v3291_v63  ;;  %v2543_v26 = vrot.slane %v2532_v19, 4 }
 0x416   : > { %v2554_v38 = vsel %vm292_vm1, 0.0, %v2553_v41  ;;  %v2490_v53 = vperm.slane %v2468_v60, %v3280_v46  ;;  %v2485_v9 = vrot.slane %v2468_v60, 4 }
 0x417   : > { %2590 = vrot.lane.b32.xlu1 %v2554_v38, %s3068_s13  ;;  %2594 = vrot.lane.b32.xlu2 %v2542_v37, %s3067_s12  ;;  %v2555_v61 = vrot.slane %v2542_v37, 4  ;;  %v2557_v22 = vrot.slane %v2548_v56, 4  ;;  %v2544_v28 = vsel %vm292_vm1, 0.0, %v2543_v26 }
 0x418   : > { %v2500_v42 = vperm.slane %v2490_v53, %v3291_v63  ;;  %v2495_v17 = vrot.slane %v2490_v53, 4  ;;  %v2486_v13 = vsel %vm292_vm1, 0.0, %v2485_v9 }
 0x419   : > { %v2556_v31 = vsel %vm292_vm1, 0.0, %v2555_v61  ;;  %v2494_v49 = vperm.slane %v2486_v13, %v3280_v46  ;;  %v2558_v45 = vsel %vm292_vm1, 0.0, %v2557_v22  ;;  %v2552_v46 = vperm.slane %v2544_v28, %v3291_v63 }
 0x41a   : > { %v2515_v30 = vrot.slane %v2500_v42, 4  ;;  %v2496_v14 = vsel %vm292_vm1, 0.0, %v2495_v17 }
 0x41b   : > { %v2504_v10 = vperm.slane %v2496_v14, %v3291_v63  ;;  %v2510_v25 = vperm.slane %v2494_v49, %v3291_v63  ;;  %v2505_v50 = vrot.slane %v2494_v49, 4  ;;  %v2559_v55 = vrot.slane %v2552_v46, 4 }
 0x41c   : > { %v2516_v57 = vsel %vm292_vm1, 0.0, %v2515_v30 }
 0x41d   : > { %2562 = vrot.lane.b32.xlu0 %v2516_v57, %s3068_s13  ;;  %v2517_v54 = vrot.slane %v2504_v10, 4  ;;  %v2519_v29 = vrot.slane %v2510_v25, 4  ;;  %v2506_v44 = vsel %vm292_vm1, 0.0, %v2505_v50  ;;  %v2560_v33 = vsel %vm292_vm1, 0.0, %v2559_v55  ;;  %s4303_s13 = sshll.u32 %s3198_s4, 3 }
 0x41e   : > { %v2514_v48 = vperm.slane %v2506_v44, %v3291_v63  ;;  %s203_s5 = scalar_lea.vmem [#allocation8], %s4303_s13 }
 0x41f   : > { %2598 = vrot.lane.b32.xlu1 %v2556_v31, %s3064_s9  ;;  %2566 = vrot.lane.b32.xlu2 %v2504_v10, %s3067_s12  ;;  %v2518_v2 = vsel %vm292_vm1, 0.0, %v2517_v54  ;;  %v2520_v39 = vsel %vm292_vm1, 0.0, %v2519_v29 }
 0x420   : > { %v2521_v32 = vrot.slane %v2514_v48, 4 }
 0x422   : > { %v2522_v51 = vsel %vm292_vm1, 0.0, %v2521_v32  ;;  %vm2623_vm1 = vcmask 523264  }
 0x425   : > { %2602 = vrot.lane.b32.xlu0 %v2548_v56, %s3065_s10 }
 0x427   : > { %2606 = vrot.lane.b32.xlu2 %v2558_v45, %s3062_s19  ;;  %2570 = vrot.lane.b32.xlu1 %v2518_v2, %s3064_s9  ;;  %s4302_s9 = smov 112  }
 0x42d   : > { %2574 = vrot.lane.b32.xlu0 %v2510_v25, %s3065_s10 }
 0x42f   : > { %2610 = vrot.lane.b32.xlu1 %v2552_v46, %s3066_s11  ;;  %2578 = vrot.lane.b32.xlu2 %v2520_v39, %s3062_s19  ;;  %s2862_s19 = sshll.u32 %s3122_s1, 3  ;;  %s2661_s1 = sshll.u32 %s203_s5, 4  ;;  %s2662_s1 = int_to_ptr.vmem [resolvable:$true] %s2661_s1 }
 0x430   : > { %s2659_s12 = scalar_lea.hbm %s4293_s3, %s2862_s19 }
 0x431   : > { %s2663_s22 = sshll.u32 %s2659_s12, 4  ;;  %s2664_s22 = int_to_ptr.hbm [resolvable:$true] %s2663_s22 }
 0x432   : > { %s3003_s27 = sshra.s32 %s2664_s22, 4  ;;  %s3004_s27 = int_to_ptr.hbm [resolvable:$true] %s3003_s27 }
 0x433   : > { %s3005_s8 = scalar_lea.hbm %s3004_s27, 8  ;;  %p3010_p9 = scmp.lt.s32.totalorder %s3004_s27, %s4293_s3 }
 0x434   : > { %p3006_p1 = scmp.ne.s32.totalorder %s3004_s27, %s3005_s8  ;;  %p3011_p10 = scmp.lt.s32.totalorder %s3009_s23, %s3005_s8 }
 0x435   : > { %2614 = vrot.lane.b32.xlu0 %v2560_v33, %s4302_s9 }
 0x436   : > { %p3007_p4 = pnand %p3006_p1, %p3167_p3  ;;  %p3012_p2 = por %p3011_p10, %p3010_p9 }
 0x437   : > { %2582 = vrot.lane.b32.xlu1 %v2514_v48, %s3066_s11  ;;  %2586 = vrot.lane.b32.xlu2 %v2522_v51, %s4302_s9 }
 0x438   : > { %p3008_p8 = pneg %p3007_p4 }
 0x43a   : > { %p3013_p11 = pnand %p3012_p2, %p3008_p8 }
 0x471   : > { %v2595_v27 = vpop.permute.xlu2 %2594 }
 0x479   : > { %v2567_v8 = vpop.permute.xlu2 %2566 }
 0x481   : > { %v2607_v20 = vpop.permute.xlu2 %2606 }
 0x489   : > { %v2591_v18 = vpop.permute.xlu1 %2590  ;;  %v2579_v1 = vpop.permute.xlu2 %2578 }
 0x48a   : > { %v2631_v12 = vsel %vm2617_vm3, %v4211_v21, %v2591_v18 }
 0x48b   : > { %v2632_v36 = vsel %vm2619_vm4, %v2631_v12, %v2595_v27 }
 0x48f   : > { %v2563_v63 = vpop.permute.xlu0 %2562 }
 0x490   : > { %v2618_v16 = vsel %vm2617_vm3, %v2500_v42, %v2563_v63 }
 0x491   : > { %v2599_v43 = vpop.permute.xlu1 %2598  ;;  %v2620_v40 = vsel %vm2619_vm4, %v2618_v16, %v2567_v8  ;;  %v2587_v34 = vpop.permute.xlu2 %2586 }
 0x492   : > { %v2633_v11 = vsel %vm2621_vm5, %v2632_v36, %v2599_v43 }
 0x497   : > { %v2603_v59 = vpop.permute.xlu0 %2602 }
 0x498   : > { %v2634_v47 = vsel %vm2623_vm1, %v2633_v11, %v2603_v59 }
 0x499   : > { %v2571_v58 = vpop.permute.xlu1 %2570  ;;  %v2635_v5 = vsel %vm2625_vm6, %v2634_v47, %v2607_v20 }
 0x49a   : > { %v2622_v52 = vsel %vm2621_vm5, %v2620_v40, %v2571_v58 }
 0x49f   : > { %v2575_v62 = vpop.permute.xlu0 %2574 }
 0x4a0   : > { %v2624_v23 = vsel %vm2623_vm1, %v2622_v52, %v2575_v62 }
 0x4a1   : > { %v2611_v3 = vpop.permute.xlu1 %2610  ;;  %v2626_v4 = vsel %vm2625_vm6, %v2624_v23, %v2579_v1 }
 0x4a2   : > { %v2636_v21 = vsel %vm2627_vm7, %v2635_v5, %v2611_v3 }
 0x4a7   : > { %v2615_v35 = vpop.permute.xlu0 %2614 }
 0x4a8   : > { %v2637_v15 = vsel %vm2629_vm8, %v2636_v21, %v2615_v35 }
 0x4a9   : > { %v2639_v6 = vperm.slane %v2637_v15, 0  ;;  %v2583_v41 = vpop.permute.xlu1 %2582 }
 0x4aa   : > { %v2628_v24 = vsel %vm2627_vm7, %v2626_v4, %v2583_v41 }
 0x4ab   : > { %v2642_v37 = vrot.slane %v2639_v6, 4  ;;  %v2630_v60 = vsel %vm2629_vm8, %v2628_v24, %v2587_v34 }
 0x4ac   : > { %v2638_v38 = vperm.slane %v2630_v60, 0 }
 0x4ae   : > { %v2643_v53 = vsel %vm211_vm0, %v2638_v38, %v2642_v37 }
 0x4af   : > { %v2645_v7 = vmul.f32 %v2643_v53, %v3208_v0 }
 0x4b1   : > { %2646 = vst [vmem:[%s203_s5] sm:$0xff] %v2645_v7 }
 0x4b2   : > { %3016 = shalt.err (!%p3013_p11)
}
 0x4b3   : > { %2869 = dma.vmem_to_hbm [thread:$0]  (%p3167_p3), %s2662_s1, 128, %s2664_s22, %s2648_s7  }
 0x4b4 PF: > { %s2675_s4 = sand.u32 1, %s3047_s14   ;;  %p4304_p12 = scmp.ge.s32.totalorder %s3059_s17, 2 }
 0x4b5   : > { %s2676_s24 = scalar_lea.sflag [#allocation5], %s2675_s4 }
 0x4b6   : > { %p2880_p13 = pnand %p4304_p12, %p3136_p6 }
 0x4b8   : > { %p2881_p0 = pneg %p2880_p13 }
 0x4ba   : > { %3042 = dma.done.wait (%p2881_p0), %s2676_s24, 128  }
 0x4bb   : > { %3044 = vsyncadd (%p2881_p0), %s2676_s24, 4294967168  ;;  %p18_p5 = scmp.ge.s32.totalorder %s3152_s25, 4   ;;  %s4305_s14 = smov %s3051_s15 }
 0x4bc   : > { %s4306_s15 = smov %s3055_s16  ;;  %s4307_s16 = smov %s3162_s29 }
 0x4bd   : > { %s4308_s17 = smov %s3152_s25  ;;  %20 = sbr.rel (!%p18_p5) target bundleno = 8 (0x8), region = 82 }
 0x4c2   :  { %2682 = vsyncpa [#allocation4], 1 }
 0x4c3   :  { %2684 = vsyncpa [#allocation4 + $0x1], 1 }
 0x4c4   :  { %2685 = vsyncpa [#allocation5], 1 }
 0x4c5   :  { %2687 = vsyncpa [#allocation5 + $0x1], 1 }
 0x4c6   :  { %2688 = vsyncpa [#allocation6], 1 }
 0x4c7   :  { %2690 = vsyncpa [#allocation6 + $0x1], 1 }

</bundles_post_ra>
